<compile_context>
chip_gen: v7x
topology: tpu7x:2x2x1
jax: 0.10.0
libtpu: 0.0.40
codegen_flags: <defaults>
</compile_context>

<pallas_src>
import numpy as np

import jax
import jax.numpy as jnp
from jax.experimental import pallas as pl


# ---------------------------------------------------------------------------
# Host-side one-time prepacking helpers (numpy; NOT on the per-forward path)
# ---------------------------------------------------------------------------
def _make_selcat(H, W, in_cols, kh, kw, stride, pad):
    """0/1 gather matrix for one conv layer.

    Row (g * orp + oh * OW + ow) selects input pixel
    (oh*stride - pad + i, ow*stride - pad + j) for kernel tap g = i*kw + j
    (all-zero row when the tap falls in the zero padding). Rows are grouped in
    blocks of `orp` (OH*OW rounded up to a multiple of 8) so every in-kernel
    slice is sublane-aligned.
    """
    OH = (H + 2 * pad - kh) // stride + 1
    OW = (W + 2 * pad - kw) // stride + 1
    ohw = OH * OW
    orp = ((ohw + 7) // 8) * 8
    sel = np.zeros((kh * kw * orp, in_cols), np.float32)
    for i in range(kh):
        for j in range(kw):
            g = i * kw + j
            for oh in range(OH):
                h = oh * stride - pad + i
                if h < 0 or h >= H:
                    continue
                for ow in range(OW):
                    w = ow * stride - pad + j
                    if w < 0 or w >= W:
                        continue
                    sel[g * orp + oh * OW + ow, h * W + w] = 1.0
    return sel, OH, OW, orp


def _pack_weight(w_oihw, batch):
    """PyTorch (Cout, Cin, KH, KW) -> (KH*KW, B*Cin, B*Cout), block-diag over batch.

    Activation columns are laid out as b*C + c, so kron(I_B, W_tap) applies the
    same per-tap weight independently to every batch element in one dot.
    """
    w_np = np.asarray(w_oihw, np.float32)
    _, _, kh, kw = w_np.shape
    eye = np.eye(batch, dtype=np.float32)
    taps = []
    for i in range(kh):
        for j in range(kw):
            taps.append(np.kron(eye, w_np[:, :, i, j].T))  # (B*Cin, B*Cout)
    return np.stack(taps, axis=0)


# ---------------------------------------------------------------------------
# Pallas kernel: the whole discriminator forward, fused in one call
# ---------------------------------------------------------------------------
def _make_kernel(main_cfg, head1_cfg, head2_cfg):
    n_main = len(main_cfg)

    def _conv(sel_ref, w_ref, a, orp, kk):
        # Gather-as-matmul: t[g*orp + m, :] holds the input pixel feeding tap g
        # of output pixel m (or zeros for padding). Then accumulate over taps.
        t = jnp.dot(sel_ref[...], a, preferred_element_type=jnp.float32)
        o = jnp.dot(t[:orp, :], w_ref[0], preferred_element_type=jnp.float32)
        for g in range(1, kk):
            o = o + jnp.dot(t[g * orp:(g + 1) * orp, :], w_ref[g],
                            preferred_element_type=jnp.float32)
        return o

    def kernel(*refs):
        x_ref = refs[0]
        out_src_ref, out_cls_ref = refs[-2], refs[-1]

        a = x_ref[...]                                   # (H*W, B*Cin) f32
        p = 1
        # --- trunk: Conv(k=4, s=2, p=1) + LeakyReLU(0.01) ---
        for li in range(n_main):
            sel_ref, w_ref, b_ref = refs[p], refs[p + 1], refs[p + 2]
            p += 3
            orp, kk = main_cfg[li]
            o = _conv(sel_ref, w_ref, a, orp, kk) + b_ref[...]
            a = jnp.where(o >= 0.0, o, 0.01 * o)         # LeakyReLU(0.01)

        # --- head 1: Conv(k=3, s=1, p=1), no bias -> out_src ---
        sel_ref, w_ref = refs[p], refs[p + 1]
        p += 2
        out_src_ref[...] = _conv(sel_ref, w_ref, a, *head1_cfg)

        # --- head 2: Conv(full-spatial kernel, no pad), no bias -> out_cls ---
        sel_ref, w_ref = refs[p], refs[p + 1]
        out_cls_ref[...] = _conv(sel_ref, w_ref, a, *head2_cfg)

    return kernel


# ---------------------------------------------------------------------------
# Forward builder: prepack once, return a jitted forward(x)
# ---------------------------------------------------------------------------
def build_forward(params, *, image_size, batch):
    B = batch
    arrays = []       # extra kernel inputs, in kernel-argument order
    main_cfg = []     # static (orp, kk) per trunk layer

    H = W = image_size
    rows = H * W      # row count (= in_cols) of the current activation matrix

    for (w, b) in params["main"]:
        w_np = np.asarray(w, np.float32)
        kh, kw = int(w_np.shape[2]), int(w_np.shape[3])
        sel, OH, OW, orp = _make_selcat(H, W, rows, kh, kw, stride=2, pad=1)
        arrays += [sel,
                   _pack_weight(w_np, B),
                   np.tile(np.asarray(b, np.float32), B)[None, :]]
        main_cfg.append((orp, kh * kw))
        H, W, rows = OH, OW, orp

    # conv1 head: k=3, s=1, p=1, no bias
    w1_np = np.asarray(params["conv1_w"], np.float32)
    sel1, OH1, OW1, orp1 = _make_selcat(H, W, rows, int(w1_np.shape[2]),
                                        int(w1_np.shape[3]), stride=1, pad=1)
    arrays += [sel1, _pack_weight(w1_np, B)]
    head1_cfg = (orp1, int(w1_np.shape[2]) * int(w1_np.shape[3]))
    cout1, ohw1 = int(w1_np.shape[0]), OH1 * OW1

    # conv2 head: kernel covers the full feature map, no pad, no bias
    w2_np = np.asarray(params["conv2_w"], np.float32)
    sel2, OH2, OW2, orp2 = _make_selcat(H, W, rows, int(w2_np.shape[2]),
                                        int(w2_np.shape[3]), stride=1, pad=0)
    assert OH2 == 1 and OW2 == 1, "conv2 kernel must cover the full feature map"
    arrays += [sel2, _pack_weight(w2_np, B)]
    head2_cfg = (orp2, int(w2_np.shape[2]) * int(w2_np.shape[3]))
    c_dim = int(w2_np.shape[0])

    arrays = tuple(jnp.asarray(a) for a in arrays)
    kernel = _make_kernel(tuple(main_cfg), head1_cfg, head2_cfg)

    out_shapes = (jax.ShapeDtypeStruct((orp1, B * cout1), jnp.float32),   # out_src
                  jax.ShapeDtypeStruct((orp2, B * c_dim), jnp.float32))   # out_cls

    def _forward(x, packed):
        bx, cin, hin, win = x.shape
        if bx != B:
            raise ValueError(f"forward was packed for batch={B}, got {bx}")
        # Single boundary layout op: NCHW -> (pixels, batch*channels)
        a0 = jnp.transpose(x, (2, 3, 0, 1)).reshape(hin * win, bx * cin)
        a0 = a0.astype(jnp.float32)

        out_src2d, out_cls2d = pl.pallas_call(
            kernel,
            out_shape=out_shapes,   # no grid: whole arrays live in VMEM
        )(a0, *packed)

        out_src = out_src2d[:ohw1, :].T.reshape(bx, cout1, OH1, OW1)  # NCHW
        out_cls = out_cls2d[0:1, :].reshape(bx, c_dim)
        return out_src, out_cls, None

    fwd = jax.jit(_forward)
    return lambda x: fwd(x, arrays)


# ---------------------------------------------------------------------------
# Parameter init (matches origin_Discriminator structure)
# ---------------------------------------------------------------------------
def init_params(key, image_size=16, conv_dim=8, c_dim=7, repeat_num=2):
    keys = jax.random.split(key, 2 * repeat_num + 2)
    params = {"main": []}
    in_c = 3
    out_c = conv_dim
    k = 0
    for _ in range(repeat_num):
        w = 0.05 * jax.random.normal(keys[k], (out_c, in_c, 4, 4), jnp.float32); k += 1
        b = 0.05 * jax.random.normal(keys[k], (out_c,), jnp.float32); k += 1
        params["main"].append((w, b))
        in_c, out_c = out_c, out_c * 2
    curr_dim = in_c
    final_k = image_size // (2 ** repeat_num)
    params["conv1_w"] = 0.05 * jax.random.normal(keys[k], (1, curr_dim, 3, 3), jnp.float32); k += 1
    params["conv2_w"] = 0.05 * jax.random.normal(keys[k], (c_dim, curr_dim, final_k, final_k),
                                                 jnp.float32)
    return params


def _reference_forward(x, params):
    """Pure-JAX reference (lax.conv) to validate the Pallas path."""
    dn = ("NCHW", "OIHW", "NCHW")
    h = x
    for (w, b) in params["main"]:
        h = jax.lax.conv_general_dilated(h, w, (2, 2), [(1, 1), (1, 1)],
                                         dimension_numbers=dn)
        h = h + b[None, :, None, None]
        h = jnp.where(h >= 0, h, 0.01 * h)
    src = jax.lax.conv_general_dilated(h, params["conv1_w"], (1, 1), [(1, 1), (1, 1)],
                                       dimension_numbers=dn)
    cls = jax.lax.conv_general_dilated(h, params["conv2_w"], (1, 1), [(0, 0), (0, 0)],
                                       dimension_numbers=dn)
    return src, cls.reshape(cls.shape[0], cls.shape[1])


if __name__ == "__main__":
    # Small-shape instantiation consistent with the module's structure:
    # image_size=16, conv_dim=8, c_dim=7, repeat_num=2 -> conv2 kernel_size = 4
    key = jax.random.PRNGKey(0)
    pkey, xkey = jax.random.split(key)
    params = init_params(pkey, image_size=16, conv_dim=8, c_dim=7, repeat_num=2)
    x = jax.random.normal(xkey, (2, 3, 16, 16), jnp.float32)

    forward = build_forward(params, image_size=16, batch=2)
    out_src, out_cls, out_none = forward(x)
    jax.block_until_ready(out_src)
    jax.block_until_ready(out_cls)

    assert out_src.shape == (2, 1, 4, 4), out_src.shape
    assert out_cls.shape == (2, 7), out_cls.shape
    assert out_none is None

    ref_src, ref_cls = _reference_forward(x, params)
    assert jnp.allclose(out_src, ref_src, atol=1e-4), "out_src mismatch vs reference"
    assert jnp.allclose(out_cls, ref_cls, atol=1e-4), "out_cls mismatch vs reference"

    print("KERNEL_OK")
</pallas_src>

<mosaic_0001>
module attributes {stable_mosaic.version = 11 : i64} {
  func.func @kernel(%arg0: memref<256x6xf32, #tpu.memory_space<vmem>>, %arg1: memref<1024x256xf32, #tpu.memory_space<vmem>>, %arg2: memref<16x6x16xf32, #tpu.memory_space<vmem>>, %arg3: memref<1x16xf32, #tpu.memory_space<vmem>>, %arg4: memref<256x64xf32, #tpu.memory_space<vmem>>, %arg5: memref<16x16x32xf32, #tpu.memory_space<vmem>>, %arg6: memref<1x32xf32, #tpu.memory_space<vmem>>, %arg7: memref<144x16xf32, #tpu.memory_space<vmem>>, %arg8: memref<9x32x2xf32, #tpu.memory_space<vmem>>, %arg9: memref<128x16xf32, #tpu.memory_space<vmem>>, %arg10: memref<16x32x14xf32, #tpu.memory_space<vmem>>, %arg11: memref<16x2xf32, #tpu.memory_space<vmem>>, %arg12: memref<8x14xf32, #tpu.memory_space<vmem>>) attributes {dimension_semantics = [], scalar_prefetch = 0 : i64, scratch_operands = 0 : i64, tpu.core_type = #tpu.core_type<tc>} {
    %c0 = arith.constant 0 : index
    %c0_0 = arith.constant 0 : index
    %0 = vector.load %arg0[%c0, %c0_0] : memref<256x6xf32, #tpu.memory_space<vmem>>, vector<256x6xf32>
    %c0_1 = arith.constant 0 : index
    %c0_2 = arith.constant 0 : index
    %1 = vector.load %arg1[%c0_1, %c0_2] : memref<1024x256xf32, #tpu.memory_space<vmem>>, vector<1024x256xf32>
    %cst = arith.constant dense<0.000000e+00> : vector<1024x6xf32>
    %2 = tpu.matmul %1, %0, %cst {dimension_numbers = #tpu.dot_dimension_numbers<[1], [0], [0], [1], [0, 0, 1, 1], [], []>} : vector<1024x256xf32>, vector<256x6xf32>, vector<1024x6xf32> -> vector<1024x6xf32>
    %3 = vector.extract_strided_slice %2 {offsets = [0, 0], sizes = [64, 6], strides = [1, 1]} : vector<1024x6xf32> to vector<64x6xf32>
    %c0_3 = arith.constant 0 : index
    %c0_4 = arith.constant 0 : index
    %c0_5 = arith.constant 0 : index
    %4 = vector.load %arg2[%c0_3, %c0_4, %c0_5] : memref<16x6x16xf32, #tpu.memory_space<vmem>>, vector<1x6x16xf32>
    %5 = vector.shape_cast %4 : vector<1x6x16xf32> to vector<6x16xf32>
    %cst_6 = arith.constant dense<0.000000e+00> : vector<64x16xf32>
    %6 = tpu.matmul %3, %5, %cst_6 {dimension_numbers = #tpu.dot_dimension_numbers<[1], [0], [0], [1], [0, 0, 1, 1], [], []>} : vector<64x6xf32>, vector<6x16xf32>, vector<64x16xf32> -> vector<64x16xf32>
    %7 = vector.extract_strided_slice %2 {offsets = [64, 0], sizes = [64, 6], strides = [1, 1]} : vector<1024x6xf32> to vector<64x6xf32>
    %c1 = arith.constant 1 : index
    %c0_7 = arith.constant 0 : index
    %c0_8 = arith.constant 0 : index
    %8 = vector.load %arg2[%c1, %c0_7, %c0_8] : memref<16x6x16xf32, #tpu.memory_space<vmem>>, vector<1x6x16xf32>
    %9 = vector.shape_cast %8 : vector<1x6x16xf32> to vector<6x16xf32>
    %cst_9 = arith.constant dense<0.000000e+00> : vector<64x16xf32>
    %10 = tpu.matmul %7, %9, %cst_9 {dimension_numbers = #tpu.dot_dimension_numbers<[1], [0], [0], [1], [0, 0, 1, 1], [], []>} : vector<64x6xf32>, vector<6x16xf32>, vector<64x16xf32> -> vector<64x16xf32>
    %11 = arith.addf %6, %10 : vector<64x16xf32>
    %12 = vector.extract_strided_slice %2 {offsets = [128, 0], sizes = [64, 6], strides = [1, 1]} : vector<1024x6xf32> to vector<64x6xf32>
    %c2 = arith.constant 2 : index
    %c0_10 = arith.constant 0 : index
    %c0_11 = arith.constant 0 : index
    %13 = vector.load %arg2[%c2, %c0_10, %c0_11] : memref<16x6x16xf32, #tpu.memory_space<vmem>>, vector<1x6x16xf32>
    %14 = vector.shape_cast %13 : vector<1x6x16xf32> to vector<6x16xf32>
    %cst_12 = arith.constant dense<0.000000e+00> : vector<64x16xf32>
    %15 = tpu.matmul %12, %14, %cst_12 {dimension_numbers = #tpu.dot_dimension_numbers<[1], [0], [0], [1], [0, 0, 1, 1], [], []>} : vector<64x6xf32>, vector<6x16xf32>, vector<64x16xf32> -> vector<64x16xf32>
    %16 = arith.addf %11, %15 : vector<64x16xf32>
    %17 = vector.extract_strided_slice %2 {offsets = [192, 0], sizes = [64, 6], strides = [1, 1]} : vector<1024x6xf32> to vector<64x6xf32>
    %c3 = arith.constant 3 : index
    %c0_13 = arith.constant 0 : index
    %c0_14 = arith.constant 0 : index
    %18 = vector.load %arg2[%c3, %c0_13, %c0_14] : memref<16x6x16xf32, #tpu.memory_space<vmem>>, vector<1x6x16xf32>
    %19 = vector.shape_cast %18 : vector<1x6x16xf32> to vector<6x16xf32>
    %cst_15 = arith.constant dense<0.000000e+00> : vector<64x16xf32>
    %20 = tpu.matmul %17, %19, %cst_15 {dimension_numbers = #tpu.dot_dimension_numbers<[1], [0], [0], [1], [0, 0, 1, 1], [], []>} : vector<64x6xf32>, vector<6x16xf32>, vector<64x16xf32> -> vector<64x16xf32>
    %21 = arith.addf %16, %20 : vector<64x16xf32>
    %22 = vector.extract_strided_slice %2 {offsets = [256, 0], sizes = [64, 6], strides = [1, 1]} : vector<1024x6xf32> to vector<64x6xf32>
    %c4 = arith.constant 4 : index
    %c0_16 = arith.constant 0 : index
    %c0_17 = arith.constant 0 : index
    %23 = vector.load %arg2[%c4, %c0_16, %c0_17] : memref<16x6x16xf32, #tpu.memory_space<vmem>>, vector<1x6x16xf32>
    %24 = vector.shape_cast %23 : vector<1x6x16xf32> to vector<6x16xf32>
    %cst_18 = arith.constant dense<0.000000e+00> : vector<64x16xf32>
    %25 = tpu.matmul %22, %24, %cst_18 {dimension_numbers = #tpu.dot_dimension_numbers<[1], [0], [0], [1], [0, 0, 1, 1], [], []>} : vector<64x6xf32>, vector<6x16xf32>, vector<64x16xf32> -> vector<64x16xf32>
    %26 = arith.addf %21, %25 : vector<64x16xf32>
    %27 = vector.extract_strided_slice %2 {offsets = [320, 0], sizes = [64, 6], strides = [1, 1]} : vector<1024x6xf32> to vector<64x6xf32>
    %c5 = arith.constant 5 : index
    %c0_19 = arith.constant 0 : index
    %c0_20 = arith.constant 0 : index
    %28 = vector.load %arg2[%c5, %c0_19, %c0_20] : memref<16x6x16xf32, #tpu.memory_space<vmem>>, vector<1x6x16xf32>
    %29 = vector.shape_cast %28 : vector<1x6x16xf32> to vector<6x16xf32>
    %cst_21 = arith.constant dense<0.000000e+00> : vector<64x16xf32>
    %30 = tpu.matmul %27, %29, %cst_21 {dimension_numbers = #tpu.dot_dimension_numbers<[1], [0], [0], [1], [0, 0, 1, 1], [], []>} : vector<64x6xf32>, vector<6x16xf32>, vector<64x16xf32> -> vector<64x16xf32>
    %31 = arith.addf %26, %30 : vector<64x16xf32>
    %32 = vector.extract_strided_slice %2 {offsets = [384, 0], sizes = [64, 6], strides = [1, 1]} : vector<1024x6xf32> to vector<64x6xf32>
    %c6 = arith.constant 6 : index
    %c0_22 = arith.constant 0 : index
    %c0_23 = arith.constant 0 : index
    %33 = vector.load %arg2[%c6, %c0_22, %c0_23] : memref<16x6x16xf32, #tpu.memory_space<vmem>>, vector<1x6x16xf32>
    %34 = vector.shape_cast %33 : vector<1x6x16xf32> to vector<6x16xf32>
    %cst_24 = arith.constant dense<0.000000e+00> : vector<64x16xf32>
    %35 = tpu.matmul %32, %34, %cst_24 {dimension_numbers = #tpu.dot_dimension_numbers<[1], [0], [0], [1], [0, 0, 1, 1], [], []>} : vector<64x6xf32>, vector<6x16xf32>, vector<64x16xf32> -> vector<64x16xf32>
    %36 = arith.addf %31, %35 : vector<64x16xf32>
    %37 = vector.extract_strided_slice %2 {offsets = [448, 0], sizes = [64, 6], strides = [1, 1]} : vector<1024x6xf32> to vector<64x6xf32>
    %c7 = arith.constant 7 : index
    %c0_25 = arith.constant 0 : index
    %c0_26 = arith.constant 0 : index
    %38 = vector.load %arg2[%c7, %c0_25, %c0_26] : memref<16x6x16xf32, #tpu.memory_space<vmem>>, vector<1x6x16xf32>
    %39 = vector.shape_cast %38 : vector<1x6x16xf32> to vector<6x16xf32>
    %cst_27 = arith.constant dense<0.000000e+00> : vector<64x16xf32>
    %40 = tpu.matmul %37, %39, %cst_27 {dimension_numbers = #tpu.dot_dimension_numbers<[1], [0], [0], [1], [0, 0, 1, 1], [], []>} : vector<64x6xf32>, vector<6x16xf32>, vector<64x16xf32> -> vector<64x16xf32>
    %41 = arith.addf %36, %40 : vector<64x16xf32>
    %42 = vector.extract_strided_slice %2 {offsets = [512, 0], sizes = [64, 6], strides = [1, 1]} : vector<1024x6xf32> to vector<64x6xf32>
    %c8 = arith.constant 8 : index
    %c0_28 = arith.constant 0 : index
    %c0_29 = arith.constant 0 : index
    %43 = vector.load %arg2[%c8, %c0_28, %c0_29] : memref<16x6x16xf32, #tpu.memory_space<vmem>>, vector<1x6x16xf32>
    %44 = vector.shape_cast %43 : vector<1x6x16xf32> to vector<6x16xf32>
    %cst_30 = arith.constant dense<0.000000e+00> : vector<64x16xf32>
    %45 = tpu.matmul %42, %44, %cst_30 {dimension_numbers = #tpu.dot_dimension_numbers<[1], [0], [0], [1], [0, 0, 1, 1], [], []>} : vector<64x6xf32>, vector<6x16xf32>, vector<64x16xf32> -> vector<64x16xf32>
    %46 = arith.addf %41, %45 : vector<64x16xf32>
    %47 = vector.extract_strided_slice %2 {offsets = [576, 0], sizes = [64, 6], strides = [1, 1]} : vector<1024x6xf32> to vector<64x6xf32>
    %c9 = arith.constant 9 : index
    %c0_31 = arith.constant 0 : index
    %c0_32 = arith.constant 0 : index
    %48 = vector.load %arg2[%c9, %c0_31, %c0_32] : memref<16x6x16xf32, #tpu.memory_space<vmem>>, vector<1x6x16xf32>
    %49 = vector.shape_cast %48 : vector<1x6x16xf32> to vector<6x16xf32>
    %cst_33 = arith.constant dense<0.000000e+00> : vector<64x16xf32>
    %50 = tpu.matmul %47, %49, %cst_33 {dimension_numbers = #tpu.dot_dimension_numbers<[1], [0], [0], [1], [0, 0, 1, 1], [], []>} : vector<64x6xf32>, vector<6x16xf32>, vector<64x16xf32> -> vector<64x16xf32>
    %51 = arith.addf %46, %50 : vector<64x16xf32>
    %52 = vector.extract_strided_slice %2 {offsets = [640, 0], sizes = [64, 6], strides = [1, 1]} : vector<1024x6xf32> to vector<64x6xf32>
    %c10 = arith.constant 10 : index
    %c0_34 = arith.constant 0 : index
    %c0_35 = arith.constant 0 : index
    %53 = vector.load %arg2[%c10, %c0_34, %c0_35] : memref<16x6x16xf32, #tpu.memory_space<vmem>>, vector<1x6x16xf32>
    %54 = vector.shape_cast %53 : vector<1x6x16xf32> to vector<6x16xf32>
    %cst_36 = arith.constant dense<0.000000e+00> : vector<64x16xf32>
    %55 = tpu.matmul %52, %54, %cst_36 {dimension_numbers = #tpu.dot_dimension_numbers<[1], [0], [0], [1], [0, 0, 1, 1], [], []>} : vector<64x6xf32>, vector<6x16xf32>, vector<64x16xf32> -> vector<64x16xf32>
    %56 = arith.addf %51, %55 : vector<64x16xf32>
    %57 = vector.extract_strided_slice %2 {offsets = [704, 0], sizes = [64, 6], strides = [1, 1]} : vector<1024x6xf32> to vector<64x6xf32>
    %c11 = arith.constant 11 : index
    %c0_37 = arith.constant 0 : index
    %c0_38 = arith.constant 0 : index
    %58 = vector.load %arg2[%c11, %c0_37, %c0_38] : memref<16x6x16xf32, #tpu.memory_space<vmem>>, vector<1x6x16xf32>
    %59 = vector.shape_cast %58 : vector<1x6x16xf32> to vector<6x16xf32>
    %cst_39 = arith.constant dense<0.000000e+00> : vector<64x16xf32>
    %60 = tpu.matmul %57, %59, %cst_39 {dimension_numbers = #tpu.dot_dimension_numbers<[1], [0], [0], [1], [0, 0, 1, 1], [], []>} : vector<64x6xf32>, vector<6x16xf32>, vector<64x16xf32> -> vector<64x16xf32>
    %61 = arith.addf %56, %60 : vector<64x16xf32>
    %62 = vector.extract_strided_slice %2 {offsets = [768, 0], sizes = [64, 6], strides = [1, 1]} : vector<1024x6xf32> to vector<64x6xf32>
    %c12 = arith.constant 12 : index
    %c0_40 = arith.constant 0 : index
    %c0_41 = arith.constant 0 : index
    %63 = vector.load %arg2[%c12, %c0_40, %c0_41] : memref<16x6x16xf32, #tpu.memory_space<vmem>>, vector<1x6x16xf32>
    %64 = vector.shape_cast %63 : vector<1x6x16xf32> to vector<6x16xf32>
    %cst_42 = arith.constant dense<0.000000e+00> : vector<64x16xf32>
    %65 = tpu.matmul %62, %64, %cst_42 {dimension_numbers = #tpu.dot_dimension_numbers<[1], [0], [0], [1], [0, 0, 1, 1], [], []>} : vector<64x6xf32>, vector<6x16xf32>, vector<64x16xf32> -> vector<64x16xf32>
    %66 = arith.addf %61, %65 : vector<64x16xf32>
    %67 = vector.extract_strided_slice %2 {offsets = [832, 0], sizes = [64, 6], strides = [1, 1]} : vector<1024x6xf32> to vector<64x6xf32>
    %c13 = arith.constant 13 : index
    %c0_43 = arith.constant 0 : index
    %c0_44 = arith.constant 0 : index
    %68 = vector.load %arg2[%c13, %c0_43, %c0_44] : memref<16x6x16xf32, #tpu.memory_space<vmem>>, vector<1x6x16xf32>
    %69 = vector.shape_cast %68 : vector<1x6x16xf32> to vector<6x16xf32>
    %cst_45 = arith.constant dense<0.000000e+00> : vector<64x16xf32>
    %70 = tpu.matmul %67, %69, %cst_45 {dimension_numbers = #tpu.dot_dimension_numbers<[1], [0], [0], [1], [0, 0, 1, 1], [], []>} : vector<64x6xf32>, vector<6x16xf32>, vector<64x16xf32> -> vector<64x16xf32>
    %71 = arith.addf %66, %70 : vector<64x16xf32>
    %72 = vector.extract_strided_slice %2 {offsets = [896, 0], sizes = [64, 6], strides = [1, 1]} : vector<1024x6xf32> to vector<64x6xf32>
    %c14 = arith.constant 14 : index
    %c0_46 = arith.constant 0 : index
    %c0_47 = arith.constant 0 : index
    %73 = vector.load %arg2[%c14, %c0_46, %c0_47] : memref<16x6x16xf32, #tpu.memory_space<vmem>>, vector<1x6x16xf32>
    %74 = vector.shape_cast %73 : vector<1x6x16xf32> to vector<6x16xf32>
    %cst_48 = arith.constant dense<0.000000e+00> : vector<64x16xf32>
    %75 = tpu.matmul %72, %74, %cst_48 {dimension_numbers = #tpu.dot_dimension_numbers<[1], [0], [0], [1], [0, 0, 1, 1], [], []>} : vector<64x6xf32>, vector<6x16xf32>, vector<64x16xf32> -> vector<64x16xf32>
    %76 = arith.addf %71, %75 : vector<64x16xf32>
    %77 = vector.extract_strided_slice %2 {offsets = [960, 0], sizes = [64, 6], strides = [1, 1]} : vector<1024x6xf32> to vector<64x6xf32>
    %c15 = arith.constant 15 : index
    %c0_49 = arith.constant 0 : index
    %c0_50 = arith.constant 0 : index
    %78 = vector.load %arg2[%c15, %c0_49, %c0_50] : memref<16x6x16xf32, #tpu.memory_space<vmem>>, vector<1x6x16xf32>
    %79 = vector.shape_cast %78 : vector<1x6x16xf32> to vector<6x16xf32>
    %cst_51 = arith.constant dense<0.000000e+00> : vector<64x16xf32>
    %80 = tpu.matmul %77, %79, %cst_51 {dimension_numbers = #tpu.dot_dimension_numbers<[1], [0], [0], [1], [0, 0, 1, 1], [], []>} : vector<64x6xf32>, vector<6x16xf32>, vector<64x16xf32> -> vector<64x16xf32>
    %81 = arith.addf %76, %80 : vector<64x16xf32>
    %c0_52 = arith.constant 0 : index
    %c0_53 = arith.constant 0 : index
    %82 = vector.load %arg3[%c0_52, %c0_53] : memref<1x16xf32, #tpu.memory_space<vmem>>, vector<1x16xf32>
    %83 = vector.broadcast %82 : vector<1x16xf32> to vector<64x16xf32>
    %84 = arith.addf %81, %83 : vector<64x16xf32>
    %cst_54 = arith.constant 0.000000e+00 : f32
    %85 = vector.broadcast %cst_54 : f32 to vector<64x16xf32>
    %86 = arith.cmpf oge, %84, %85 : vector<64x16xf32>
    %cst_55 = arith.constant 0.00999999977 : f32
    %87 = vector.broadcast %cst_55 : f32 to vector<64x16xf32>
    %88 = arith.mulf %87, %84 : vector<64x16xf32>
    %89 = arith.select %86, %84, %88 : vector<64x16xi1>, vector<64x16xf32>
    %c0_56 = arith.constant 0 : index
    %c0_57 = arith.constant 0 : index
    %90 = vector.load %arg4[%c0_56, %c0_57] : memref<256x64xf32, #tpu.memory_space<vmem>>, vector<256x64xf32>
    %cst_58 = arith.constant dense<0.000000e+00> : vector<256x16xf32>
    %91 = tpu.matmul %90, %89, %cst_58 {dimension_numbers = #tpu.dot_dimension_numbers<[1], [0], [0], [1], [0, 0, 1, 1], [], []>} : vector<256x64xf32>, vector<64x16xf32>, vector<256x16xf32> -> vector<256x16xf32>
    %92 = vector.extract_strided_slice %91 {offsets = [0, 0], sizes = [16, 16], strides = [1, 1]} : vector<256x16xf32> to vector<16x16xf32>
    %c0_59 = arith.constant 0 : index
    %c0_60 = arith.constant 0 : index
    %c0_61 = arith.constant 0 : index
    %93 = vector.load %arg5[%c0_59, %c0_60, %c0_61] : memref<16x16x32xf32, #tpu.memory_space<vmem>>, vector<1x16x32xf32>
    %94 = vector.shape_cast %93 : vector<1x16x32xf32> to vector<16x32xf32>
    %cst_62 = arith.constant dense<0.000000e+00> : vector<16x32xf32>
    %95 = tpu.matmul %92, %94, %cst_62 {dimension_numbers = #tpu.dot_dimension_numbers<[1], [0], [0], [1], [0, 0, 1, 1], [], []>} : vector<16x16xf32>, vector<16x32xf32>, vector<16x32xf32> -> vector<16x32xf32>
    %96 = vector.extract_strided_slice %91 {offsets = [16, 0], sizes = [16, 16], strides = [1, 1]} : vector<256x16xf32> to vector<16x16xf32>
    %c1_63 = arith.constant 1 : index
    %c0_64 = arith.constant 0 : index
    %c0_65 = arith.constant 0 : index
    %97 = vector.load %arg5[%c1_63, %c0_64, %c0_65] : memref<16x16x32xf32, #tpu.memory_space<vmem>>, vector<1x16x32xf32>
    %98 = vector.shape_cast %97 : vector<1x16x32xf32> to vector<16x32xf32>
    %cst_66 = arith.constant dense<0.000000e+00> : vector<16x32xf32>
    %99 = tpu.matmul %96, %98, %cst_66 {dimension_numbers = #tpu.dot_dimension_numbers<[1], [0], [0], [1], [0, 0, 1, 1], [], []>} : vector<16x16xf32>, vector<16x32xf32>, vector<16x32xf32> -> vector<16x32xf32>
    %100 = arith.addf %95, %99 : vector<16x32xf32>
    %101 = vector.extract_strided_slice %91 {offsets = [32, 0], sizes = [16, 16], strides = [1, 1]} : vector<256x16xf32> to vector<16x16xf32>
    %c2_67 = arith.constant 2 : index
    %c0_68 = arith.constant 0 : index
    %c0_69 = arith.constant 0 : index
    %102 = vector.load %arg5[%c2_67, %c0_68, %c0_69] : memref<16x16x32xf32, #tpu.memory_space<vmem>>, vector<1x16x32xf32>
    %103 = vector.shape_cast %102 : vector<1x16x32xf32> to vector<16x32xf32>
    %cst_70 = arith.constant dense<0.000000e+00> : vector<16x32xf32>
    %104 = tpu.matmul %101, %103, %cst_70 {dimension_numbers = #tpu.dot_dimension_numbers<[1], [0], [0], [1], [0, 0, 1, 1], [], []>} : vector<16x16xf32>, vector<16x32xf32>, vector<16x32xf32> -> vector<16x32xf32>
    %105 = arith.addf %100, %104 : vector<16x32xf32>
    %106 = vector.extract_strided_slice %91 {offsets = [48, 0], sizes = [16, 16], strides = [1, 1]} : vector<256x16xf32> to vector<16x16xf32>
    %c3_71 = arith.constant 3 : index
    %c0_72 = arith.constant 0 : index
    %c0_73 = arith.constant 0 : index
    %107 = vector.load %arg5[%c3_71, %c0_72, %c0_73] : memref<16x16x32xf32, #tpu.memory_space<vmem>>, vector<1x16x32xf32>
    %108 = vector.shape_cast %107 : vector<1x16x32xf32> to vector<16x32xf32>
    %cst_74 = arith.constant dense<0.000000e+00> : vector<16x32xf32>
    %109 = tpu.matmul %106, %108, %cst_74 {dimension_numbers = #tpu.dot_dimension_numbers<[1], [0], [0], [1], [0, 0, 1, 1], [], []>} : vector<16x16xf32>, vector<16x32xf32>, vector<16x32xf32> -> vector<16x32xf32>
    %110 = arith.addf %105, %109 : vector<16x32xf32>
    %111 = vector.extract_strided_slice %91 {offsets = [64, 0], sizes = [16, 16], strides = [1, 1]} : vector<256x16xf32> to vector<16x16xf32>
    %c4_75 = arith.constant 4 : index
    %c0_76 = arith.constant 0 : index
    %c0_77 = arith.constant 0 : index
    %112 = vector.load %arg5[%c4_75, %c0_76, %c0_77] : memref<16x16x32xf32, #tpu.memory_space<vmem>>, vector<1x16x32xf32>
    %113 = vector.shape_cast %112 : vector<1x16x32xf32> to vector<16x32xf32>
    %cst_78 = arith.constant dense<0.000000e+00> : vector<16x32xf32>
    %114 = tpu.matmul %111, %113, %cst_78 {dimension_numbers = #tpu.dot_dimension_numbers<[1], [0], [0], [1], [0, 0, 1, 1], [], []>} : vector<16x16xf32>, vector<16x32xf32>, vector<16x32xf32> -> vector<16x32xf32>
    %115 = arith.addf %110, %114 : vector<16x32xf32>
    %116 = vector.extract_strided_slice %91 {offsets = [80, 0], sizes = [16, 16], strides = [1, 1]} : vector<256x16xf32> to vector<16x16xf32>
    %c5_79 = arith.constant 5 : index
    %c0_80 = arith.constant 0 : index
    %c0_81 = arith.constant 0 : index
    %117 = vector.load %arg5[%c5_79, %c0_80, %c0_81] : memref<16x16x32xf32, #tpu.memory_space<vmem>>, vector<1x16x32xf32>
    %118 = vector.shape_cast %117 : vector<1x16x32xf32> to vector<16x32xf32>
    %cst_82 = arith.constant dense<0.000000e+00> : vector<16x32xf32>
    %119 = tpu.matmul %116, %118, %cst_82 {dimension_numbers = #tpu.dot_dimension_numbers<[1], [0], [0], [1], [0, 0, 1, 1], [], []>} : vector<16x16xf32>, vector<16x32xf32>, vector<16x32xf32> -> vector<16x32xf32>
    %120 = arith.addf %115, %119 : vector<16x32xf32>
    %121 = vector.extract_strided_slice %91 {offsets = [96, 0], sizes = [16, 16], strides = [1, 1]} : vector<256x16xf32> to vector<16x16xf32>
    %c6_83 = arith.constant 6 : index
    %c0_84 = arith.constant 0 : index
    %c0_85 = arith.constant 0 : index
    %122 = vector.load %arg5[%c6_83, %c0_84, %c0_85] : memref<16x16x32xf32, #tpu.memory_space<vmem>>, vector<1x16x32xf32>
    %123 = vector.shape_cast %122 : vector<1x16x32xf32> to vector<16x32xf32>
    %cst_86 = arith.constant dense<0.000000e+00> : vector<16x32xf32>
    %124 = tpu.matmul %121, %123, %cst_86 {dimension_numbers = #tpu.dot_dimension_numbers<[1], [0], [0], [1], [0, 0, 1, 1], [], []>} : vector<16x16xf32>, vector<16x32xf32>, vector<16x32xf32> -> vector<16x32xf32>
    %125 = arith.addf %120, %124 : vector<16x32xf32>
    %126 = vector.extract_strided_slice %91 {offsets = [112, 0], sizes = [16, 16], strides = [1, 1]} : vector<256x16xf32> to vector<16x16xf32>
    %c7_87 = arith.constant 7 : index
    %c0_88 = arith.constant 0 : index
    %c0_89 = arith.constant 0 : index
    %127 = vector.load %arg5[%c7_87, %c0_88, %c0_89] : memref<16x16x32xf32, #tpu.memory_space<vmem>>, vector<1x16x32xf32>
    %128 = vector.shape_cast %127 : vector<1x16x32xf32> to vector<16x32xf32>
    %cst_90 = arith.constant dense<0.000000e+00> : vector<16x32xf32>
    %129 = tpu.matmul %126, %128, %cst_90 {dimension_numbers = #tpu.dot_dimension_numbers<[1], [0], [0], [1], [0, 0, 1, 1], [], []>} : vector<16x16xf32>, vector<16x32xf32>, vector<16x32xf32> -> vector<16x32xf32>
    %130 = arith.addf %125, %129 : vector<16x32xf32>
    %131 = vector.extract_strided_slice %91 {offsets = [128, 0], sizes = [16, 16], strides = [1, 1]} : vector<256x16xf32> to vector<16x16xf32>
    %c8_91 = arith.constant 8 : index
    %c0_92 = arith.constant 0 : index
    %c0_93 = arith.constant 0 : index
    %132 = vector.load %arg5[%c8_91, %c0_92, %c0_93] : memref<16x16x32xf32, #tpu.memory_space<vmem>>, vector<1x16x32xf32>
    %133 = vector.shape_cast %132 : vector<1x16x32xf32> to vector<16x32xf32>
    %cst_94 = arith.constant dense<0.000000e+00> : vector<16x32xf32>
    %134 = tpu.matmul %131, %133, %cst_94 {dimension_numbers = #tpu.dot_dimension_numbers<[1], [0], [0], [1], [0, 0, 1, 1], [], []>} : vector<16x16xf32>, vector<16x32xf32>, vector<16x32xf32> -> vector<16x32xf32>
    %135 = arith.addf %130, %134 : vector<16x32xf32>
    %136 = vector.extract_strided_slice %91 {offsets = [144, 0], sizes = [16, 16], strides = [1, 1]} : vector<256x16xf32> to vector<16x16xf32>
    %c9_95 = arith.constant 9 : index
    %c0_96 = arith.constant 0 : index
    %c0_97 = arith.constant 0 : index
    %137 = vector.load %arg5[%c9_95, %c0_96, %c0_97] : memref<16x16x32xf32, #tpu.memory_space<vmem>>, vector<1x16x32xf32>
    %138 = vector.shape_cast %137 : vector<1x16x32xf32> to vector<16x32xf32>
    %cst_98 = arith.constant dense<0.000000e+00> : vector<16x32xf32>
    %139 = tpu.matmul %136, %138, %cst_98 {dimension_numbers = #tpu.dot_dimension_numbers<[1], [0], [0], [1], [0, 0, 1, 1], [], []>} : vector<16x16xf32>, vector<16x32xf32>, vector<16x32xf32> -> vector<16x32xf32>
    %140 = arith.addf %135, %139 : vector<16x32xf32>
    %141 = vector.extract_strided_slice %91 {offsets = [160, 0], sizes = [16, 16], strides = [1, 1]} : vector<256x16xf32> to vector<16x16xf32>
    %c10_99 = arith.constant 10 : index
    %c0_100 = arith.constant 0 : index
    %c0_101 = arith.constant 0 : index
    %142 = vector.load %arg5[%c10_99, %c0_100, %c0_101] : memref<16x16x32xf32, #tpu.memory_space<vmem>>, vector<1x16x32xf32>
    %143 = vector.shape_cast %142 : vector<1x16x32xf32> to vector<16x32xf32>
    %cst_102 = arith.constant dense<0.000000e+00> : vector<16x32xf32>
    %144 = tpu.matmul %141, %143, %cst_102 {dimension_numbers = #tpu.dot_dimension_numbers<[1], [0], [0], [1], [0, 0, 1, 1], [], []>} : vector<16x16xf32>, vector<16x32xf32>, vector<16x32xf32> -> vector<16x32xf32>
    %145 = arith.addf %140, %144 : vector<16x32xf32>
    %146 = vector.extract_strided_slice %91 {offsets = [176, 0], sizes = [16, 16], strides = [1, 1]} : vector<256x16xf32> to vector<16x16xf32>
    %c11_103 = arith.constant 11 : index
    %c0_104 = arith.constant 0 : index
    %c0_105 = arith.constant 0 : index
    %147 = vector.load %arg5[%c11_103, %c0_104, %c0_105] : memref<16x16x32xf32, #tpu.memory_space<vmem>>, vector<1x16x32xf32>
    %148 = vector.shape_cast %147 : vector<1x16x32xf32> to vector<16x32xf32>
    %cst_106 = arith.constant dense<0.000000e+00> : vector<16x32xf32>
    %149 = tpu.matmul %146, %148, %cst_106 {dimension_numbers = #tpu.dot_dimension_numbers<[1], [0], [0], [1], [0, 0, 1, 1], [], []>} : vector<16x16xf32>, vector<16x32xf32>, vector<16x32xf32> -> vector<16x32xf32>
    %150 = arith.addf %145, %149 : vector<16x32xf32>
    %151 = vector.extract_strided_slice %91 {offsets = [192, 0], sizes = [16, 16], strides = [1, 1]} : vector<256x16xf32> to vector<16x16xf32>
    %c12_107 = arith.constant 12 : index
    %c0_108 = arith.constant 0 : index
    %c0_109 = arith.constant 0 : index
    %152 = vector.load %arg5[%c12_107, %c0_108, %c0_109] : memref<16x16x32xf32, #tpu.memory_space<vmem>>, vector<1x16x32xf32>
    %153 = vector.shape_cast %152 : vector<1x16x32xf32> to vector<16x32xf32>
    %cst_110 = arith.constant dense<0.000000e+00> : vector<16x32xf32>
    %154 = tpu.matmul %151, %153, %cst_110 {dimension_numbers = #tpu.dot_dimension_numbers<[1], [0], [0], [1], [0, 0, 1, 1], [], []>} : vector<16x16xf32>, vector<16x32xf32>, vector<16x32xf32> -> vector<16x32xf32>
    %155 = arith.addf %150, %154 : vector<16x32xf32>
    %156 = vector.extract_strided_slice %91 {offsets = [208, 0], sizes = [16, 16], strides = [1, 1]} : vector<256x16xf32> to vector<16x16xf32>
    %c13_111 = arith.constant 13 : index
    %c0_112 = arith.constant 0 : index
    %c0_113 = arith.constant 0 : index
    %157 = vector.load %arg5[%c13_111, %c0_112, %c0_113] : memref<16x16x32xf32, #tpu.memory_space<vmem>>, vector<1x16x32xf32>
    %158 = vector.shape_cast %157 : vector<1x16x32xf32> to vector<16x32xf32>
    %cst_114 = arith.constant dense<0.000000e+00> : vector<16x32xf32>
    %159 = tpu.matmul %156, %158, %cst_114 {dimension_numbers = #tpu.dot_dimension_numbers<[1], [0], [0], [1], [0, 0, 1, 1], [], []>} : vector<16x16xf32>, vector<16x32xf32>, vector<16x32xf32> -> vector<16x32xf32>
    %160 = arith.addf %155, %159 : vector<16x32xf32>
    %161 = vector.extract_strided_slice %91 {offsets = [224, 0], sizes = [16, 16], strides = [1, 1]} : vector<256x16xf32> to vector<16x16xf32>
    %c14_115 = arith.constant 14 : index
    %c0_116 = arith.constant 0 : index
    %c0_117 = arith.constant 0 : index
    %162 = vector.load %arg5[%c14_115, %c0_116, %c0_117] : memref<16x16x32xf32, #tpu.memory_space<vmem>>, vector<1x16x32xf32>
    %163 = vector.shape_cast %162 : vector<1x16x32xf32> to vector<16x32xf32>
    %cst_118 = arith.constant dense<0.000000e+00> : vector<16x32xf32>
    %164 = tpu.matmul %161, %163, %cst_118 {dimension_numbers = #tpu.dot_dimension_numbers<[1], [0], [0], [1], [0, 0, 1, 1], [], []>} : vector<16x16xf32>, vector<16x32xf32>, vector<16x32xf32> -> vector<16x32xf32>
    %165 = arith.addf %160, %164 : vector<16x32xf32>
    %166 = vector.extract_strided_slice %91 {offsets = [240, 0], sizes = [16, 16], strides = [1, 1]} : vector<256x16xf32> to vector<16x16xf32>
    %c15_119 = arith.constant 15 : index
    %c0_120 = arith.constant 0 : index
    %c0_121 = arith.constant 0 : index
    %167 = vector.load %arg5[%c15_119, %c0_120, %c0_121] : memref<16x16x32xf32, #tpu.memory_space<vmem>>, vector<1x16x32xf32>
    %168 = vector.shape_cast %167 : vector<1x16x32xf32> to vector<16x32xf32>
    %cst_122 = arith.constant dense<0.000000e+00> : vector<16x32xf32>
    %169 = tpu.matmul %166, %168, %cst_122 {dimension_numbers = #tpu.dot_dimension_numbers<[1], [0], [0], [1], [0, 0, 1, 1], [], []>} : vector<16x16xf32>, vector<16x32xf32>, vector<16x32xf32> -> vector<16x32xf32>
    %170 = arith.addf %165, %169 : vector<16x32xf32>
    %c0_123 = arith.constant 0 : index
    %c0_124 = arith.constant 0 : index
    %171 = vector.load %arg6[%c0_123, %c0_124] : memref<1x32xf32, #tpu.memory_space<vmem>>, vector<1x32xf32>
    %172 = vector.broadcast %171 : vector<1x32xf32> to vector<16x32xf32>
    %173 = arith.addf %170, %172 : vector<16x32xf32>
    %cst_125 = arith.constant 0.000000e+00 : f32
    %174 = vector.broadcast %cst_125 : f32 to vector<16x32xf32>
    %175 = arith.cmpf oge, %173, %174 : vector<16x32xf32>
    %cst_126 = arith.constant 0.00999999977 : f32
    %176 = vector.broadcast %cst_126 : f32 to vector<16x32xf32>
    %177 = arith.mulf %176, %173 : vector<16x32xf32>
    %178 = arith.select %175, %173, %177 : vector<16x32xi1>, vector<16x32xf32>
    %c0_127 = arith.constant 0 : index
    %c0_128 = arith.constant 0 : index
    %179 = vector.load %arg7[%c0_127, %c0_128] : memref<144x16xf32, #tpu.memory_space<vmem>>, vector<144x16xf32>
    %cst_129 = arith.constant dense<0.000000e+00> : vector<144x32xf32>
    %180 = tpu.matmul %179, %178, %cst_129 {dimension_numbers = #tpu.dot_dimension_numbers<[1], [0], [0], [1], [0, 0, 1, 1], [], []>} : vector<144x16xf32>, vector<16x32xf32>, vector<144x32xf32> -> vector<144x32xf32>
    %181 = vector.extract_strided_slice %180 {offsets = [0, 0], sizes = [16, 32], strides = [1, 1]} : vector<144x32xf32> to vector<16x32xf32>
    %c0_130 = arith.constant 0 : index
    %c0_131 = arith.constant 0 : index
    %c0_132 = arith.constant 0 : index
    %182 = vector.load %arg8[%c0_130, %c0_131, %c0_132] : memref<9x32x2xf32, #tpu.memory_space<vmem>>, vector<1x32x2xf32>
    %183 = vector.shape_cast %182 : vector<1x32x2xf32> to vector<32x2xf32>
    %cst_133 = arith.constant dense<0.000000e+00> : vector<16x2xf32>
    %184 = tpu.matmul %181, %183, %cst_133 {dimension_numbers = #tpu.dot_dimension_numbers<[1], [0], [0], [1], [0, 0, 1, 1], [], []>} : vector<16x32xf32>, vector<32x2xf32>, vector<16x2xf32> -> vector<16x2xf32>
    %185 = vector.extract_strided_slice %180 {offsets = [16, 0], sizes = [16, 32], strides = [1, 1]} : vector<144x32xf32> to vector<16x32xf32>
    %c1_134 = arith.constant 1 : index
    %c0_135 = arith.constant 0 : index
    %c0_136 = arith.constant 0 : index
    %186 = vector.load %arg8[%c1_134, %c0_135, %c0_136] : memref<9x32x2xf32, #tpu.memory_space<vmem>>, vector<1x32x2xf32>
    %187 = vector.shape_cast %186 : vector<1x32x2xf32> to vector<32x2xf32>
    %cst_137 = arith.constant dense<0.000000e+00> : vector<16x2xf32>
    %188 = tpu.matmul %185, %187, %cst_137 {dimension_numbers = #tpu.dot_dimension_numbers<[1], [0], [0], [1], [0, 0, 1, 1], [], []>} : vector<16x32xf32>, vector<32x2xf32>, vector<16x2xf32> -> vector<16x2xf32>
    %189 = arith.addf %184, %188 : vector<16x2xf32>
    %190 = vector.extract_strided_slice %180 {offsets = [32, 0], sizes = [16, 32], strides = [1, 1]} : vector<144x32xf32> to vector<16x32xf32>
    %c2_138 = arith.constant 2 : index
    %c0_139 = arith.constant 0 : index
    %c0_140 = arith.constant 0 : index
    %191 = vector.load %arg8[%c2_138, %c0_139, %c0_140] : memref<9x32x2xf32, #tpu.memory_space<vmem>>, vector<1x32x2xf32>
    %192 = vector.shape_cast %191 : vector<1x32x2xf32> to vector<32x2xf32>
    %cst_141 = arith.constant dense<0.000000e+00> : vector<16x2xf32>
    %193 = tpu.matmul %190, %192, %cst_141 {dimension_numbers = #tpu.dot_dimension_numbers<[1], [0], [0], [1], [0, 0, 1, 1], [], []>} : vector<16x32xf32>, vector<32x2xf32>, vector<16x2xf32> -> vector<16x2xf32>
    %194 = arith.addf %189, %193 : vector<16x2xf32>
    %195 = vector.extract_strided_slice %180 {offsets = [48, 0], sizes = [16, 32], strides = [1, 1]} : vector<144x32xf32> to vector<16x32xf32>
    %c3_142 = arith.constant 3 : index
    %c0_143 = arith.constant 0 : index
    %c0_144 = arith.constant 0 : index
    %196 = vector.load %arg8[%c3_142, %c0_143, %c0_144] : memref<9x32x2xf32, #tpu.memory_space<vmem>>, vector<1x32x2xf32>
    %197 = vector.shape_cast %196 : vector<1x32x2xf32> to vector<32x2xf32>
    %cst_145 = arith.constant dense<0.000000e+00> : vector<16x2xf32>
    %198 = tpu.matmul %195, %197, %cst_145 {dimension_numbers = #tpu.dot_dimension_numbers<[1], [0], [0], [1], [0, 0, 1, 1], [], []>} : vector<16x32xf32>, vector<32x2xf32>, vector<16x2xf32> -> vector<16x2xf32>
    %199 = arith.addf %194, %198 : vector<16x2xf32>
    %200 = vector.extract_strided_slice %180 {offsets = [64, 0], sizes = [16, 32], strides = [1, 1]} : vector<144x32xf32> to vector<16x32xf32>
    %c4_146 = arith.constant 4 : index
    %c0_147 = arith.constant 0 : index
    %c0_148 = arith.constant 0 : index
    %201 = vector.load %arg8[%c4_146, %c0_147, %c0_148] : memref<9x32x2xf32, #tpu.memory_space<vmem>>, vector<1x32x2xf32>
    %202 = vector.shape_cast %201 : vector<1x32x2xf32> to vector<32x2xf32>
    %cst_149 = arith.constant dense<0.000000e+00> : vector<16x2xf32>
    %203 = tpu.matmul %200, %202, %cst_149 {dimension_numbers = #tpu.dot_dimension_numbers<[1], [0], [0], [1], [0, 0, 1, 1], [], []>} : vector<16x32xf32>, vector<32x2xf32>, vector<16x2xf32> -> vector<16x2xf32>
    %204 = arith.addf %199, %203 : vector<16x2xf32>
    %205 = vector.extract_strided_slice %180 {offsets = [80, 0], sizes = [16, 32], strides = [1, 1]} : vector<144x32xf32> to vector<16x32xf32>
    %c5_150 = arith.constant 5 : index
    %c0_151 = arith.constant 0 : index
    %c0_152 = arith.constant 0 : index
    %206 = vector.load %arg8[%c5_150, %c0_151, %c0_152] : memref<9x32x2xf32, #tpu.memory_space<vmem>>, vector<1x32x2xf32>
    %207 = vector.shape_cast %206 : vector<1x32x2xf32> to vector<32x2xf32>
    %cst_153 = arith.constant dense<0.000000e+00> : vector<16x2xf32>
    %208 = tpu.matmul %205, %207, %cst_153 {dimension_numbers = #tpu.dot_dimension_numbers<[1], [0], [0], [1], [0, 0, 1, 1], [], []>} : vector<16x32xf32>, vector<32x2xf32>, vector<16x2xf32> -> vector<16x2xf32>
    %209 = arith.addf %204, %208 : vector<16x2xf32>
    %210 = vector.extract_strided_slice %180 {offsets = [96, 0], sizes = [16, 32], strides = [1, 1]} : vector<144x32xf32> to vector<16x32xf32>
    %c6_154 = arith.constant 6 : index
    %c0_155 = arith.constant 0 : index
    %c0_156 = arith.constant 0 : index
    %211 = vector.load %arg8[%c6_154, %c0_155, %c0_156] : memref<9x32x2xf32, #tpu.memory_space<vmem>>, vector<1x32x2xf32>
    %212 = vector.shape_cast %211 : vector<1x32x2xf32> to vector<32x2xf32>
    %cst_157 = arith.constant dense<0.000000e+00> : vector<16x2xf32>
    %213 = tpu.matmul %210, %212, %cst_157 {dimension_numbers = #tpu.dot_dimension_numbers<[1], [0], [0], [1], [0, 0, 1, 1], [], []>} : vector<16x32xf32>, vector<32x2xf32>, vector<16x2xf32> -> vector<16x2xf32>
    %214 = arith.addf %209, %213 : vector<16x2xf32>
    %215 = vector.extract_strided_slice %180 {offsets = [112, 0], sizes = [16, 32], strides = [1, 1]} : vector<144x32xf32> to vector<16x32xf32>
    %c7_158 = arith.constant 7 : index
    %c0_159 = arith.constant 0 : index
    %c0_160 = arith.constant 0 : index
    %216 = vector.load %arg8[%c7_158, %c0_159, %c0_160] : memref<9x32x2xf32, #tpu.memory_space<vmem>>, vector<1x32x2xf32>
    %217 = vector.shape_cast %216 : vector<1x32x2xf32> to vector<32x2xf32>
    %cst_161 = arith.constant dense<0.000000e+00> : vector<16x2xf32>
    %218 = tpu.matmul %215, %217, %cst_161 {dimension_numbers = #tpu.dot_dimension_numbers<[1], [0], [0], [1], [0, 0, 1, 1], [], []>} : vector<16x32xf32>, vector<32x2xf32>, vector<16x2xf32> -> vector<16x2xf32>
    %219 = arith.addf %214, %218 : vector<16x2xf32>
    %220 = vector.extract_strided_slice %180 {offsets = [128, 0], sizes = [16, 32], strides = [1, 1]} : vector<144x32xf32> to vector<16x32xf32>
    %c8_162 = arith.constant 8 : index
    %c0_163 = arith.constant 0 : index
    %c0_164 = arith.constant 0 : index
    %221 = vector.load %arg8[%c8_162, %c0_163, %c0_164] : memref<9x32x2xf32, #tpu.memory_space<vmem>>, vector<1x32x2xf32>
    %222 = vector.shape_cast %221 : vector<1x32x2xf32> to vector<32x2xf32>
    %cst_165 = arith.constant dense<0.000000e+00> : vector<16x2xf32>
    %223 = tpu.matmul %220, %222, %cst_165 {dimension_numbers = #tpu.dot_dimension_numbers<[1], [0], [0], [1], [0, 0, 1, 1], [], []>} : vector<16x32xf32>, vector<32x2xf32>, vector<16x2xf32> -> vector<16x2xf32>
    %224 = arith.addf %219, %223 : vector<16x2xf32>
    %c0_166 = arith.constant 0 : index
    %c0_167 = arith.constant 0 : index
    %225 = vector.load %arg11[%c0_166, %c0_167] : memref<16x2xf32, #tpu.memory_space<vmem>>, vector<16x2xf32>
    tpu.vector_store %arg11[%c0_166, %c0_167], %224 {strides = array<i32>} : memref<16x2xf32, #tpu.memory_space<vmem>>, vector<16x2xf32>,
    %c0_168 = arith.constant 0 : index
    %c0_169 = arith.constant 0 : index
    %226 = vector.load %arg9[%c0_168, %c0_169] : memref<128x16xf32, #tpu.memory_space<vmem>>, vector<128x16xf32>
    %cst_170 = arith.constant dense<0.000000e+00> : vector<128x32xf32>
    %227 = tpu.matmul %226, %178, %cst_170 {dimension_numbers = #tpu.dot_dimension_numbers<[1], [0], [0], [1], [0, 0, 1, 1], [], []>} : vector<128x16xf32>, vector<16x32xf32>, vector<128x32xf32> -> vector<128x32xf32>
    %228 = vector.extract_strided_slice %227 {offsets = [0, 0], sizes = [8, 32], strides = [1, 1]} : vector<128x32xf32> to vector<8x32xf32>
    %c0_171 = arith.constant 0 : index
    %c0_172 = arith.constant 0 : index
    %c0_173 = arith.constant 0 : index
    %229 = vector.load %arg10[%c0_171, %c0_172, %c0_173] : memref<16x32x14xf32, #tpu.memory_space<vmem>>, vector<1x32x14xf32>
    %230 = vector.shape_cast %229 : vector<1x32x14xf32> to vector<32x14xf32>
    %cst_174 = arith.constant dense<0.000000e+00> : vector<8x14xf32>
    %231 = tpu.matmul %228, %230, %cst_174 {dimension_numbers = #tpu.dot_dimension_numbers<[1], [0], [0], [1], [0, 0, 1, 1], [], []>} : vector<8x32xf32>, vector<32x14xf32>, vector<8x14xf32> -> vector<8x14xf32>
    %232 = vector.extract_strided_slice %227 {offsets = [8, 0], sizes = [8, 32], strides = [1, 1]} : vector<128x32xf32> to vector<8x32xf32>
    %c1_175 = arith.constant 1 : index
    %c0_176 = arith.constant 0 : index
    %c0_177 = arith.constant 0 : index
    %233 = vector.load %arg10[%c1_175, %c0_176, %c0_177] : memref<16x32x14xf32, #tpu.memory_space<vmem>>, vector<1x32x14xf32>
    %234 = vector.shape_cast %233 : vector<1x32x14xf32> to vector<32x14xf32>
    %cst_178 = arith.constant dense<0.000000e+00> : vector<8x14xf32>
    %235 = tpu.matmul %232, %234, %cst_178 {dimension_numbers = #tpu.dot_dimension_numbers<[1], [0], [0], [1], [0, 0, 1, 1], [], []>} : vector<8x32xf32>, vector<32x14xf32>, vector<8x14xf32> -> vector<8x14xf32>
    %236 = arith.addf %231, %235 : vector<8x14xf32>
    %237 = vector.extract_strided_slice %227 {offsets = [16, 0], sizes = [8, 32], strides = [1, 1]} : vector<128x32xf32> to vector<8x32xf32>
    %c2_179 = arith.constant 2 : index
    %c0_180 = arith.constant 0 : index
    %c0_181 = arith.constant 0 : index
    %238 = vector.load %arg10[%c2_179, %c0_180, %c0_181] : memref<16x32x14xf32, #tpu.memory_space<vmem>>, vector<1x32x14xf32>
    %239 = vector.shape_cast %238 : vector<1x32x14xf32> to vector<32x14xf32>
    %cst_182 = arith.constant dense<0.000000e+00> : vector<8x14xf32>
    %240 = tpu.matmul %237, %239, %cst_182 {dimension_numbers = #tpu.dot_dimension_numbers<[1], [0], [0], [1], [0, 0, 1, 1], [], []>} : vector<8x32xf32>, vector<32x14xf32>, vector<8x14xf32> -> vector<8x14xf32>
    %241 = arith.addf %236, %240 : vector<8x14xf32>
    %242 = vector.extract_strided_slice %227 {offsets = [24, 0], sizes = [8, 32], strides = [1, 1]} : vector<128x32xf32> to vector<8x32xf32>
    %c3_183 = arith.constant 3 : index
    %c0_184 = arith.constant 0 : index
    %c0_185 = arith.constant 0 : index
    %243 = vector.load %arg10[%c3_183, %c0_184, %c0_185] : memref<16x32x14xf32, #tpu.memory_space<vmem>>, vector<1x32x14xf32>
    %244 = vector.shape_cast %243 : vector<1x32x14xf32> to vector<32x14xf32>
    %cst_186 = arith.constant dense<0.000000e+00> : vector<8x14xf32>
    %245 = tpu.matmul %242, %244, %cst_186 {dimension_numbers = #tpu.dot_dimension_numbers<[1], [0], [0], [1], [0, 0, 1, 1], [], []>} : vector<8x32xf32>, vector<32x14xf32>, vector<8x14xf32> -> vector<8x14xf32>
    %246 = arith.addf %241, %245 : vector<8x14xf32>
    %247 = vector.extract_strided_slice %227 {offsets = [32, 0], sizes = [8, 32], strides = [1, 1]} : vector<128x32xf32> to vector<8x32xf32>
    %c4_187 = arith.constant 4 : index
    %c0_188 = arith.constant 0 : index
    %c0_189 = arith.constant 0 : index
    %248 = vector.load %arg10[%c4_187, %c0_188, %c0_189] : memref<16x32x14xf32, #tpu.memory_space<vmem>>, vector<1x32x14xf32>
    %249 = vector.shape_cast %248 : vector<1x32x14xf32> to vector<32x14xf32>
    %cst_190 = arith.constant dense<0.000000e+00> : vector<8x14xf32>
    %250 = tpu.matmul %247, %249, %cst_190 {dimension_numbers = #tpu.dot_dimension_numbers<[1], [0], [0], [1], [0, 0, 1, 1], [], []>} : vector<8x32xf32>, vector<32x14xf32>, vector<8x14xf32> -> vector<8x14xf32>
    %251 = arith.addf %246, %250 : vector<8x14xf32>
    %252 = vector.extract_strided_slice %227 {offsets = [40, 0], sizes = [8, 32], strides = [1, 1]} : vector<128x32xf32> to vector<8x32xf32>
    %c5_191 = arith.constant 5 : index
    %c0_192 = arith.constant 0 : index
    %c0_193 = arith.constant 0 : index
    %253 = vector.load %arg10[%c5_191, %c0_192, %c0_193] : memref<16x32x14xf32, #tpu.memory_space<vmem>>, vector<1x32x14xf32>
    %254 = vector.shape_cast %253 : vector<1x32x14xf32> to vector<32x14xf32>
    %cst_194 = arith.constant dense<0.000000e+00> : vector<8x14xf32>
    %255 = tpu.matmul %252, %254, %cst_194 {dimension_numbers = #tpu.dot_dimension_numbers<[1], [0], [0], [1], [0, 0, 1, 1], [], []>} : vector<8x32xf32>, vector<32x14xf32>, vector<8x14xf32> -> vector<8x14xf32>
    %256 = arith.addf %251, %255 : vector<8x14xf32>
    %257 = vector.extract_strided_slice %227 {offsets = [48, 0], sizes = [8, 32], strides = [1, 1]} : vector<128x32xf32> to vector<8x32xf32>
    %c6_195 = arith.constant 6 : index
    %c0_196 = arith.constant 0 : index
    %c0_197 = arith.constant 0 : index
    %258 = vector.load %arg10[%c6_195, %c0_196, %c0_197] : memref<16x32x14xf32, #tpu.memory_space<vmem>>, vector<1x32x14xf32>
    %259 = vector.shape_cast %258 : vector<1x32x14xf32> to vector<32x14xf32>
    %cst_198 = arith.constant dense<0.000000e+00> : vector<8x14xf32>
    %260 = tpu.matmul %257, %259, %cst_198 {dimension_numbers = #tpu.dot_dimension_numbers<[1], [0], [0], [1], [0, 0, 1, 1], [], []>} : vector<8x32xf32>, vector<32x14xf32>, vector<8x14xf32> -> vector<8x14xf32>
    %261 = arith.addf %256, %260 : vector<8x14xf32>
    %262 = vector.extract_strided_slice %227 {offsets = [56, 0], sizes = [8, 32], strides = [1, 1]} : vector<128x32xf32> to vector<8x32xf32>
    %c7_199 = arith.constant 7 : index
    %c0_200 = arith.constant 0 : index
    %c0_201 = arith.constant 0 : index
    %263 = vector.load %arg10[%c7_199, %c0_200, %c0_201] : memref<16x32x14xf32, #tpu.memory_space<vmem>>, vector<1x32x14xf32>
    %264 = vector.shape_cast %263 : vector<1x32x14xf32> to vector<32x14xf32>
    %cst_202 = arith.constant dense<0.000000e+00> : vector<8x14xf32>
    %265 = tpu.matmul %262, %264, %cst_202 {dimension_numbers = #tpu.dot_dimension_numbers<[1], [0], [0], [1], [0, 0, 1, 1], [], []>} : vector<8x32xf32>, vector<32x14xf32>, vector<8x14xf32> -> vector<8x14xf32>
    %266 = arith.addf %261, %265 : vector<8x14xf32>
    %267 = vector.extract_strided_slice %227 {offsets = [64, 0], sizes = [8, 32], strides = [1, 1]} : vector<128x32xf32> to vector<8x32xf32>
    %c8_203 = arith.constant 8 : index
    %c0_204 = arith.constant 0 : index
    %c0_205 = arith.constant 0 : index
    %268 = vector.load %arg10[%c8_203, %c0_204, %c0_205] : memref<16x32x14xf32, #tpu.memory_space<vmem>>, vector<1x32x14xf32>
    %269 = vector.shape_cast %268 : vector<1x32x14xf32> to vector<32x14xf32>
    %cst_206 = arith.constant dense<0.000000e+00> : vector<8x14xf32>
    %270 = tpu.matmul %267, %269, %cst_206 {dimension_numbers = #tpu.dot_dimension_numbers<[1], [0], [0], [1], [0, 0, 1, 1], [], []>} : vector<8x32xf32>, vector<32x14xf32>, vector<8x14xf32> -> vector<8x14xf32>
    %271 = arith.addf %266, %270 : vector<8x14xf32>
    %272 = vector.extract_strided_slice %227 {offsets = [72, 0], sizes = [8, 32], strides = [1, 1]} : vector<128x32xf32> to vector<8x32xf32>
    %c9_207 = arith.constant 9 : index
    %c0_208 = arith.constant 0 : index
    %c0_209 = arith.constant 0 : index
    %273 = vector.load %arg10[%c9_207, %c0_208, %c0_209] : memref<16x32x14xf32, #tpu.memory_space<vmem>>, vector<1x32x14xf32>
    %274 = vector.shape_cast %273 : vector<1x32x14xf32> to vector<32x14xf32>
    %cst_210 = arith.constant dense<0.000000e+00> : vector<8x14xf32>
    %275 = tpu.matmul %272, %274, %cst_210 {dimension_numbers = #tpu.dot_dimension_numbers<[1], [0], [0], [1], [0, 0, 1, 1], [], []>} : vector<8x32xf32>, vector<32x14xf32>, vector<8x14xf32> -> vector<8x14xf32>
    %276 = arith.addf %271, %275 : vector<8x14xf32>
    %277 = vector.extract_strided_slice %227 {offsets = [80, 0], sizes = [8, 32], strides = [1, 1]} : vector<128x32xf32> to vector<8x32xf32>
    %c10_211 = arith.constant 10 : index
    %c0_212 = arith.constant 0 : index
    %c0_213 = arith.constant 0 : index
    %278 = vector.load %arg10[%c10_211, %c0_212, %c0_213] : memref<16x32x14xf32, #tpu.memory_space<vmem>>, vector<1x32x14xf32>
    %279 = vector.shape_cast %278 : vector<1x32x14xf32> to vector<32x14xf32>
    %cst_214 = arith.constant dense<0.000000e+00> : vector<8x14xf32>
    %280 = tpu.matmul %277, %279, %cst_214 {dimension_numbers = #tpu.dot_dimension_numbers<[1], [0], [0], [1], [0, 0, 1, 1], [], []>} : vector<8x32xf32>, vector<32x14xf32>, vector<8x14xf32> -> vector<8x14xf32>
    %281 = arith.addf %276, %280 : vector<8x14xf32>
    %282 = vector.extract_strided_slice %227 {offsets = [88, 0], sizes = [8, 32], strides = [1, 1]} : vector<128x32xf32> to vector<8x32xf32>
    %c11_215 = arith.constant 11 : index
    %c0_216 = arith.constant 0 : index
    %c0_217 = arith.constant 0 : index
    %283 = vector.load %arg10[%c11_215, %c0_216, %c0_217] : memref<16x32x14xf32, #tpu.memory_space<vmem>>, vector<1x32x14xf32>
    %284 = vector.shape_cast %283 : vector<1x32x14xf32> to vector<32x14xf32>
    %cst_218 = arith.constant dense<0.000000e+00> : vector<8x14xf32>
    %285 = tpu.matmul %282, %284, %cst_218 {dimension_numbers = #tpu.dot_dimension_numbers<[1], [0], [0], [1], [0, 0, 1, 1], [], []>} : vector<8x32xf32>, vector<32x14xf32>, vector<8x14xf32> -> vector<8x14xf32>
    %286 = arith.addf %281, %285 : vector<8x14xf32>
    %287 = vector.extract_strided_slice %227 {offsets = [96, 0], sizes = [8, 32], strides = [1, 1]} : vector<128x32xf32> to vector<8x32xf32>
    %c12_219 = arith.constant 12 : index
    %c0_220 = arith.constant 0 : index
    %c0_221 = arith.constant 0 : index
    %288 = vector.load %arg10[%c12_219, %c0_220, %c0_221] : memref<16x32x14xf32, #tpu.memory_space<vmem>>, vector<1x32x14xf32>
    %289 = vector.shape_cast %288 : vector<1x32x14xf32> to vector<32x14xf32>
    %cst_222 = arith.constant dense<0.000000e+00> : vector<8x14xf32>
    %290 = tpu.matmul %287, %289, %cst_222 {dimension_numbers = #tpu.dot_dimension_numbers<[1], [0], [0], [1], [0, 0, 1, 1], [], []>} : vector<8x32xf32>, vector<32x14xf32>, vector<8x14xf32> -> vector<8x14xf32>
    %291 = arith.addf %286, %290 : vector<8x14xf32>
    %292 = vector.extract_strided_slice %227 {offsets = [104, 0], sizes = [8, 32], strides = [1, 1]} : vector<128x32xf32> to vector<8x32xf32>
    %c13_223 = arith.constant 13 : index
    %c0_224 = arith.constant 0 : index
    %c0_225 = arith.constant 0 : index
    %293 = vector.load %arg10[%c13_223, %c0_224, %c0_225] : memref<16x32x14xf32, #tpu.memory_space<vmem>>, vector<1x32x14xf32>
    %294 = vector.shape_cast %293 : vector<1x32x14xf32> to vector<32x14xf32>
    %cst_226 = arith.constant dense<0.000000e+00> : vector<8x14xf32>
    %295 = tpu.matmul %292, %294, %cst_226 {dimension_numbers = #tpu.dot_dimension_numbers<[1], [0], [0], [1], [0, 0, 1, 1], [], []>} : vector<8x32xf32>, vector<32x14xf32>, vector<8x14xf32> -> vector<8x14xf32>
    %296 = arith.addf %291, %295 : vector<8x14xf32>
    %297 = vector.extract_strided_slice %227 {offsets = [112, 0], sizes = [8, 32], strides = [1, 1]} : vector<128x32xf32> to vector<8x32xf32>
    %c14_227 = arith.constant 14 : index
    %c0_228 = arith.constant 0 : index
    %c0_229 = arith.constant 0 : index
    %298 = vector.load %arg10[%c14_227, %c0_228, %c0_229] : memref<16x32x14xf32, #tpu.memory_space<vmem>>, vector<1x32x14xf32>
    %299 = vector.shape_cast %298 : vector<1x32x14xf32> to vector<32x14xf32>
    %cst_230 = arith.constant dense<0.000000e+00> : vector<8x14xf32>
    %300 = tpu.matmul %297, %299, %cst_230 {dimension_numbers = #tpu.dot_dimension_numbers<[1], [0], [0], [1], [0, 0, 1, 1], [], []>} : vector<8x32xf32>, vector<32x14xf32>, vector<8x14xf32> -> vector<8x14xf32>
    %301 = arith.addf %296, %300 : vector<8x14xf32>
    %302 = vector.extract_strided_slice %227 {offsets = [120, 0], sizes = [8, 32], strides = [1, 1]} : vector<128x32xf32> to vector<8x32xf32>
    %c15_231 = arith.constant 15 : index
    %c0_232 = arith.constant 0 : index
    %c0_233 = arith.constant 0 : index
    %303 = vector.load %arg10[%c15_231, %c0_232, %c0_233] : memref<16x32x14xf32, #tpu.memory_space<vmem>>, vector<1x32x14xf32>
    %304 = vector.shape_cast %303 : vector<1x32x14xf32> to vector<32x14xf32>
    %cst_234 = arith.constant dense<0.000000e+00> : vector<8x14xf32>
    %305 = tpu.matmul %302, %304, %cst_234 {dimension_numbers = #tpu.dot_dimension_numbers<[1], [0], [0], [1], [0, 0, 1, 1], [], []>} : vector<8x32xf32>, vector<32x14xf32>, vector<8x14xf32> -> vector<8x14xf32>
    %306 = arith.addf %301, %305 : vector<8x14xf32>
    %c0_235 = arith.constant 0 : index
    %c0_236 = arith.constant 0 : index
    %307 = vector.load %arg12[%c0_235, %c0_236] : memref<8x14xf32, #tpu.memory_space<vmem>>, vector<8x14xf32>
    tpu.vector_store %arg12[%c0_235, %c0_236], %306 {strides = array<i32>} : memref<8x14xf32, #tpu.memory_space<vmem>>, vector<8x14xf32>,
    return
  }
}

</mosaic_0001>

<bundles_post_ra>
// kernel: _forward.1
= control target key start
LH: loop header
LB: loop body
LE: loop exit
PB: predicated region body
PF: predicated region fallthrough
CT: control target
= control target key end

     0   :  { %v9648_v0 = vmov 0.0|0.0   ;;  %vm1061_vm0 = vcmask 1045504   ;;  %vm1036_vm1 = vcmask 48128   ;;  %vm3361_vm2 = vcmask 523264   ;;  %s11742_s0 = inlined_call_operand.vmem [shape: f32[256,6], index: 0, kind: input, shape index: {}]   ;;  %s11743_s1 = inlined_call_operand.vmem [shape: f32[1024,256], index: 1, kind: input, shape index: {}]   ;;  %s11744_s2 = inlined_call_operand.vmem [shape: f32[16,6,16], index: 2, kind: input, shape index: {}]   ;;  %s11745_s4 = inlined_call_operand.vmem [shape: f32[256,64], index: 4, kind: input, shape index: {}]   ;;  %s11746_s3 = inlined_call_operand.vmem [shape: f32[1,16], index: 3, kind: input, shape index: {}]   ;;  %s11747_s5 = inlined_call_operand.vmem [shape: f32[16,16,32], index: 5, kind: input, shape index: {}]   ;;  %s11748_s7 = inlined_call_operand.vmem [shape: f32[144,16], index: 7, kind: input, shape index: {}]   ;;  %s11749_s6 = inlined_call_operand.vmem [shape: f32[1,32], index: 6, kind: input, shape index: {}]   ;;  %s11750_s8 = inlined_call_operand.vmem [shape: f32[9,32,2], index: 8, kind: input, shape index: {}]   ;;  %s11751_s9 = inlined_call_operand.vmem [shape: f32[128,16], index: 9, kind: input, shape index: {}]   ;;  %s11752_s10 = inlined_call_operand.vmem [shape: f32[16,32,14], index: 10, kind: input, shape index: {}]   ;;  %s11753_s11 = inlined_call_operand.vmem [shape: f32[16,2], index: 11, kind: output, shape index: {0}]   ;;  %s11754_s12 = inlined_call_operand.vmem [shape: f32[8,14], index: 12, kind: output, shape index: {1}]  }
   0x1   :  { %9137 = vmatprep.subr.bf16.mxu0 %v9648_v0  ;;  %v40_v1 = vld [vmem:[%s11742_s0] sm:$0xff]  ;;  %v41_v2 = vld [vmem:[%s11742_s0 + $0x8] sm:$0xff]  ;;  %v42_v3 = vld [vmem:[%s11742_s0 + $0x10] sm:$0xff]  ;;  %vm3688_vm11 = vcmask 130048   ;;  %vm5306_vm14 = vcmask 261120   ;;  %vm9649_vm15 = vmmov 0  }
   0x2   :  { %v9138_v4 = vpack.c.bf16 %v41_v2, %v40_v1  ;;  %v43_v5 = vld [vmem:[%s11742_s0 + $0x18] sm:$0xff]  ;;  %v44_v7 = vld [vmem:[%s11742_s0 + $0x20] sm:$0xff]  ;;  %v45_v8 = vld [vmem:[%s11742_s0 + $0x28] sm:$0xff] }
   0x3   :  { %v9141_v6 = vpack.c.bf16 %v43_v5, %v42_v3  ;;  %v9144_v9 = vpack.c.bf16 %v45_v8, %v44_v7  ;;  %v46_v10 = vld [vmem:[%s11742_s0 + $0x30] sm:$0xff]  ;;  %v47_v11 = vld [vmem:[%s11742_s0 + $0x38] sm:$0xff]  ;;  %v73_v12 = vld [vmem:[%s11743_s1 + $0x8] sm:$0xff] }
   0x4   :  { %9139 = vmatpush1.bf16.msra.mxu0 %v9138_v4  ;;  %v9147_v13 = vpack.c.bf16 %v47_v11, %v46_v10  ;;  %392 = vmatprep.mubr.f32.mxu0 %v73_v12  ;;  %v48_v14 = vld [vmem:[%s11742_s0 + $0x40] sm:$0xff]  ;;  %v49_v15 = vld [vmem:[%s11742_s0 + $0x48] sm:$0xff]  ;;  %v50_v17 = vld [vmem:[%s11742_s0 + $0x50] sm:$0xff] }
   0x5   :  { %9140 = vmatprep.subr.bf16.mxu0 %v9648_v0  ;;  %v9150_v16 = vpack.c.bf16 %v49_v15, %v48_v14  ;;  %v51_v18 = vld [vmem:[%s11742_s0 + $0x58] sm:$0xff]  ;;  %v52_v20 = vld [vmem:[%s11742_s0 + $0x60] sm:$0xff]  ;;  %v53_v21 = vld [vmem:[%s11742_s0 + $0x68] sm:$0xff] }
   0x6   :  { %v9153_v19 = vpack.c.bf16 %v51_v18, %v50_v17  ;;  %v9156_v22 = vpack.c.bf16 %v53_v21, %v52_v20  ;;  %v54_v23 = vld [vmem:[%s11742_s0 + $0x70] sm:$0xff]  ;;  %v55_v24 = vld [vmem:[%s11742_s0 + $0x78] sm:$0xff]  ;;  %v56_v26 = vld [vmem:[%s11742_s0 + $0x80] sm:$0xff] }
   0x7   :  { %v9159_v25 = vpack.c.bf16 %v55_v24, %v54_v23  ;;  %v57_v27 = vld [vmem:[%s11742_s0 + $0x88] sm:$0xff]  ;;  %v58_v29 = vld [vmem:[%s11742_s0 + $0x90] sm:$0xff]  ;;  %v59_v30 = vld [vmem:[%s11742_s0 + $0x98] sm:$0xff] }
   0x8   :  { %9142 = vmatpush1.bf16.msra.mxu0 %v9141_v6  ;;  %v9162_v28 = vpack.c.bf16 %v57_v27, %v56_v26  ;;  %v9165_v31 = vpack.c.bf16 %v59_v30, %v58_v29  ;;  %v60_v32 = vld [vmem:[%s11742_s0 + $0xa0] sm:$0xff]  ;;  %v61_v33 = vld [vmem:[%s11742_s0 + $0xa8] sm:$0xff]  ;;  %v62_v35 = vld [vmem:[%s11742_s0 + $0xb0] sm:$0xff] }
   0x9   :  { %9143 = vmatprep.subr.bf16.mxu0 %v9648_v0  ;;  %v9168_v34 = vpack.c.bf16 %v61_v33, %v60_v32  ;;  %v63_v36 = vld [vmem:[%s11742_s0 + $0xb8] sm:$0xff]  ;;  %v64_v38 = vld [vmem:[%s11742_s0 + $0xc0] sm:$0xff]  ;;  %v65_v39 = vld [vmem:[%s11742_s0 + $0xc8] sm:$0xff] }
   0xa   :  { %v9171_v37 = vpack.c.bf16 %v63_v36, %v62_v35  ;;  %v9174_v40 = vpack.c.bf16 %v65_v39, %v64_v38  ;;  %v66_v41 = vld [vmem:[%s11742_s0 + $0xd0] sm:$0xff]  ;;  %v67_v42 = vld [vmem:[%s11742_s0 + $0xd8] sm:$0xff]  ;;  %v68_v44 = vld [vmem:[%s11742_s0 + $0xe0] sm:$0xff] }
   0xb   :  { %v9177_v43 = vpack.c.bf16 %v67_v42, %v66_v41  ;;  %v69_v45 = vld [vmem:[%s11742_s0 + $0xe8] sm:$0xff]  ;;  %v70_v47 = vld [vmem:[%s11742_s0 + $0xf0] sm:$0xff]  ;;  %v71_v48 = vld [vmem:[%s11742_s0 + $0xf8] sm:$0xff] }
   0xc   :  { %9145 = vmatpush1.bf16.msra.mxu0 %v9144_v9  ;;  %v9180_v46 = vpack.c.bf16 %v69_v45, %v68_v44  ;;  %v9183_v49 = vpack.c.bf16 %v71_v48, %v70_v47  ;;  %v72_v50 = vld [vmem:[%s11743_s1] sm:$0xff]  ;;  %v75_v51 = vld [vmem:[%s11743_s1 + $0x18] sm:$0xff]  ;;  %v74_v52 = vld [vmem:[%s11743_s1 + $0x10] sm:$0xff] }
   0xd   :  { %9146 = vmatprep.subr.bf16.mxu0 %v9648_v0  ;;  %v77_v53 = vld [vmem:[%s11743_s1 + $0x28] sm:$0xff]  ;;  %v76_v54 = vld [vmem:[%s11743_s1 + $0x20] sm:$0xff]  ;;  %v79_v55 = vld [vmem:[%s11743_s1 + $0x38] sm:$0xff] }
   0xe   :  { %v78_v56 = vld [vmem:[%s11743_s1 + $0x30] sm:$0xff]  ;;  %v81_v57 = vld [vmem:[%s11743_s1 + $0x48] sm:$0xff]  ;;  %v80_v58 = vld [vmem:[%s11743_s1 + $0x40] sm:$0xff] }
   0xf   :  { %v83_v59 = vld [vmem:[%s11743_s1 + $0x58] sm:$0xff]  ;;  %v82_v60 = vld [vmem:[%s11743_s1 + $0x50] sm:$0xff]  ;;  %v85_v61 = vld [vmem:[%s11743_s1 + $0x68] sm:$0xff] }
  0x10   :  { %9148 = vmatpush1.bf16.msra.mxu0 %v9147_v13  ;;  %v84_v62 = vld [vmem:[%s11743_s1 + $0x60] sm:$0xff]  ;;  %v87_v63 = vld [vmem:[%s11743_s1 + $0x78] sm:$0xff]  ;;  %v86_v1 = vld [vmem:[%s11743_s1 + $0x70] sm:$0xff] }
  0x11   :  { %9149 = vmatprep.subr.bf16.mxu0 %v9648_v0  ;;  %v89_v2 = vld [vmem:[%s11743_s1 + $0x88] sm:$0xff]  ;;  %v88_v3 = vld [vmem:[%s11743_s1 + $0x80] sm:$0xff]  ;;  %v91_v4 = vld [vmem:[%s11743_s1 + $0x98] sm:$0xff] }
  0x12   :  { %v90_v5 = vld [vmem:[%s11743_s1 + $0x90] sm:$0xff]  ;;  %v93_v6 = vld [vmem:[%s11743_s1 + $0xa8] sm:$0xff]  ;;  %v92_v7 = vld [vmem:[%s11743_s1 + $0xa0] sm:$0xff] }
  0x13   :  { %v95_v8 = vld [vmem:[%s11743_s1 + $0xb8] sm:$0xff]  ;;  %v94_v9 = vld [vmem:[%s11743_s1 + $0xb0] sm:$0xff]  ;;  %v97_v10 = vld [vmem:[%s11743_s1 + $0xc8] sm:$0xff] }
  0x14   :  { %9151 = vmatpush1.bf16.msra.mxu0 %v9150_v16  ;;  %v96_v11 = vld [vmem:[%s11743_s1 + $0xc0] sm:$0xff]  ;;  %v99_v12 = vld [vmem:[%s11743_s1 + $0xd8] sm:$0xff]  ;;  %v98_v13 = vld [vmem:[%s11743_s1 + $0xd0] sm:$0xff] }
  0x15   :  { %9152 = vmatprep.subr.bf16.mxu0 %v9648_v0  ;;  %v101_v14 = vld [vmem:[%s11743_s1 + $0xe8] sm:$0xff]  ;;  %v100_v15 = vld [vmem:[%s11743_s1 + $0xe0] sm:$0xff]  ;;  %v103_v16 = vld [vmem:[%s11743_s1 + $0xf8] sm:$0xff] }
  0x16   :  { %v102_v17 = vld [vmem:[%s11743_s1 + $0xf0] sm:$0xff]  ;;  %v105_v18 = vld [vmem:[%s11743_s1 + $0x108] sm:$0xff]  ;;  %v107_v20 = vld [vmem:[%s11743_s1 + $0x118] sm:$0xff] }
  0x17   :  { %v106_v21 = vld [vmem:[%s11743_s1 + $0x110] sm:$0xff]  ;;  %v108_v23 = vld [vmem:[%s11743_s1 + $0x120] sm:$0xff]  ;;  %v111_v24 = vld [vmem:[%s11743_s1 + $0x138] sm:$0xff] }
  0x18   :  { %9154 = vmatpush1.bf16.msra.mxu0 %v9153_v19  ;;  %v104_v19 = vld [vmem:[%s11743_s1 + $0x100] sm:$0xff]  ;;  %v113_v26 = vld [vmem:[%s11743_s1 + $0x148] sm:$0xff]  ;;  %v114_v29 = vld [vmem:[%s11743_s1 + $0x150] sm:$0xff] }
  0x19   :  { %9155 = vmatprep.subr.bf16.mxu0 %v9648_v0  ;;  %v112_v27 = vld [vmem:[%s11743_s1 + $0x140] sm:$0xff]  ;;  %v117_v30 = vld [vmem:[%s11743_s1 + $0x168] sm:$0xff]  ;;  %v119_v32 = vld [vmem:[%s11743_s1 + $0x178] sm:$0xff] }
  0x1a   :  { %v118_v33 = vld [vmem:[%s11743_s1 + $0x170] sm:$0xff]  ;;  %v120_v35 = vld [vmem:[%s11743_s1 + $0x180] sm:$0xff]  ;;  %v123_v36 = vld [vmem:[%s11743_s1 + $0x198] sm:$0xff] }
  0x1b   :  { %v125_v38 = vld [vmem:[%s11743_s1 + $0x1a8] sm:$0xff]  ;;  %v124_v39 = vld [vmem:[%s11743_s1 + $0x1a0] sm:$0xff]  ;;  %v126_v41 = vld [vmem:[%s11743_s1 + $0x1b0] sm:$0xff] }
  0x1c   :  { %9157 = vmatpush1.bf16.msra.mxu0 %v9156_v22  ;;  %v109_v22 = vld [vmem:[%s11743_s1 + $0x128] sm:$0xff]  ;;  %v131_v44 = vld [vmem:[%s11743_s1 + $0x1d8] sm:$0xff]  ;;  %v130_v45 = vld [vmem:[%s11743_s1 + $0x1d0] sm:$0xff] }
  0x1d   :  { %9158 = vmatprep.subr.bf16.mxu0 %v9648_v0  ;;  %v129_v42 = vld [vmem:[%s11743_s1 + $0x1c8] sm:$0xff]  ;;  %v132_v47 = vld [vmem:[%s11743_s1 + $0x1e0] sm:$0xff] }
  0x1e   :  { %v7568_v48 = vld [vmem:[%s11744_s2 + $0x8] sm:$0x3f] }
  0x1f   :  { %8403 = vmatprep.subr.msk.mxu1 %vm1061_vm0, %v7568_v48 }
  0x20   :  { %9160 = vmatpush1.bf16.msra.mxu0 %v9159_v25  ;;  %v110_v25 = vld [vmem:[%s11743_s1 + $0x130] sm:$0xff]  ;;  %8404 = vmatpush3.msk.msra.mxu1 %vm1061_vm0, %v7568_v48 }
  0x21   :  { %9161 = vmatprep.subr.bf16.mxu0 %v9648_v0  ;;  %v186_v48 = vld [vmem:[%s11743_s1 + $0x390] sm:$0xff] }
  0x24   :  { %9163 = vmatpush1.bf16.msra.mxu0 %v9162_v28  ;;  %v115_v28 = vld [vmem:[%s11743_s1 + $0x158] sm:$0xff] }
  0x25   :  { %9164 = vmatprep.subr.bf16.mxu0 %v9648_v0 }
  0x28   :  { %9166 = vmatpush1.bf16.msra.mxu0 %v9165_v31  ;;  %v116_v31 = vld [vmem:[%s11743_s1 + $0x160] sm:$0xff] }
  0x29   :  { %9167 = vmatprep.subr.bf16.mxu0 %v9648_v0 }
  0x2c   :  { %9169 = vmatpush1.bf16.msra.mxu0 %v9168_v34  ;;  %v121_v34 = vld [vmem:[%s11743_s1 + $0x188] sm:$0xff] }
  0x2d   :  { %9170 = vmatprep.subr.bf16.mxu0 %v9648_v0 }
  0x30   :  { %9172 = vmatpush1.bf16.msra.mxu0 %v9171_v37  ;;  %v122_v37 = vld [vmem:[%s11743_s1 + $0x190] sm:$0xff] }
  0x31   :  { %9173 = vmatprep.subr.bf16.mxu0 %v9648_v0 }
  0x34   :  { %9175 = vmatpush1.bf16.msra.mxu0 %v9174_v40  ;;  %v127_v40 = vld [vmem:[%s11743_s1 + $0x1b8] sm:$0xff] }
  0x35   :  { %9176 = vmatprep.subr.bf16.mxu0 %v9648_v0 }
  0x38   :  { %9178 = vmatpush1.bf16.msra.mxu0 %v9177_v43  ;;  %v128_v43 = vld [vmem:[%s11743_s1 + $0x1c0] sm:$0xff] }
  0x39   :  { %9179 = vmatprep.subr.bf16.mxu0 %v9648_v0 }
  0x3c   :  { %9181 = vmatpush1.bf16.msra.mxu0 %v9180_v46  ;;  %v133_v46 = vld [vmem:[%s11743_s1 + $0x1e8] sm:$0xff] }
  0x3d   :  { %9182 = vmatprep.subr.bf16.mxu0 %v9648_v0 }
  0x40   :  { %9184 = vmatpush1.bf16.msra.mxu0 %v9183_v49  ;;  %v135_v49 = vld [vmem:[%s11743_s1 + $0x1f8] sm:$0xff] }
  0x43   :  { %393 = vmatmul.mubr.f32.vlgmr.msra.gmra.mrb[0].mxu0 %v72_v50  ;;  %v134_v50 = vld [vmem:[%s11743_s1 + $0x1f0] sm:$0xff] }
  0x44   :  { %397 = vmatprep.mubr.f32.mxu0 %v75_v51  ;;  %v137_v51 = vld [vmem:[%s11743_s1 + $0x208] sm:$0xff] }
  0x47   :  { %398 = vmatmul.mubr.f32.gmra.mrb[2].mxu0 %v74_v52  ;;  %v136_v52 = vld [vmem:[%s11743_s1 + $0x200] sm:$0xff] }
  0x48   :  { %402 = vmatprep.mubr.f32.mxu0 %v77_v53  ;;  %v139_v53 = vld [vmem:[%s11743_s1 + $0x218] sm:$0xff] }
  0x4b   :  { %403 = vmatmul.mubr.f32.gmra.mrb[4].mxu0 %v76_v54  ;;  %v138_v54 = vld [vmem:[%s11743_s1 + $0x210] sm:$0xff] }
  0x4c   :  { %407 = vmatprep.mubr.f32.mxu0 %v79_v55  ;;  %v141_v55 = vld [vmem:[%s11743_s1 + $0x228] sm:$0xff] }
  0x4f   :  { %408 = vmatmul.mubr.f32.gmra.mrb[6].mxu0 %v78_v56  ;;  %v140_v56 = vld [vmem:[%s11743_s1 + $0x220] sm:$0xff] }
  0x50   :  { %412 = vmatprep.mubr.f32.mxu0 %v81_v57  ;;  %v143_v57 = vld [vmem:[%s11743_s1 + $0x238] sm:$0xff] }
  0x53   :  { %413 = vmatmul.mubr.f32.gmra.mrb[8].mxu0 %v80_v58  ;;  %v142_v58 = vld [vmem:[%s11743_s1 + $0x230] sm:$0xff] }
  0x54   :  { %417 = vmatprep.mubr.f32.mxu0 %v83_v59  ;;  %v145_v59 = vld [vmem:[%s11743_s1 + $0x248] sm:$0xff] }
  0x57   :  { %418 = vmatmul.mubr.f32.gmra.mrb[10].mxu0 %v82_v60  ;;  %v144_v60 = vld [vmem:[%s11743_s1 + $0x240] sm:$0xff] }
  0x58   :  { %422 = vmatprep.mubr.f32.mxu0 %v85_v61  ;;  %v147_v61 = vld [vmem:[%s11743_s1 + $0x258] sm:$0xff] }
  0x5b   :  { %423 = vmatmul.mubr.f32.gmra.mrb[12].mxu0 %v84_v62  ;;  %v146_v62 = vld [vmem:[%s11743_s1 + $0x250] sm:$0xff] }
  0x5c   :  { %427 = vmatprep.mubr.f32.mxu0 %v87_v63  ;;  %v10064_v63 = vld [vmem:[%s11744_s2] sm:$0x3f] }
  0x5d   :  { %8417 = vmatprep.subr.msk.mxu1 %vm1061_vm0, %v10064_v63 }
  0x5f   :  { %428 = vmatmul.mubr.f32.gmra.mrb[14].mxu0 %v86_v1  ;;  %v149_v1 = vld [vmem:[%s11743_s1 + $0x268] sm:$0xff] }
  0x60   :  { %432 = vmatprep.mubr.f32.mxu0 %v89_v2  ;;  %v148_v2 = vld [vmem:[%s11743_s1 + $0x260] sm:$0xff] }
  0x63   :  { %433 = vmatmul.mubr.f32.gmra.mrb[16].mxu0 %v88_v3  ;;  %v151_v3 = vld [vmem:[%s11743_s1 + $0x278] sm:$0xff] }
  0x64   :  { %437 = vmatprep.mubr.f32.mxu0 %v91_v4  ;;  %v150_v4 = vld [vmem:[%s11743_s1 + $0x270] sm:$0xff] }
  0x67   :  { %438 = vmatmul.mubr.f32.gmra.mrb[18].mxu0 %v90_v5  ;;  %v153_v5 = vld [vmem:[%s11743_s1 + $0x288] sm:$0xff] }
  0x68   :  { %442 = vmatprep.mubr.f32.mxu0 %v93_v6  ;;  %v152_v6 = vld [vmem:[%s11743_s1 + $0x280] sm:$0xff] }
  0x6b   :  { %443 = vmatmul.mubr.f32.gmra.mrb[20].mxu0 %v92_v7  ;;  %v155_v7 = vld [vmem:[%s11743_s1 + $0x298] sm:$0xff] }
  0x6c   :  { %447 = vmatprep.mubr.f32.mxu0 %v95_v8  ;;  %v154_v8 = vld [vmem:[%s11743_s1 + $0x290] sm:$0xff] }
  0x6f   :  { %448 = vmatmul.mubr.f32.gmra.mrb[22].mxu0 %v94_v9  ;;  %v157_v9 = vld [vmem:[%s11743_s1 + $0x2a8] sm:$0xff] }
  0x70   :  { %452 = vmatprep.mubr.f32.mxu0 %v97_v10  ;;  %v156_v10 = vld [vmem:[%s11743_s1 + $0x2a0] sm:$0xff] }
  0x73   :  { %453 = vmatmul.mubr.f32.gmra.mrb[24].mxu0 %v96_v11  ;;  %v159_v11 = vld [vmem:[%s11743_s1 + $0x2b8] sm:$0xff] }
  0x74   :  { %457 = vmatprep.mubr.f32.mxu0 %v99_v12  ;;  %v158_v12 = vld [vmem:[%s11743_s1 + $0x2b0] sm:$0xff] }
  0x77   :  { %458 = vmatmul.mubr.f32.gmra.mrb[26].mxu0 %v98_v13  ;;  %v161_v13 = vld [vmem:[%s11743_s1 + $0x2c8] sm:$0xff] }
  0x78   :  { %462 = vmatprep.mubr.f32.mxu0 %v101_v14  ;;  %v160_v14 = vld [vmem:[%s11743_s1 + $0x2c0] sm:$0xff] }
  0x7b   :  { %463 = vmatmul.mubr.f32.gmra.mrb[28].mxu0 %v100_v15  ;;  %v163_v15 = vld [vmem:[%s11743_s1 + $0x2d8] sm:$0xff] }
  0x7c   :  { %467 = vmatprep.mubr.f32.mxu0 %v103_v16  ;;  %v162_v16 = vld [vmem:[%s11743_s1 + $0x2d0] sm:$0xff] }
  0x7f   :  { %468 = vmatmul.mubr.f32.gmra.mrb[30].mxu0 %v102_v17  ;;  %v165_v17 = vld [vmem:[%s11743_s1 + $0x2e8] sm:$0xff] }
  0x80   :  { %472 = vmatprep.mubr.f32.mxu0 %v105_v18  ;;  %v164_v18 = vld [vmem:[%s11743_s1 + $0x2e0] sm:$0xff] }
  0x83   :  { %473 = vmatmul.mubr.f32.gmra.mrb[32].mxu0 %v104_v19  ;;  %v167_v19 = vld [vmem:[%s11743_s1 + $0x2f8] sm:$0xff] }
  0x84   :  { %477 = vmatprep.mubr.f32.mxu0 %v107_v20  ;;  %v166_v20 = vld [vmem:[%s11743_s1 + $0x2f0] sm:$0xff] }
  0x87   :  { %478 = vmatmul.mubr.f32.gmra.mrb[34].mxu0 %v106_v21  ;;  %v169_v21 = vld [vmem:[%s11743_s1 + $0x308] sm:$0xff] }
  0x88   :  { %482 = vmatprep.mubr.f32.mxu0 %v109_v22  ;;  %v168_v22 = vld [vmem:[%s11743_s1 + $0x300] sm:$0xff] }
  0x8b   :  { %483 = vmatmul.mubr.f32.gmra.mrb[36].mxu0 %v108_v23  ;;  %v171_v23 = vld [vmem:[%s11743_s1 + $0x318] sm:$0xff] }
  0x8c   :  { %487 = vmatprep.mubr.f32.mxu0 %v111_v24  ;;  %v170_v24 = vld [vmem:[%s11743_s1 + $0x310] sm:$0xff] }
  0x8f   :  { %488 = vmatmul.mubr.f32.gmra.mrb[38].mxu0 %v110_v25  ;;  %v173_v25 = vld [vmem:[%s11743_s1 + $0x328] sm:$0xff] }
  0x90   :  { %492 = vmatprep.mubr.f32.mxu0 %v113_v26  ;;  %v172_v26 = vld [vmem:[%s11743_s1 + $0x320] sm:$0xff] }
  0x93   :  { %493 = vmatmul.mubr.f32.gmra.mrb[40].mxu0 %v112_v27  ;;  %v175_v27 = vld [vmem:[%s11743_s1 + $0x338] sm:$0xff] }
  0x94   :  { %497 = vmatprep.mubr.f32.mxu0 %v115_v28  ;;  %v174_v28 = vld [vmem:[%s11743_s1 + $0x330] sm:$0xff] }
  0x97   :  { %498 = vmatmul.mubr.f32.gmra.mrb[42].mxu0 %v114_v29  ;;  %v177_v29 = vld [vmem:[%s11743_s1 + $0x348] sm:$0xff] }
  0x98   :  { %502 = vmatprep.mubr.f32.mxu0 %v117_v30  ;;  %v176_v30 = vld [vmem:[%s11743_s1 + $0x340] sm:$0xff] }
  0x9b   :  { %503 = vmatmul.mubr.f32.gmra.mrb[44].mxu0 %v116_v31  ;;  %v179_v31 = vld [vmem:[%s11743_s1 + $0x358] sm:$0xff] }
  0x9c   :  { %507 = vmatprep.mubr.f32.mxu0 %v119_v32  ;;  %v178_v32 = vld [vmem:[%s11743_s1 + $0x350] sm:$0xff] }
  0x9f   :  { %508 = vmatmul.mubr.f32.gmra.mrb[46].mxu0 %v118_v33  ;;  %v181_v33 = vld [vmem:[%s11743_s1 + $0x368] sm:$0xff] }
  0xa0   :  { %512 = vmatprep.mubr.f32.mxu0 %v121_v34 }
  0xa3   :  { %513 = vmatmul.mubr.f32.gmra.mrb[48].mxu0 %v120_v35 }
  0xa4   :  { %517 = vmatprep.mubr.f32.mxu0 %v123_v36  ;;  %v180_v36 = vld [vmem:[%s11743_s1 + $0x360] sm:$0xff] }
  0xa7   :  { %518 = vmatmul.mubr.f32.gmra.mrb[50].mxu0 %v122_v37  ;;  %v183_v37 = vld [vmem:[%s11743_s1 + $0x378] sm:$0xff] }
  0xa8   :  { %522 = vmatprep.mubr.f32.mxu0 %v125_v38 }
  0xab   :  { %523 = vmatmul.mubr.f32.gmra.mrb[52].mxu0 %v124_v39 }
  0xac   :  { %527 = vmatprep.mubr.f32.mxu0 %v127_v40  ;;  %v182_v40 = vld [vmem:[%s11743_s1 + $0x370] sm:$0xff] }
  0xaf   :  { %528 = vmatmul.mubr.f32.gmra.mrb[54].mxu0 %v126_v41  ;;  %v185_v41 = vld [vmem:[%s11743_s1 + $0x388] sm:$0xff] }
  0xb0   :  { %532 = vmatprep.mubr.f32.mxu0 %v129_v42 }
  0xb3   :  { %533 = vmatmul.mubr.f32.gmra.mrb[56].mxu0 %v128_v43 }
  0xb4   :  { %537 = vmatprep.mubr.f32.mxu0 %v131_v44  ;;  %v184_v44 = vld [vmem:[%s11743_s1 + $0x380] sm:$0xff] }
  0xb7   :  { %538 = vmatmul.mubr.f32.gmra.mrb[58].mxu0 %v130_v45  ;;  %v187_v45 = vld [vmem:[%s11743_s1 + $0x398] sm:$0xff] }
  0xb8   :  { %542 = vmatprep.mubr.f32.mxu0 %v133_v46 }
  0xbb   :  { %543 = vmatmul.mubr.f32.gmra.mrb[60].mxu0 %v132_v47 }
  0xbc   :  { %547 = vmatprep.mubr.f32.mxu0 %v135_v49  ;;  %v189_v49 = vld [vmem:[%s11743_s1 + $0x3a8] sm:$0xff] }
  0xbf   :  { %548 = vmatmul.mubr.f32.gmra.mrb[62].mxu0 %v134_v50 }
  0xc0   :  { %552 = vmatprep.mubr.f32.mxu0 %v137_v51 }
  0xc3   :  { %553 = vmatmul.mubr.f32.gmra.mrb[64].mxu0 %v136_v52  ;;  %v188_v52 = vld [vmem:[%s11743_s1 + $0x3a0] sm:$0xff] }
  0xc4   :  { %557 = vmatprep.mubr.f32.mxu0 %v139_v53  ;;  %v191_v53 = vld [vmem:[%s11743_s1 + $0x3b8] sm:$0xff] }
  0xc7   :  { %558 = vmatmul.mubr.f32.gmra.mrb[66].mxu0 %v138_v54 }
  0xc8   :  { %562 = vmatprep.mubr.f32.mxu0 %v141_v55 }
  0xcb   :  { %563 = vmatmul.mubr.f32.gmra.mrb[68].mxu0 %v140_v56  ;;  %v190_v56 = vld [vmem:[%s11743_s1 + $0x3b0] sm:$0xff] }
  0xcc   :  { %567 = vmatprep.mubr.f32.mxu0 %v143_v57  ;;  %v193_v57 = vld [vmem:[%s11743_s1 + $0x3c8] sm:$0xff] }
  0xcf   :  { %568 = vmatmul.mubr.f32.gmra.mrb[70].mxu0 %v142_v58 }
  0xd0   :  { %572 = vmatprep.mubr.f32.mxu0 %v145_v59 }
  0xd3   :  { %573 = vmatmul.mubr.f32.gmra.mrb[72].mxu0 %v144_v60  ;;  %v192_v60 = vld [vmem:[%s11743_s1 + $0x3c0] sm:$0xff] }
  0xd4   :  { %577 = vmatprep.mubr.f32.mxu0 %v147_v61  ;;  %v195_v61 = vld [vmem:[%s11743_s1 + $0x3d8] sm:$0xff] }
  0xd7   :  { %578 = vmatmul.mubr.f32.gmra.mrb[74].mxu0 %v146_v62 }
  0xd8   :  { %582 = vmatprep.mubr.f32.mxu0 %v149_v1 }
  0xdb   :  { %583 = vmatmul.mubr.f32.gmra.mrb[76].mxu0 %v148_v2  ;;  %v194_v2 = vld [vmem:[%s11743_s1 + $0x3d0] sm:$0xff] }
  0xdc   :  { %587 = vmatprep.mubr.f32.mxu0 %v151_v3  ;;  %v197_v3 = vld [vmem:[%s11743_s1 + $0x3e8] sm:$0xff] }
  0xdf   :  { %588 = vmatmul.mubr.f32.gmra.mrb[78].mxu0 %v150_v4 }
  0xe0   :  { %592 = vmatprep.mubr.f32.mxu0 %v153_v5 }
  0xe3   :  { %593 = vmatmul.mubr.f32.gmra.mrb[80].mxu0 %v152_v6  ;;  %v196_v6 = vld [vmem:[%s11743_s1 + $0x3e0] sm:$0xff] }
  0xe4   :  { %597 = vmatprep.mubr.f32.mxu0 %v155_v7  ;;  %v199_v7 = vld [vmem:[%s11743_s1 + $0x3f8] sm:$0xff] }
  0xe7   :  { %598 = vmatmul.mubr.f32.gmra.mrb[82].mxu0 %v154_v8 }
  0xe8   :  { %602 = vmatprep.mubr.f32.mxu0 %v157_v9  ;;  %v7587_v9 = vld [vmem:[%s11744_s2 + $0x10] sm:$0x3f] }
  0xeb   :  { %603 = vmatmul.mubr.f32.gmra.mrb[84].mxu0 %v156_v10 }
  0xec   :  { %607 = vmatprep.mubr.f32.mxu0 %v159_v11  ;;  %v198_v11 = vld [vmem:[%s11743_s1 + $0x3f0] sm:$0xff] }
  0xef   :  { %608 = vmatmul.mubr.f32.gmra.mrb[86].mxu0 %v158_v12  ;;  %v201_v12 = vld [vmem:[%s11743_s1 + $0x408] sm:$0xff] }
  0xf0   :  { %612 = vmatprep.mubr.f32.mxu0 %v161_v13 }
  0xf3   :  { %613 = vmatmul.mubr.f32.gmra.mrb[88].mxu0 %v160_v14 }
  0xf4   :  { %617 = vmatprep.mubr.f32.mxu0 %v163_v15  ;;  %v200_v15 = vld [vmem:[%s11743_s1 + $0x400] sm:$0xff] }
  0xf7   :  { %618 = vmatmul.mubr.f32.gmra.mrb[90].mxu0 %v162_v16 }
  0xf8   :  { %622 = vmatprep.mubr.f32.mxu0 %v165_v17 }
  0xfb   :  { %623 = vmatmul.mubr.f32.gmra.mrb[92].mxu0 %v164_v18  ;;  %v202_v18 = vld [vmem:[%s11743_s1 + $0x410] sm:$0xff] }
  0xfc   :  { %627 = vmatprep.mubr.f32.mxu0 %v167_v19  ;;  %v205_v19 = vld [vmem:[%s11743_s1 + $0x428] sm:$0xff] }
  0xff   :  { %628 = vmatmul.mubr.f32.gmra.mrb[94].mxu0 %v166_v20 }
 0x100   :  { %632 = vmatprep.mubr.f32.mxu0 %v169_v21 }
 0x103   :  { %633 = vmatmul.mubr.f32.gmra.mrb[96].mxu0 %v168_v22  ;;  %v204_v22 = vld [vmem:[%s11743_s1 + $0x420] sm:$0xff] }
 0x104   :  { %637 = vmatprep.mubr.f32.mxu0 %v171_v23  ;;  %v207_v23 = vld [vmem:[%s11743_s1 + $0x438] sm:$0xff] }
 0x107   :  { %638 = vmatmul.mubr.f32.gmra.mrb[98].mxu0 %v170_v24 }
 0x108   :  { %642 = vmatprep.mubr.f32.mxu0 %v173_v25 }
 0x10b   :  { %643 = vmatmul.mubr.f32.gmra.mrb[100].mxu0 %v172_v26  ;;  %v206_v26 = vld [vmem:[%s11743_s1 + $0x430] sm:$0xff] }
 0x10c   :  { %647 = vmatprep.mubr.f32.mxu0 %v175_v27  ;;  %v209_v27 = vld [vmem:[%s11743_s1 + $0x448] sm:$0xff] }
 0x10f   :  { %648 = vmatmul.mubr.f32.gmra.mrb[102].mxu0 %v174_v28 }
 0x110   :  { %652 = vmatprep.mubr.f32.mxu0 %v177_v29 }
 0x113   :  { %653 = vmatmul.mubr.f32.gmra.mrb[104].mxu0 %v176_v30  ;;  %v208_v30 = vld [vmem:[%s11743_s1 + $0x440] sm:$0xff] }
 0x114   :  { %657 = vmatprep.mubr.f32.mxu0 %v179_v31  ;;  %v211_v31 = vld [vmem:[%s11743_s1 + $0x458] sm:$0xff] }
 0x116   :  { %v10167_v34 = vpop.f32.mrb[0].mxu0 }
 0x117   :  { %v396_v35 = vpop.f32.mrb[1].mxu0  ;;  %658 = vmatmul.mubr.f32.gmra.mrb[106].mxu0 %v178_v32 }
 0x118   :  { %662 = vmatprep.mubr.f32.mxu0 %v181_v33  ;;  %v210_v35 = vld [vmem:[%s11743_s1 + $0x450] sm:$0xff] }
 0x11a   :  { %v10175_v38 = vpop.f32.mrb[2].mxu0 }
 0x11b   :  { %v401_v39 = vpop.f32.mrb[3].mxu0  ;;  %663 = vmatmul.mubr.f32.gmra.mrb[108].mxu0 %v180_v36  ;;  %v213_v36 = vld [vmem:[%s11743_s1 + $0x468] sm:$0xff] }
 0x11c   :  { %667 = vmatprep.mubr.f32.mxu0 %v183_v37 }
 0x11e   :  { %v10183_v42 = vpop.f32.mrb[4].mxu0 }
 0x11f   :  { %v406_v43 = vpop.f32.mrb[5].mxu0  ;;  %668 = vmatmul.mubr.f32.gmra.mrb[110].mxu0 %v182_v40  ;;  %v7597_v40 = vld [vmem:[%s11744_s2 + $0x18] sm:$0x3f] }
 0x120   :  { %672 = vmatprep.mubr.f32.mxu0 %v185_v41  ;;  %v215_v41 = vld [vmem:[%s11743_s1 + $0x478] sm:$0xff] }
 0x122   :  { %v10191_v46 = vpop.f32.mrb[6].mxu0 }
 0x123   :  { %v411_v47 = vpop.f32.mrb[7].mxu0  ;;  %673 = vmatmul.mubr.f32.gmra.mrb[112].mxu0 %v184_v44  ;;  %v217_v44 = vld [vmem:[%s11743_s1 + $0x488] sm:$0xff] }
 0x124   :  { %677 = vmatprep.mubr.f32.mxu0 %v187_v45 }
 0x126   :  { %v10199_v50 = vpop.f32.mrb[8].mxu0 }
 0x127   :  { %v416_v51 = vpop.f32.mrb[9].mxu0  ;;  %678 = vmatmul.mubr.f32.gmra.mrb[114].mxu0 %v186_v48  ;;  %v219_v48 = vld [vmem:[%s11743_s1 + $0x498] sm:$0xff] }
 0x128   :  { %682 = vmatprep.mubr.f32.mxu0 %v189_v49  ;;  %v218_v51 = vld [vmem:[%s11743_s1 + $0x490] sm:$0xff] }
 0x12a   :  { %v10207_v54 = vpop.f32.mrb[10].mxu0 }
 0x12b   :  { %v421_v55 = vpop.f32.mrb[11].mxu0  ;;  %683 = vmatmul.mubr.f32.gmra.mrb[116].mxu0 %v188_v52  ;;  %v221_v52 = vld [vmem:[%s11743_s1 + $0x4a8] sm:$0xff] }
 0x12c   :  { %687 = vmatprep.mubr.f32.mxu0 %v191_v53  ;;  %v7607_v55 = vld [vmem:[%s11744_s2 + $0x20] sm:$0x3f] }
 0x12e   :  { %v10215_v58 = vpop.f32.mrb[12].mxu0 }
 0x12f   :  { %v426_v59 = vpop.f32.mrb[13].mxu0  ;;  %688 = vmatmul.mubr.f32.gmra.mrb[118].mxu0 %v190_v56  ;;  %v220_v56 = vld [vmem:[%s11743_s1 + $0x4a0] sm:$0xff] }
 0x130   :  { %692 = vmatprep.mubr.f32.mxu0 %v193_v57  ;;  %v223_v57 = vld [vmem:[%s11743_s1 + $0x4b8] sm:$0xff] }
 0x132   :  { %v10223_v62 = vpop.f32.mrb[14].mxu0 }
 0x133   :  { %v431_v1 = vpop.f32.mrb[15].mxu0  ;;  %693 = vmatmul.mubr.f32.gmra.mrb[120].mxu0 %v192_v60  ;;  %v222_v60 = vld [vmem:[%s11743_s1 + $0x4b0] sm:$0xff] }
 0x134   :  { %697 = vmatprep.mubr.f32.mxu0 %v195_v61  ;;  %v225_v61 = vld [vmem:[%s11743_s1 + $0x4c8] sm:$0xff] }
 0x136   :  { %v434_v4 = vpop.f32.mrb[16].mxu0 }
 0x137   :  { %v436_v5 = vpop.f32.mrb[17].mxu0  ;;  %698 = vmatmul.mubr.f32.gmra.mrb[122].mxu0 %v194_v2  ;;  %8405 = vmatprep.mubr.msk.f32.mxu1 %vm1036_vm1, %v434_v4  ;;  %v224_v2 = vld [vmem:[%s11743_s1 + $0x4c0] sm:$0xff] }
 0x138   :  { %702 = vmatprep.mubr.f32.mxu0 %v197_v3  ;;  %v227_v3 = vld [vmem:[%s11743_s1 + $0x4d8] sm:$0xff] }
 0x13a   :  { %v439_v8 = vpop.f32.mrb[18].mxu0 }
 0x13b   :  { %v441_v10 = vpop.f32.mrb[19].mxu0  ;;  %703 = vmatmul.mubr.f32.gmra.mrb[124].mxu0 %v196_v6  ;;  %8406 = vmatmul.mubr.msk.f32.vlgmr.msra.gmra.mrb[0].mxu1 %vm1036_vm1, %v439_v8  ;;  %v226_v6 = vld [vmem:[%s11743_s1 + $0x4d0] sm:$0xff] }
 0x13c   :  { %707 = vmatprep.mubr.f32.mxu0 %v199_v7  ;;  %8418 = vmatpush3.msk.msra.mxu1 %vm1061_vm0, %v10064_v63  ;;  %v203_v63 = vld [vmem:[%s11743_s1 + $0x418] sm:$0xff]  ;;  %v229_v7 = vld [vmem:[%s11743_s1 + $0x4e8] sm:$0xff]  ;;  %v228_v10 = vld [vmem:[%s11743_s1 + $0x4e0] sm:$0xff] }
 0x13d   :  { %8431 = vmatprep.subr.msk.mxu1 %vm1061_vm0, %v7587_v9 }
 0x13e   :  { %v444_v13 = vpop.f32.mrb[20].mxu0 }
 0x13f   :  { %v446_v14 = vpop.f32.mrb[21].mxu0  ;;  %708 = vmatmul.mubr.f32.gmra.mrb[126].mxu0 %v198_v11  ;;  %8408 = vmatprep.mubr.msk.f32.mxu1 %vm1036_vm1, %v444_v13  ;;  %v231_v11 = vld [vmem:[%s11743_s1 + $0x4f8] sm:$0xff]  ;;  %v10385_v13 = vld [vmem:[%s11744_s2 + $0x28] sm:$0x3f] }
 0x140   :  { %712 = vmatprep.mubr.f32.mxu0 %v201_v12 }
 0x142   :  { %v449_v16 = vpop.f32.mrb[22].mxu0 }
 0x143   :  { %v451_v17 = vpop.f32.mrb[23].mxu0  ;;  %713 = vmatmul.mubr.f32.gmra.mrb[128].mxu0 %v200_v15  ;;  %8409 = vmatmul.mubr.msk.f32.gmra.mrb[2].mxu1 %vm1036_vm1, %v449_v16  ;;  %v230_v15 = vld [vmem:[%s11743_s1 + $0x4f0] sm:$0xff] }
 0x144   :  { %717 = vmatprep.mubr.f32.mxu0 %v203_v63  ;;  %v233_v63 = vld [vmem:[%s11743_s1 + $0x508] sm:$0xff] }
 0x146   :  { %v454_v20 = vpop.f32.mrb[24].mxu0 }
 0x147   :  { %v456_v21 = vpop.f32.mrb[25].mxu0  ;;  %718 = vmatmul.mubr.f32.gmra.mrb[130].mxu0 %v202_v18  ;;  %8411 = vmatprep.mubr.msk.f32.mxu1 %vm1036_vm1, %v454_v20  ;;  %v232_v18 = vld [vmem:[%s11743_s1 + $0x500] sm:$0xff] }
 0x148   :  { %722 = vmatprep.mubr.f32.mxu0 %v205_v19  ;;  %v235_v19 = vld [vmem:[%s11743_s1 + $0x518] sm:$0xff] }
 0x14a   :  { %v459_v24 = vpop.f32.mrb[26].mxu0 }
 0x14b   :  { %v461_v25 = vpop.f32.mrb[27].mxu0  ;;  %723 = vmatmul.mubr.f32.gmra.mrb[132].mxu0 %v204_v22  ;;  %8412 = vmatmul.mubr.msk.f32.gmra.mrb[4].mxu1 %vm1036_vm1, %v459_v24  ;;  %v234_v22 = vld [vmem:[%s11743_s1 + $0x510] sm:$0xff] }
 0x14c   :  { %727 = vmatprep.mubr.f32.mxu0 %v207_v23  ;;  %v237_v23 = vld [vmem:[%s11743_s1 + $0x528] sm:$0xff] }
 0x14e   :  { %v464_v28 = vpop.f32.mrb[28].mxu0 }
 0x14f   :  { %v466_v29 = vpop.f32.mrb[29].mxu0  ;;  %728 = vmatmul.mubr.f32.gmra.mrb[134].mxu0 %v206_v26  ;;  %8414 = vmatprep.mubr.msk.f32.mxu1 %vm1036_vm1, %v464_v28  ;;  %v236_v26 = vld [vmem:[%s11743_s1 + $0x520] sm:$0xff] }
 0x150   :  { %732 = vmatprep.mubr.f32.mxu0 %v209_v27  ;;  %v239_v27 = vld [vmem:[%s11743_s1 + $0x538] sm:$0xff] }
 0x152   :  { %v469_v32 = vpop.f32.mrb[30].mxu0 }
 0x153   :  { %v471_v33 = vpop.f32.mrb[31].mxu0  ;;  %733 = vmatmul.mubr.f32.gmra.mrb[136].mxu0 %v208_v30  ;;  %8415 = vmatmul.mubr.msk.f32.gmra.mrb[6].mxu1 %vm1036_vm1, %v469_v32  ;;  %v238_v30 = vld [vmem:[%s11743_s1 + $0x530] sm:$0xff] }
 0x154   :  { %8419 = vmatprep.mubr.msk.f32.mxu1 %vm1036_vm1, %v10167_v34  ;;  %737 = vmatprep.mubr.f32.mxu0 %v211_v31  ;;  %v212_v34 = vld [vmem:[%s11743_s1 + $0x460] sm:$0xff]  ;;  %v241_v31 = vld [vmem:[%s11743_s1 + $0x548] sm:$0xff] }
 0x156   :  { %v474_v37 = vpop.f32.mrb[32].mxu0 }
 0x157   :  { %v476_v39 = vpop.f32.mrb[33].mxu0  ;;  %738 = vmatmul.mubr.f32.gmra.mrb[138].mxu0 %v210_v35  ;;  %8420 = vmatmul.mubr.msk.f32.vlgmr.msra.gmra.mrb[0].mxu1 %vm1036_vm1, %v10175_v38  ;;  %v240_v35 = vld [vmem:[%s11743_s1 + $0x540] sm:$0xff] }
 0x158   :  { %8422 = vmatprep.mubr.msk.f32.mxu1 %vm1036_vm1, %v10183_v42  ;;  %742 = vmatprep.mubr.f32.mxu0 %v213_v36  ;;  %v214_v42 = vld [vmem:[%s11743_s1 + $0x470] sm:$0xff]  ;;  %v243_v36 = vld [vmem:[%s11743_s1 + $0x558] sm:$0xff] }
 0x159   :  { %8432 = vmatpush3.msk.msra.mxu1 %vm1061_vm0, %v7587_v9 }
 0x15a   :  { %v479_v43 = vpop.f32.mrb[34].mxu0  ;;  %8445 = vmatprep.subr.msk.mxu1 %vm1061_vm0, %v7597_v40 }
 0x15b   :  { %v481_v38 = vpop.f32.mrb[35].mxu0  ;;  %743 = vmatmul.mubr.f32.gmra.mrb[140].mxu0 %v212_v34  ;;  %8423 = vmatmul.mubr.msk.f32.gmra.mrb[2].mxu1 %vm1036_vm1, %v10191_v46  ;;  %v216_v46 = vld [vmem:[%s11743_s1 + $0x480] sm:$0xff]  ;;  %v245_v34 = vld [vmem:[%s11743_s1 + $0x568] sm:$0xff] }
 0x15c   :  { %8425 = vmatprep.mubr.msk.f32.mxu1 %vm1036_vm1, %v10199_v50  ;;  %747 = vmatprep.mubr.f32.mxu0 %v215_v41  ;;  %v244_v38 = vld [vmem:[%s11743_s1 + $0x560] sm:$0xff] }
 0x15e   :  { %v484_v45 = vpop.f32.mrb[36].mxu0 }
 0x15f   :  { %v486_v47 = vpop.f32.mrb[37].mxu0  ;;  %748 = vmatmul.mubr.f32.gmra.mrb[142].mxu0 %v214_v42  ;;  %8426 = vmatmul.mubr.msk.f32.gmra.mrb[4].mxu1 %vm1036_vm1, %v10207_v54  ;;  %v247_v42 = vld [vmem:[%s11743_s1 + $0x578] sm:$0xff] }
 0x160   :  { %8428 = vmatprep.mubr.msk.f32.mxu1 %vm1036_vm1, %v10215_v58  ;;  %752 = vmatprep.mubr.f32.mxu0 %v217_v44 }
 0x162   :  { %v489_v49 = vpop.f32.mrb[38].mxu0 }
 0x163   :  { %v491_v50 = vpop.f32.mrb[39].mxu0  ;;  %753 = vmatmul.mubr.f32.gmra.mrb[144].mxu0 %v216_v46  ;;  %8429 = vmatmul.mubr.msk.f32.gmra.mrb[6].mxu1 %vm1036_vm1, %v10223_v62  ;;  %v246_v46 = vld [vmem:[%s11743_s1 + $0x570] sm:$0xff] }
 0x164   :  { %8433 = vmatprep.mubr.msk.f32.mxu1 %vm1036_vm1, %v474_v37  ;;  %757 = vmatprep.mubr.f32.mxu0 %v219_v48  ;;  %v249_v48 = vld [vmem:[%s11743_s1 + $0x588] sm:$0xff] }
 0x166   :  { %v494_v53 = vpop.f32.mrb[40].mxu0 }
 0x167   :  { %v496_v54 = vpop.f32.mrb[41].mxu0  ;;  %758 = vmatmul.mubr.f32.gmra.mrb[146].mxu0 %v218_v51  ;;  %8434 = vmatmul.mubr.msk.f32.vlgmr.msra.gmra.mrb[0].mxu1 %vm1036_vm1, %v479_v43  ;;  %v248_v51 = vld [vmem:[%s11743_s1 + $0x580] sm:$0xff] }
 0x168   :  { %8436 = vmatprep.mubr.msk.f32.mxu1 %vm1036_vm1, %v484_v45  ;;  %762 = vmatprep.mubr.f32.mxu0 %v221_v52  ;;  %v10449_v45 = vld [vmem:[%s11744_s2 + $0x30] sm:$0x3f]  ;;  %v251_v52 = vld [vmem:[%s11743_s1 + $0x598] sm:$0xff] }
 0x169   :  { %8446 = vmatpush3.msk.msra.mxu1 %vm1061_vm0, %v7597_v40  ;;  %v242_v40 = vld [vmem:[%s11743_s1 + $0x550] sm:$0xff] }
 0x16a   :  { %v499_v58 = vpop.f32.mrb[42].mxu0  ;;  %8459 = vmatprep.subr.msk.mxu1 %vm1061_vm0, %v7607_v55 }
 0x16b   :  { %v501_v59 = vpop.f32.mrb[43].mxu0  ;;  %763 = vmatmul.mubr.f32.gmra.mrb[148].mxu0 %v220_v56  ;;  %8437 = vmatmul.mubr.msk.f32.gmra.mrb[2].mxu1 %vm1036_vm1, %v489_v49  ;;  %v253_v56 = vld [vmem:[%s11743_s1 + $0x5a8] sm:$0xff] }
 0x16c   :  { %8439 = vmatprep.mubr.msk.f32.mxu1 %vm1036_vm1, %v494_v53  ;;  %767 = vmatprep.mubr.f32.mxu0 %v223_v57  ;;  %v252_v59 = vld [vmem:[%s11743_s1 + $0x5a0] sm:$0xff] }
 0x16e   :  { %v504_v62 = vpop.f32.mrb[44].mxu0 }
 0x16f   :  { %v506_v1 = vpop.f32.mrb[45].mxu0  ;;  %768 = vmatmul.mubr.f32.gmra.mrb[150].mxu0 %v222_v60  ;;  %8440 = vmatmul.mubr.msk.f32.gmra.mrb[4].mxu1 %vm1036_vm1, %v499_v58  ;;  %v255_v60 = vld [vmem:[%s11743_s1 + $0x5b8] sm:$0xff] }
 0x170   :  { %8442 = vmatprep.mubr.msk.f32.mxu1 %vm1036_vm1, %v504_v62  ;;  %772 = vmatprep.mubr.f32.mxu0 %v225_v61  ;;  %v254_v1 = vld [vmem:[%s11743_s1 + $0x5b0] sm:$0xff] }
 0x172   :  { %v509_v4 = vpop.f32.mrb[46].mxu0 }
 0x173   :  { %v511_v5 = vpop.f32.mrb[47].mxu0  ;;  %773 = vmatmul.mubr.f32.gmra.mrb[152].mxu0 %v224_v2  ;;  %8443 = vmatmul.mubr.msk.f32.gmra.mrb[6].mxu1 %vm1036_vm1, %v509_v4  ;;  %v257_v2 = vld [vmem:[%s11743_s1 + $0x5c8] sm:$0xff] }
 0x174   :  { %777 = vmatprep.mubr.f32.mxu0 %v227_v3  ;;  %v256_v5 = vld [vmem:[%s11743_s1 + $0x5c0] sm:$0xff] }
 0x176   :  { %v514_v8 = vpop.f32.mrb[48].mxu0 }
 0x177   :  { %v516_v9 = vpop.f32.mrb[49].mxu0  ;;  %778 = vmatmul.mubr.f32.gmra.mrb[154].mxu0 %v226_v6  ;;  %8447 = vmatprep.mubr.msk.f32.mxu1 %vm1036_vm1, %v514_v8  ;;  %v259_v6 = vld [vmem:[%s11743_s1 + $0x5d8] sm:$0xff] }
 0x178   :  { %782 = vmatprep.mubr.f32.mxu0 %v229_v7  ;;  %v258_v9 = vld [vmem:[%s11743_s1 + $0x5d0] sm:$0xff] }
 0x17a   :  { %v519_v12 = vpop.f32.mrb[50].mxu0 }
 0x17b   :  { %v521_v14 = vpop.f32.mrb[51].mxu0  ;;  %783 = vmatmul.mubr.f32.gmra.mrb[156].mxu0 %v228_v10  ;;  %8448 = vmatmul.mubr.msk.f32.vlgmr.msra.gmra.mrb[0].mxu1 %vm1036_vm1, %v519_v12  ;;  %v261_v10 = vld [vmem:[%s11743_s1 + $0x5e8] sm:$0xff] }
 0x17c   :  { %787 = vmatprep.mubr.f32.mxu0 %v231_v11  ;;  %8460 = vmatpush3.msk.msra.mxu1 %vm1061_vm0, %v7607_v55  ;;  %v250_v55 = vld [vmem:[%s11743_s1 + $0x590] sm:$0xff]  ;;  %v263_v14 = vld [vmem:[%s11743_s1 + $0x5f8] sm:$0xff] }
 0x17d   :  { %8473 = vmatprep.subr.msk.mxu1 %vm1061_vm0, %v10385_v13 }
 0x17e   :  { %v524_v16 = vpop.f32.mrb[52].mxu0 }
 0x17f   :  { %v526_v17 = vpop.f32.mrb[53].mxu0  ;;  %788 = vmatmul.mubr.f32.gmra.mrb[158].mxu0 %v230_v15  ;;  %8450 = vmatprep.mubr.msk.f32.mxu1 %vm1036_vm1, %v524_v16 }
 0x180   :  { %792 = vmatprep.mubr.f32.mxu0 %v233_v63  ;;  %v10514_v63 = vld [vmem:[%s11744_s2 + $0x38] sm:$0x3f]  ;;  %v262_v17 = vld [vmem:[%s11743_s1 + $0x5f0] sm:$0xff] }
 0x182   :  { %v529_v20 = vpop.f32.mrb[54].mxu0 }
 0x183   :  { %v531_v21 = vpop.f32.mrb[55].mxu0  ;;  %793 = vmatmul.mubr.f32.gmra.mrb[160].mxu0 %v232_v18  ;;  %8451 = vmatmul.mubr.msk.f32.gmra.mrb[2].mxu1 %vm1036_vm1, %v529_v20  ;;  %v265_v18 = vld [vmem:[%s11743_s1 + $0x608] sm:$0xff] }
 0x184   :  { %797 = vmatprep.mubr.f32.mxu0 %v235_v19  ;;  %v264_v21 = vld [vmem:[%s11743_s1 + $0x600] sm:$0xff] }
 0x186   :  { %v534_v24 = vpop.f32.mrb[56].mxu0 }
 0x187   :  { %v536_v25 = vpop.f32.mrb[57].mxu0  ;;  %798 = vmatmul.mubr.f32.gmra.mrb[162].mxu0 %v234_v22  ;;  %8453 = vmatprep.mubr.msk.f32.mxu1 %vm1036_vm1, %v534_v24  ;;  %v267_v22 = vld [vmem:[%s11743_s1 + $0x618] sm:$0xff] }
 0x188   :  { %802 = vmatprep.mubr.f32.mxu0 %v237_v23  ;;  %v266_v25 = vld [vmem:[%s11743_s1 + $0x610] sm:$0xff] }
 0x18a   :  { %v539_v28 = vpop.f32.mrb[58].mxu0 }
 0x18b   :  { %v541_v29 = vpop.f32.mrb[59].mxu0  ;;  %803 = vmatmul.mubr.f32.gmra.mrb[164].mxu0 %v236_v26  ;;  %8454 = vmatmul.mubr.msk.f32.gmra.mrb[4].mxu1 %vm1036_vm1, %v539_v28  ;;  %v269_v26 = vld [vmem:[%s11743_s1 + $0x628] sm:$0xff] }
 0x18c   :  { %807 = vmatprep.mubr.f32.mxu0 %v239_v27  ;;  %v268_v29 = vld [vmem:[%s11743_s1 + $0x620] sm:$0xff] }
 0x18e   :  { %v544_v32 = vpop.f32.mrb[60].mxu0 }
 0x18f   :  { %v546_v33 = vpop.f32.mrb[61].mxu0  ;;  %808 = vmatmul.mubr.f32.gmra.mrb[166].mxu0 %v238_v30  ;;  %8456 = vmatprep.mubr.msk.f32.mxu1 %vm1036_vm1, %v544_v32  ;;  %v271_v30 = vld [vmem:[%s11743_s1 + $0x638] sm:$0xff] }
 0x190   :  { %812 = vmatprep.mubr.f32.mxu0 %v241_v31  ;;  %v270_v33 = vld [vmem:[%s11743_s1 + $0x630] sm:$0xff] }
 0x192   :  { %v549_v37 = vpop.f32.mrb[62].mxu0 }
 0x193   :  { %v551_v39 = vpop.f32.mrb[63].mxu0  ;;  %813 = vmatmul.mubr.f32.gmra.mrb[168].mxu0 %v240_v35  ;;  %8457 = vmatmul.mubr.msk.f32.gmra.mrb[6].mxu1 %vm1036_vm1, %v549_v37  ;;  %v273_v35 = vld [vmem:[%s11743_s1 + $0x648] sm:$0xff] }
 0x194   :  { %817 = vmatprep.mubr.f32.mxu0 %v243_v36  ;;  %v272_v39 = vld [vmem:[%s11743_s1 + $0x640] sm:$0xff] }
 0x196   :  { %v554_v41 = vpop.f32.mrb[64].mxu0 }
 0x197   :  { %v556_v43 = vpop.f32.mrb[65].mxu0  ;;  %818 = vmatmul.mubr.f32.gmra.mrb[170].mxu0 %v242_v40  ;;  %8461 = vmatprep.mubr.msk.f32.mxu1 %vm1036_vm1, %v554_v41  ;;  %v275_v40 = vld [vmem:[%s11743_s1 + $0x658] sm:$0xff] }
 0x198   :  { %822 = vmatprep.mubr.f32.mxu0 %v245_v34  ;;  %v274_v43 = vld [vmem:[%s11743_s1 + $0x650] sm:$0xff] }
 0x19a   :  { %v559_v44 = vpop.f32.mrb[66].mxu0 }
 0x19b   :  { %v561_v47 = vpop.f32.mrb[67].mxu0  ;;  %823 = vmatmul.mubr.f32.gmra.mrb[172].mxu0 %v244_v38  ;;  %8462 = vmatmul.mubr.msk.f32.vlgmr.msra.gmra.mrb[0].mxu1 %vm1036_vm1, %v559_v44  ;;  %v277_v38 = vld [vmem:[%s11743_s1 + $0x668] sm:$0xff] }
 0x19c   :  { %827 = vmatprep.mubr.f32.mxu0 %v247_v42  ;;  %8474 = vmatpush3.msk.msra.mxu1 %vm1061_vm0, %v10385_v13  ;;  %v260_v13 = vld [vmem:[%s11743_s1 + $0x5e0] sm:$0xff]  ;;  %v279_v47 = vld [vmem:[%s11743_s1 + $0x678] sm:$0xff] }
 0x19d   :  { %8487 = vmatprep.subr.msk.mxu1 %vm1061_vm0, %v10449_v45 }
 0x19e   :  { %v564_v49 = vpop.f32.mrb[68].mxu0 }
 0x19f   :  { %v566_v50 = vpop.f32.mrb[69].mxu0  ;;  %828 = vmatmul.mubr.f32.gmra.mrb[174].mxu0 %v246_v46  ;;  %8464 = vmatprep.mubr.msk.f32.mxu1 %vm1036_vm1, %v564_v49 }
 0x1a0   :  { %832 = vmatprep.mubr.f32.mxu0 %v249_v48  ;;  %v10579_v48 = vld [vmem:[%s11744_s2 + $0x40] sm:$0x3f]  ;;  %v278_v50 = vld [vmem:[%s11743_s1 + $0x670] sm:$0xff] }
 0x1a2   :  { %v569_v53 = vpop.f32.mrb[70].mxu0 }
 0x1a3   :  { %v571_v54 = vpop.f32.mrb[71].mxu0  ;;  %833 = vmatmul.mubr.f32.gmra.mrb[176].mxu0 %v248_v51  ;;  %8465 = vmatmul.mubr.msk.f32.gmra.mrb[2].mxu1 %vm1036_vm1, %v569_v53  ;;  %v281_v51 = vld [vmem:[%s11743_s1 + $0x688] sm:$0xff] }
 0x1a4   :  { %837 = vmatprep.mubr.f32.mxu0 %v251_v52  ;;  %v280_v54 = vld [vmem:[%s11743_s1 + $0x680] sm:$0xff] }
 0x1a6   :  { %v574_v57 = vpop.f32.mrb[72].mxu0 }
 0x1a7   :  { %v576_v58 = vpop.f32.mrb[73].mxu0  ;;  %838 = vmatmul.mubr.f32.gmra.mrb[178].mxu0 %v250_v55  ;;  %8467 = vmatprep.mubr.msk.f32.mxu1 %vm1036_vm1, %v574_v57  ;;  %v283_v55 = vld [vmem:[%s11743_s1 + $0x698] sm:$0xff] }
 0x1a8   :  { %842 = vmatprep.mubr.f32.mxu0 %v253_v56  ;;  %v282_v58 = vld [vmem:[%s11743_s1 + $0x690] sm:$0xff] }
 0x1aa   :  { %v579_v61 = vpop.f32.mrb[74].mxu0 }
 0x1ab   :  { %v581_v62 = vpop.f32.mrb[75].mxu0  ;;  %843 = vmatmul.mubr.f32.gmra.mrb[180].mxu0 %v252_v59  ;;  %8468 = vmatmul.mubr.msk.f32.gmra.mrb[4].mxu1 %vm1036_vm1, %v579_v61  ;;  %v285_v59 = vld [vmem:[%s11743_s1 + $0x6a8] sm:$0xff] }
 0x1ac   :  { %847 = vmatprep.mubr.f32.mxu0 %v255_v60  ;;  %v284_v62 = vld [vmem:[%s11743_s1 + $0x6a0] sm:$0xff] }
 0x1ae   :  { %v584_v3 = vpop.f32.mrb[76].mxu0 }
 0x1af   :  { %v586_v4 = vpop.f32.mrb[77].mxu0  ;;  %848 = vmatmul.mubr.f32.gmra.mrb[182].mxu0 %v254_v1  ;;  %8470 = vmatprep.mubr.msk.f32.mxu1 %vm1036_vm1, %v584_v3  ;;  %v287_v1 = vld [vmem:[%s11743_s1 + $0x6b8] sm:$0xff] }
 0x1b0   :  { %852 = vmatprep.mubr.f32.mxu0 %v257_v2  ;;  %v286_v4 = vld [vmem:[%s11743_s1 + $0x6b0] sm:$0xff] }
 0x1b2   :  { %v589_v7 = vpop.f32.mrb[78].mxu0 }
 0x1b3   :  { %v591_v8 = vpop.f32.mrb[79].mxu0  ;;  %853 = vmatmul.mubr.f32.gmra.mrb[184].mxu0 %v256_v5  ;;  %8471 = vmatmul.mubr.msk.f32.gmra.mrb[6].mxu1 %vm1036_vm1, %v589_v7  ;;  %v289_v5 = vld [vmem:[%s11743_s1 + $0x6c8] sm:$0xff] }
 0x1b4   :  { %857 = vmatprep.mubr.f32.mxu0 %v259_v6  ;;  %v288_v8 = vld [vmem:[%s11743_s1 + $0x6c0] sm:$0xff] }
 0x1b6   :  { %v594_v11 = vpop.f32.mrb[80].mxu0 }
 0x1b7   :  { %v596_v12 = vpop.f32.mrb[81].mxu0  ;;  %858 = vmatmul.mubr.f32.gmra.mrb[186].mxu0 %v258_v9  ;;  %8475 = vmatprep.mubr.msk.f32.mxu1 %vm1036_vm1, %v594_v11  ;;  %v291_v9 = vld [vmem:[%s11743_s1 + $0x6d8] sm:$0xff] }
 0x1b8   :  { %862 = vmatprep.mubr.f32.mxu0 %v261_v10  ;;  %v290_v12 = vld [vmem:[%s11743_s1 + $0x6d0] sm:$0xff] }
 0x1ba   :  { %v599_v15 = vpop.f32.mrb[82].mxu0 }
 0x1bb   :  { %v601_v16 = vpop.f32.mrb[83].mxu0  ;;  %863 = vmatmul.mubr.f32.gmra.mrb[188].mxu0 %v260_v13  ;;  %8476 = vmatmul.mubr.msk.f32.vlgmr.msra.gmra.mrb[0].mxu1 %vm1036_vm1, %v599_v15  ;;  %v293_v13 = vld [vmem:[%s11743_s1 + $0x6e8] sm:$0xff] }
 0x1bc   :  { %867 = vmatprep.mubr.f32.mxu0 %v263_v14  ;;  %8488 = vmatpush3.msk.msra.mxu1 %vm1061_vm0, %v10449_v45  ;;  %v276_v45 = vld [vmem:[%s11743_s1 + $0x660] sm:$0xff]  ;;  %v295_v16 = vld [vmem:[%s11743_s1 + $0x6f8] sm:$0xff] }
 0x1bd   :  { %8501 = vmatprep.subr.msk.mxu1 %vm1061_vm0, %v10514_v63 }
 0x1be   :  { %v604_v19 = vpop.f32.mrb[84].mxu0 }
 0x1bf   :  { %v606_v20 = vpop.f32.mrb[85].mxu0  ;;  %868 = vmatmul.mubr.f32.gmra.mrb[190].mxu0 %v262_v17  ;;  %8478 = vmatprep.mubr.msk.f32.mxu1 %vm1036_vm1, %v604_v19 }
 0x1c0   :  { %872 = vmatprep.mubr.f32.mxu0 %v265_v18  ;;  %v10644_v18 = vld [vmem:[%s11744_s2 + $0x48] sm:$0x3f]  ;;  %v294_v20 = vld [vmem:[%s11743_s1 + $0x6f0] sm:$0xff] }
 0x1c2   :  { %v609_v23 = vpop.f32.mrb[86].mxu0 }
 0x1c3   :  { %v611_v24 = vpop.f32.mrb[87].mxu0  ;;  %873 = vmatmul.mubr.f32.gmra.mrb[192].mxu0 %v264_v21  ;;  %8479 = vmatmul.mubr.msk.f32.gmra.mrb[2].mxu1 %vm1036_vm1, %v609_v23  ;;  %v297_v21 = vld [vmem:[%s11743_s1 + $0x708] sm:$0xff] }
 0x1c4   :  { %877 = vmatprep.mubr.f32.mxu0 %v267_v22  ;;  %v296_v24 = vld [vmem:[%s11743_s1 + $0x700] sm:$0xff] }
 0x1c6   :  { %v614_v27 = vpop.f32.mrb[88].mxu0 }
 0x1c7   :  { %v616_v28 = vpop.f32.mrb[89].mxu0  ;;  %878 = vmatmul.mubr.f32.gmra.mrb[194].mxu0 %v266_v25  ;;  %8481 = vmatprep.mubr.msk.f32.mxu1 %vm1036_vm1, %v614_v27  ;;  %v299_v25 = vld [vmem:[%s11743_s1 + $0x718] sm:$0xff] }
 0x1c8   :  { %882 = vmatprep.mubr.f32.mxu0 %v269_v26  ;;  %v298_v28 = vld [vmem:[%s11743_s1 + $0x710] sm:$0xff] }
 0x1ca   :  { %v619_v31 = vpop.f32.mrb[90].mxu0 }
 0x1cb   :  { %v621_v32 = vpop.f32.mrb[91].mxu0  ;;  %883 = vmatmul.mubr.f32.gmra.mrb[196].mxu0 %v268_v29  ;;  %8482 = vmatmul.mubr.msk.f32.gmra.mrb[4].mxu1 %vm1036_vm1, %v619_v31  ;;  %v301_v29 = vld [vmem:[%s11743_s1 + $0x728] sm:$0xff] }
 0x1cc   :  { %887 = vmatprep.mubr.f32.mxu0 %v271_v30  ;;  %v300_v32 = vld [vmem:[%s11743_s1 + $0x720] sm:$0xff] }
 0x1ce   :  { %v624_v36 = vpop.f32.mrb[92].mxu0 }
 0x1cf   :  { %v626_v37 = vpop.f32.mrb[93].mxu0  ;;  %888 = vmatmul.mubr.f32.gmra.mrb[198].mxu0 %v270_v33  ;;  %8484 = vmatprep.mubr.msk.f32.mxu1 %vm1036_vm1, %v624_v36  ;;  %v303_v33 = vld [vmem:[%s11743_s1 + $0x738] sm:$0xff] }
 0x1d0   :  { %892 = vmatprep.mubr.f32.mxu0 %v273_v35  ;;  %v302_v37 = vld [vmem:[%s11743_s1 + $0x730] sm:$0xff] }
 0x1d2   :  { %v629_v34 = vpop.f32.mrb[94].mxu0 }
 0x1d3   :  { %v631_v41 = vpop.f32.mrb[95].mxu0  ;;  %893 = vmatmul.mubr.f32.gmra.mrb[200].mxu0 %v272_v39  ;;  %8485 = vmatmul.mubr.msk.f32.gmra.mrb[6].mxu1 %vm1036_vm1, %v629_v34  ;;  %v305_v39 = vld [vmem:[%s11743_s1 + $0x748] sm:$0xff] }
 0x1d4   :  { %897 = vmatprep.mubr.f32.mxu0 %v275_v40  ;;  %v304_v41 = vld [vmem:[%s11743_s1 + $0x740] sm:$0xff] }
 0x1d6   :  { %v634_v42 = vpop.f32.mrb[96].mxu0 }
 0x1d7   :  { %v636_v44 = vpop.f32.mrb[97].mxu0  ;;  %898 = vmatmul.mubr.f32.gmra.mrb[202].mxu0 %v274_v43  ;;  %8489 = vmatprep.mubr.msk.f32.mxu1 %vm1036_vm1, %v634_v42  ;;  %v307_v43 = vld [vmem:[%s11743_s1 + $0x758] sm:$0xff] }
 0x1d8   :  { %902 = vmatprep.mubr.f32.mxu0 %v277_v38  ;;  %v306_v44 = vld [vmem:[%s11743_s1 + $0x750] sm:$0xff] }
 0x1da   :  { %v639_v46 = vpop.f32.mrb[98].mxu0 }
 0x1db   :  { %v641_v49 = vpop.f32.mrb[99].mxu0  ;;  %903 = vmatmul.mubr.f32.gmra.mrb[204].mxu0 %v276_v45  ;;  %8490 = vmatmul.mubr.msk.f32.vlgmr.msra.gmra.mrb[0].mxu1 %vm1036_vm1, %v639_v46  ;;  %v309_v45 = vld [vmem:[%s11743_s1 + $0x768] sm:$0xff] }
 0x1dc   :  { %907 = vmatprep.mubr.f32.mxu0 %v279_v47  ;;  %8502 = vmatpush3.msk.msra.mxu1 %vm1061_vm0, %v10514_v63  ;;  %v292_v63 = vld [vmem:[%s11743_s1 + $0x6e0] sm:$0xff]  ;;  %v311_v49 = vld [vmem:[%s11743_s1 + $0x778] sm:$0xff] }
 0x1dd   :  { %8515 = vmatprep.subr.msk.mxu1 %vm1061_vm0, %v10579_v48 }
 0x1de   :  { %v644_v52 = vpop.f32.mrb[100].mxu0 }
 0x1df   :  { %v646_v53 = vpop.f32.mrb[101].mxu0  ;;  %908 = vmatmul.mubr.f32.gmra.mrb[206].mxu0 %v278_v50  ;;  %8492 = vmatprep.mubr.msk.f32.mxu1 %vm1036_vm1, %v644_v52 }
 0x1e0   :  { %912 = vmatprep.mubr.f32.mxu0 %v281_v51  ;;  %v10709_v51 = vld [vmem:[%s11744_s2 + $0x50] sm:$0x3f] }
 0x1e1   :  { %v310_v53 = vld [vmem:[%s11743_s1 + $0x770] sm:$0xff] }
 0x1e2   :  { %v649_v56 = vpop.f32.mrb[102].mxu0 }
 0x1e3   :  { %v651_v57 = vpop.f32.mrb[103].mxu0  ;;  %913 = vmatmul.mubr.f32.gmra.mrb[208].mxu0 %v280_v54  ;;  %8493 = vmatmul.mubr.msk.f32.gmra.mrb[2].mxu1 %vm1036_vm1, %v649_v56  ;;  %v313_v54 = vld [vmem:[%s11743_s1 + $0x788] sm:$0xff] }
 0x1e4   :  { %917 = vmatprep.mubr.f32.mxu0 %v283_v55  ;;  %v312_v57 = vld [vmem:[%s11743_s1 + $0x780] sm:$0xff] }
 0x1e6   :  { %v654_v60 = vpop.f32.mrb[104].mxu0 }
 0x1e7   :  { %v656_v61 = vpop.f32.mrb[105].mxu0  ;;  %918 = vmatmul.mubr.f32.gmra.mrb[210].mxu0 %v282_v58  ;;  %8495 = vmatprep.mubr.msk.f32.mxu1 %vm1036_vm1, %v654_v60  ;;  %v315_v58 = vld [vmem:[%s11743_s1 + $0x798] sm:$0xff] }
 0x1e8   :  { %922 = vmatprep.mubr.f32.mxu0 %v285_v59  ;;  %v314_v61 = vld [vmem:[%s11743_s1 + $0x790] sm:$0xff] }
 0x1ea   :  { %v659_v2 = vpop.f32.mrb[106].mxu0 }
 0x1eb   :  { %v661_v3 = vpop.f32.mrb[107].mxu0  ;;  %923 = vmatmul.mubr.f32.gmra.mrb[212].mxu0 %v284_v62  ;;  %8496 = vmatmul.mubr.msk.f32.gmra.mrb[4].mxu1 %vm1036_vm1, %v659_v2  ;;  %v317_v62 = vld [vmem:[%s11743_s1 + $0x7a8] sm:$0xff] }
 0x1ec   :  { %927 = vmatprep.mubr.f32.mxu0 %v287_v1  ;;  %v316_v3 = vld [vmem:[%s11743_s1 + $0x7a0] sm:$0xff] }
 0x1ee   :  { %v664_v6 = vpop.f32.mrb[108].mxu0 }
 0x1ef   :  { %v666_v7 = vpop.f32.mrb[109].mxu0  ;;  %928 = vmatmul.mubr.f32.gmra.mrb[214].mxu0 %v286_v4  ;;  %8498 = vmatprep.mubr.msk.f32.mxu1 %vm1036_vm1, %v664_v6  ;;  %v319_v4 = vld [vmem:[%s11743_s1 + $0x7b8] sm:$0xff] }
 0x1f0   :  { %932 = vmatprep.mubr.f32.mxu0 %v289_v5  ;;  %v318_v7 = vld [vmem:[%s11743_s1 + $0x7b0] sm:$0xff] }
 0x1f2   :  { %v669_v10 = vpop.f32.mrb[110].mxu0 }
 0x1f3   :  { %v671_v11 = vpop.f32.mrb[111].mxu0  ;;  %933 = vmatmul.mubr.f32.gmra.mrb[216].mxu0 %v288_v8  ;;  %8499 = vmatmul.mubr.msk.f32.gmra.mrb[6].mxu1 %vm1036_vm1, %v669_v10  ;;  %v321_v8 = vld [vmem:[%s11743_s1 + $0x7c8] sm:$0xff] }
 0x1f4   :  { %937 = vmatprep.mubr.f32.mxu0 %v291_v9  ;;  %v320_v11 = vld [vmem:[%s11743_s1 + $0x7c0] sm:$0xff] }
 0x1f6   :  { %v674_v14 = vpop.f32.mrb[112].mxu0 }
 0x1f7   :  { %v676_v15 = vpop.f32.mrb[113].mxu0  ;;  %938 = vmatmul.mubr.f32.gmra.mrb[218].mxu0 %v290_v12  ;;  %8503 = vmatprep.mubr.msk.f32.mxu1 %vm1036_vm1, %v674_v14  ;;  %v323_v12 = vld [vmem:[%s11743_s1 + $0x7d8] sm:$0xff] }
 0x1f8   :  { %942 = vmatprep.mubr.f32.mxu0 %v293_v13  ;;  %v322_v15 = vld [vmem:[%s11743_s1 + $0x7d0] sm:$0xff] }
 0x1fa   :  { %v679_v17 = vpop.f32.mrb[114].mxu0 }
 0x1fb   :  { %v681_v19 = vpop.f32.mrb[115].mxu0  ;;  %943 = vmatmul.mubr.f32.gmra.mrb[220].mxu0 %v292_v63  ;;  %8504 = vmatmul.mubr.msk.f32.vlgmr.msra.gmra.mrb[0].mxu1 %vm1036_vm1, %v679_v17  ;;  %v325_v63 = vld [vmem:[%s11743_s1 + $0x7e8] sm:$0xff] }
 0x1fc   :  { %947 = vmatprep.mubr.f32.mxu0 %v295_v16  ;;  %8516 = vmatpush3.msk.msra.mxu1 %vm1061_vm0, %v10579_v48  ;;  %v308_v48 = vld [vmem:[%s11743_s1 + $0x760] sm:$0xff]  ;;  %v327_v19 = vld [vmem:[%s11743_s1 + $0x7f8] sm:$0xff] }
 0x1fd   :  { %8529 = vmatprep.subr.msk.mxu1 %vm1061_vm0, %v10644_v18 }
 0x1fe   :  { %v684_v22 = vpop.f32.mrb[116].mxu0 }
 0x1ff   :  { %v686_v23 = vpop.f32.mrb[117].mxu0  ;;  %948 = vmatmul.mubr.f32.gmra.mrb[222].mxu0 %v294_v20  ;;  %8506 = vmatprep.mubr.msk.f32.mxu1 %vm1036_vm1, %v684_v22 }
 0x200   :  { %952 = vmatprep.mubr.f32.mxu0 %v297_v21  ;;  %v7677_v21 = vld [vmem:[%s11744_s2 + $0x58] sm:$0x3f]  ;;  %v326_v23 = vld [vmem:[%s11743_s1 + $0x7f0] sm:$0xff] }
 0x202   :  { %v689_v26 = vpop.f32.mrb[118].mxu0 }
 0x203   :  { %v691_v27 = vpop.f32.mrb[119].mxu0  ;;  %953 = vmatmul.mubr.f32.gmra.mrb[224].mxu0 %v296_v24  ;;  %8507 = vmatmul.mubr.msk.f32.gmra.mrb[2].mxu1 %vm1036_vm1, %v689_v26 }
 0x204   :  { %957 = vmatprep.mubr.f32.mxu0 %v299_v25 }
 0x206   :  { %v694_v30 = vpop.f32.mrb[120].mxu0 }
 0x207   :  { %v696_v31 = vpop.f32.mrb[121].mxu0  ;;  %958 = vmatmul.mubr.f32.gmra.mrb[226].mxu0 %v298_v28  ;;  %8509 = vmatprep.mubr.msk.f32.mxu1 %vm1036_vm1, %v694_v30 }
 0x208   :  { %962 = vmatprep.mubr.f32.mxu0 %v301_v29 }
 0x20a   :  { %v699_v35 = vpop.f32.mrb[122].mxu0 }
 0x20b   :  { %v701_v36 = vpop.f32.mrb[123].mxu0  ;;  %963 = vmatmul.mubr.f32.gmra.mrb[228].mxu0 %v300_v32  ;;  %8510 = vmatmul.mubr.msk.f32.gmra.mrb[4].mxu1 %vm1036_vm1, %v699_v35 }
 0x20c   :  { %967 = vmatprep.mubr.f32.mxu0 %v303_v33 }
 0x20e   :  { %v704_v40 = vpop.f32.mrb[124].mxu0 }
 0x20f   :  { %v706_v34 = vpop.f32.mrb[125].mxu0  ;;  %968 = vmatmul.mubr.f32.gmra.mrb[230].mxu0 %v302_v37  ;;  %8512 = vmatprep.mubr.msk.f32.mxu1 %vm1036_vm1, %v704_v40 }
 0x210   :  { %972 = vmatprep.mubr.f32.mxu0 %v305_v39  ;;  %v7687_v34 = vld [vmem:[%s11744_s2 + $0x60] sm:$0x3f] }
 0x212   :  { %v709_v38 = vpop.f32.mrb[126].mxu0 }
 0x213   :  { %v711_v42 = vpop.f32.mrb[127].mxu0  ;;  %973 = vmatmul.mubr.f32.gmra.mrb[232].mxu0 %v304_v41  ;;  %8513 = vmatmul.mubr.msk.f32.gmra.mrb[6].mxu1 %vm1036_vm1, %v709_v38 }
 0x214   :  { %977 = vmatprep.mubr.f32.mxu0 %v307_v43 }
 0x216   :  { %v714_v47 = vpop.f32.mrb[128].mxu0 }
 0x217   :  { %v716_v46 = vpop.f32.mrb[129].mxu0  ;;  %978 = vmatmul.mubr.f32.gmra.mrb[234].mxu0 %v306_v44  ;;  %8517 = vmatprep.mubr.msk.f32.mxu1 %vm1036_vm1, %v714_v47 }
 0x218   :  { %982 = vmatprep.mubr.f32.mxu0 %v309_v45 }
 0x21a   :  { %v719_v50 = vpop.f32.mrb[130].mxu0 }
 0x21b   :  { %v721_v52 = vpop.f32.mrb[131].mxu0  ;;  %983 = vmatmul.mubr.f32.gmra.mrb[236].mxu0 %v308_v48  ;;  %8518 = vmatmul.mubr.msk.f32.vlgmr.msra.gmra.mrb[0].mxu1 %vm1036_vm1, %v719_v50 }
 0x21c   :  { %987 = vmatprep.mubr.f32.mxu0 %v311_v49  ;;  %8530 = vmatpush3.msk.msra.mxu1 %vm1061_vm0, %v10644_v18  ;;  %v324_v18 = vld [vmem:[%s11743_s1 + $0x7e0] sm:$0xff] }
 0x21d   :  { %8543 = vmatprep.subr.msk.mxu1 %vm1061_vm0, %v10709_v51 }
 0x21e   :  { %v724_v55 = vpop.f32.mrb[132].mxu0 }
 0x21f   :  { %v726_v56 = vpop.f32.mrb[133].mxu0  ;;  %988 = vmatmul.mubr.f32.gmra.mrb[238].mxu0 %v310_v53  ;;  %8520 = vmatprep.mubr.msk.f32.mxu1 %vm1036_vm1, %v724_v55 }
 0x220   :  { %992 = vmatprep.mubr.f32.mxu0 %v313_v54  ;;  %v7697_v56 = vld [vmem:[%s11744_s2 + $0x68] sm:$0x3f] }
 0x222   :  { %v729_v59 = vpop.f32.mrb[134].mxu0 }
 0x223   :  { %v731_v60 = vpop.f32.mrb[135].mxu0  ;;  %993 = vmatmul.mubr.f32.gmra.mrb[240].mxu0 %v312_v57  ;;  %8521 = vmatmul.mubr.msk.f32.gmra.mrb[2].mxu1 %vm1036_vm1, %v729_v59 }
 0x224   :  { %997 = vmatprep.mubr.f32.mxu0 %v315_v58 }
 0x226   :  { %v734_v1 = vpop.f32.mrb[136].mxu0 }
 0x227   :  { %v736_v2 = vpop.f32.mrb[137].mxu0  ;;  %998 = vmatmul.mubr.f32.gmra.mrb[242].mxu0 %v314_v61  ;;  %8523 = vmatprep.mubr.msk.f32.mxu1 %vm1036_vm1, %v734_v1 }
 0x228   :  { %1002 = vmatprep.mubr.f32.mxu0 %v317_v62 }
 0x22a   :  { %v739_v5 = vpop.f32.mrb[138].mxu0 }
 0x22b   :  { %v741_v6 = vpop.f32.mrb[139].mxu0  ;;  %1003 = vmatmul.mubr.f32.gmra.mrb[244].mxu0 %v316_v3  ;;  %8524 = vmatmul.mubr.msk.f32.gmra.mrb[4].mxu1 %vm1036_vm1, %v739_v5 }
 0x22c   :  { %1007 = vmatprep.mubr.f32.mxu0 %v319_v4 }
 0x22e   :  { %v744_v9 = vpop.f32.mrb[140].mxu0 }
 0x22f   :  { %v746_v10 = vpop.f32.mrb[141].mxu0  ;;  %1008 = vmatmul.mubr.f32.gmra.mrb[246].mxu0 %v318_v7  ;;  %8526 = vmatprep.mubr.msk.f32.mxu1 %vm1036_vm1, %v744_v9 }
 0x230   :  { %1012 = vmatprep.mubr.f32.mxu0 %v321_v8 }
 0x232   :  { %v749_v13 = vpop.f32.mrb[142].mxu0 }
 0x233   :  { %v751_v14 = vpop.f32.mrb[143].mxu0  ;;  %1013 = vmatmul.mubr.f32.gmra.mrb[248].mxu0 %v320_v11  ;;  %8527 = vmatmul.mubr.msk.f32.gmra.mrb[6].mxu1 %vm1036_vm1, %v749_v13  ;;  %v7707_v11 = vld [vmem:[%s11744_s2 + $0x70] sm:$0x3f] }
 0x234   :  { %1017 = vmatprep.mubr.f32.mxu0 %v323_v12 }
 0x236   :  { %v754_v16 = vpop.f32.mrb[144].mxu0 }
 0x237   :  { %v756_v17 = vpop.f32.mrb[145].mxu0  ;;  %1018 = vmatmul.mubr.f32.gmra.mrb[250].mxu0 %v322_v15  ;;  %8531 = vmatprep.mubr.msk.f32.mxu1 %vm1036_vm1, %v754_v16 }
 0x238   :  { %1022 = vmatprep.mubr.f32.mxu0 %v325_v63 }
 0x23a   :  { %v759_v20 = vpop.f32.mrb[146].mxu0 }
 0x23b   :  { %v761_v22 = vpop.f32.mrb[147].mxu0  ;;  %1023 = vmatmul.mubr.f32.gmra.mrb[252].mxu0 %v324_v18  ;;  %8532 = vmatmul.mubr.msk.f32.vlgmr.msra.gmra.mrb[0].mxu1 %vm1036_vm1, %v759_v20 }
 0x23c   :  { %1027 = vmatprep.mubr.f32.mxu0 %v327_v19  ;;  %8544 = vmatpush3.msk.msra.mxu1 %vm1061_vm0, %v10709_v51 }
 0x23d   :  { %8557 = vmatprep.subr.msk.mxu1 %vm1061_vm0, %v7677_v21 }
 0x23e   :  { %v764_v24 = vpop.f32.mrb[148].mxu0 }
 0x23f   :  { %v766_v25 = vpop.f32.mrb[149].mxu0  ;;  %1028 = vmatmul.mubr.f32.gmra.mrb[254].mxu0 %v326_v23  ;;  %8534 = vmatprep.mubr.msk.f32.mxu1 %vm1036_vm1, %v764_v24 }
 0x242   :  { %v769_v26 = vpop.f32.mrb[150].mxu0 }
 0x243   :  { %v771_v27 = vpop.f32.mrb[151].mxu0  ;;  %8535 = vmatmul.mubr.msk.f32.gmra.mrb[2].mxu1 %vm1036_vm1, %v769_v26 }
 0x244   :  { %v7717_v27 = vld [vmem:[%s11744_s2 + $0x78] sm:$0x3f] }
 0x246   :  { %v774_v28 = vpop.f32.mrb[152].mxu0 }
 0x247   :  { %v776_v29 = vpop.f32.mrb[153].mxu0  ;;  %8537 = vmatprep.mubr.msk.f32.mxu1 %vm1036_vm1, %v774_v28 }
 0x24a   :  { %v779_v30 = vpop.f32.mrb[154].mxu0 }
 0x24b   :  { %v781_v31 = vpop.f32.mrb[155].mxu0  ;;  %8538 = vmatmul.mubr.msk.f32.gmra.mrb[4].mxu1 %vm1036_vm1, %v779_v30 }
 0x24e   :  { %v784_v32 = vpop.f32.mrb[156].mxu0 }
 0x24f   :  { %v786_v33 = vpop.f32.mrb[157].mxu0  ;;  %8540 = vmatprep.mubr.msk.f32.mxu1 %vm1036_vm1, %v784_v32 }
 0x252   :  { %v789_v35 = vpop.f32.mrb[158].mxu0 }
 0x253   :  { %v791_v36 = vpop.f32.mrb[159].mxu0  ;;  %8541 = vmatmul.mubr.msk.f32.gmra.mrb[6].mxu1 %vm1036_vm1, %v789_v35 }
 0x256   :  { %v794_v37 = vpop.f32.mrb[160].mxu0 }
 0x257   :  { %v796_v39 = vpop.f32.mrb[161].mxu0  ;;  %8545 = vmatprep.mubr.msk.f32.mxu1 %vm1036_vm1, %v794_v37 }
 0x25a   :  { %v799_v40 = vpop.f32.mrb[162].mxu0 }
 0x25b   :  { %v801_v41 = vpop.f32.mrb[163].mxu0  ;;  %8546 = vmatmul.mubr.msk.f32.vlgmr.msra.gmra.mrb[0].mxu1 %vm1036_vm1, %v799_v40 }
 0x25c   :  { %8558 = vmatpush3.msk.msra.mxu1 %vm1061_vm0, %v7677_v21 }
 0x25d   :  { %8571 = vmatprep.subr.msk.mxu1 %vm1061_vm0, %v7687_v34 }
 0x25e   :  { %v804_v43 = vpop.f32.mrb[164].mxu0 }
 0x25f   :  { %v806_v38 = vpop.f32.mrb[165].mxu0  ;;  %8548 = vmatprep.mubr.msk.f32.mxu1 %vm1036_vm1, %v804_v43 }
 0x262   :  { %v809_v42 = vpop.f32.mrb[166].mxu0 }
 0x263   :  { %v811_v44 = vpop.f32.mrb[167].mxu0  ;;  %8549 = vmatmul.mubr.msk.f32.gmra.mrb[2].mxu1 %vm1036_vm1, %v809_v42 }
 0x266   :  { %v814_v45 = vpop.f32.mrb[168].mxu0 }
 0x267   :  { %v816_v47 = vpop.f32.mrb[169].mxu0  ;;  %8551 = vmatprep.mubr.msk.f32.mxu1 %vm1036_vm1, %v814_v45 }
 0x26a   :  { %v819_v46 = vpop.f32.mrb[170].mxu0 }
 0x26b   :  { %v821_v48 = vpop.f32.mrb[171].mxu0  ;;  %8552 = vmatmul.mubr.msk.f32.gmra.mrb[4].mxu1 %vm1036_vm1, %v819_v46 }
 0x26e   :  { %v824_v49 = vpop.f32.mrb[172].mxu0 }
 0x26f   :  { %v826_v50 = vpop.f32.mrb[173].mxu0  ;;  %8554 = vmatprep.mubr.msk.f32.mxu1 %vm1036_vm1, %v824_v49 }
 0x272   :  { %v829_v51 = vpop.f32.mrb[174].mxu0 }
 0x273   :  { %v831_v52 = vpop.f32.mrb[175].mxu0  ;;  %8555 = vmatmul.mubr.msk.f32.gmra.mrb[6].mxu1 %vm1036_vm1, %v829_v51 }
 0x276   :  { %v834_v53 = vpop.f32.mrb[176].mxu0 }
 0x277   :  { %v836_v54 = vpop.f32.mrb[177].mxu0  ;;  %8559 = vmatprep.mubr.msk.f32.mxu1 %vm1036_vm1, %v834_v53 }
 0x27a   :  { %v839_v55 = vpop.f32.mrb[178].mxu0 }
 0x27b   :  { %v841_v57 = vpop.f32.mrb[179].mxu0  ;;  %8560 = vmatmul.mubr.msk.f32.vlgmr.msra.gmra.mrb[0].mxu1 %vm1036_vm1, %v839_v55 }
 0x27c   :  { %8572 = vmatpush3.msk.msra.mxu1 %vm1061_vm0, %v7687_v34 }
 0x27d   :  { %8585 = vmatprep.subr.msk.mxu1 %vm1061_vm0, %v7697_v56 }
 0x27e   :  { %v844_v58 = vpop.f32.mrb[180].mxu0 }
 0x27f   :  { %v846_v59 = vpop.f32.mrb[181].mxu0  ;;  %8562 = vmatprep.mubr.msk.f32.mxu1 %vm1036_vm1, %v844_v58 }
 0x282   :  { %v849_v60 = vpop.f32.mrb[182].mxu0 }
 0x283   :  { %v851_v61 = vpop.f32.mrb[183].mxu0  ;;  %8563 = vmatmul.mubr.msk.f32.gmra.mrb[2].mxu1 %vm1036_vm1, %v849_v60 }
 0x286   :  { %v854_v62 = vpop.f32.mrb[184].mxu0 }
 0x287   :  { %v856_v1 = vpop.f32.mrb[185].mxu0  ;;  %8565 = vmatprep.mubr.msk.f32.mxu1 %vm1036_vm1, %v854_v62 }
 0x28a   :  { %v859_v2 = vpop.f32.mrb[186].mxu0 }
 0x28b   :  { %v861_v3 = vpop.f32.mrb[187].mxu0  ;;  %8566 = vmatmul.mubr.msk.f32.gmra.mrb[4].mxu1 %vm1036_vm1, %v859_v2 }
 0x28e   :  { %v864_v4 = vpop.f32.mrb[188].mxu0 }
 0x28f   :  { %v866_v5 = vpop.f32.mrb[189].mxu0  ;;  %8568 = vmatprep.mubr.msk.f32.mxu1 %vm1036_vm1, %v864_v4 }
 0x292   :  { %v869_v6 = vpop.f32.mrb[190].mxu0 }
 0x293   :  { %v871_v7 = vpop.f32.mrb[191].mxu0  ;;  %8569 = vmatmul.mubr.msk.f32.gmra.mrb[6].mxu1 %vm1036_vm1, %v869_v6 }
 0x296   :  { %v874_v8 = vpop.f32.mrb[192].mxu0 }
 0x297   :  { %v876_v9 = vpop.f32.mrb[193].mxu0  ;;  %8573 = vmatprep.mubr.msk.f32.mxu1 %vm1036_vm1, %v874_v8 }
 0x29a   :  { %v879_v10 = vpop.f32.mrb[194].mxu0 }
 0x29b   :  { %v881_v12 = vpop.f32.mrb[195].mxu0  ;;  %8574 = vmatmul.mubr.msk.f32.vlgmr.msra.gmra.mrb[0].mxu1 %vm1036_vm1, %v879_v10 }
 0x29c   :  { %8586 = vmatpush3.msk.msra.mxu1 %vm1061_vm0, %v7697_v56  ;;  %v3345_v12 = vld [vmem:[%s11745_s4 + $0x80] sm:$0xff] }
 0x29d   :  { %8599 = vmatprep.subr.msk.mxu1 %vm1061_vm0, %v7707_v11 }
 0x29e   :  { %v884_v13 = vpop.f32.mrb[196].mxu0 }
 0x29f   :  { %v886_v14 = vpop.f32.mrb[197].mxu0  ;;  %8576 = vmatprep.mubr.msk.f32.mxu1 %vm1036_vm1, %v884_v13  ;;  %v7727_v13 = vld [vmem:[%s11746_s3] ss:$0 sm:$0xff] }
 0x2a2   :  { %v889_v15 = vpop.f32.mrb[198].mxu0 }
 0x2a3   :  { %v891_v63 = vpop.f32.mrb[199].mxu0  ;;  %8577 = vmatmul.mubr.msk.f32.gmra.mrb[2].mxu1 %vm1036_vm1, %v889_v15 }
 0x2a6   :  { %v894_v16 = vpop.f32.mrb[200].mxu0 }
 0x2a7   :  { %v896_v17 = vpop.f32.mrb[201].mxu0  ;;  %8579 = vmatprep.mubr.msk.f32.mxu1 %vm1036_vm1, %v894_v16 }
 0x2aa   :  { %v899_v18 = vpop.f32.mrb[202].mxu0 }
 0x2ab   :  { %v901_v19 = vpop.f32.mrb[203].mxu0  ;;  %8580 = vmatmul.mubr.msk.f32.gmra.mrb[4].mxu1 %vm1036_vm1, %v899_v18 }
 0x2ae   :  { %v904_v20 = vpop.f32.mrb[204].mxu0 }
 0x2af   :  { %v906_v21 = vpop.f32.mrb[205].mxu0  ;;  %8582 = vmatprep.mubr.msk.f32.mxu1 %vm1036_vm1, %v904_v20 }
 0x2b2   :  { %v909_v22 = vpop.f32.mrb[206].mxu0 }
 0x2b3   :  { %v911_v23 = vpop.f32.mrb[207].mxu0  ;;  %8583 = vmatmul.mubr.msk.f32.gmra.mrb[6].mxu1 %vm1036_vm1, %v909_v22 }
 0x2b6   :  { %v914_v24 = vpop.f32.mrb[208].mxu0 }
 0x2b7   :  { %v916_v25 = vpop.f32.mrb[209].mxu0  ;;  %8587 = vmatprep.mubr.msk.f32.mxu1 %vm1036_vm1, %v914_v24 }
 0x2ba   :  { %v919_v26 = vpop.f32.mrb[210].mxu0 }
 0x2bb   :  { %v921_v28 = vpop.f32.mrb[211].mxu0  ;;  %8588 = vmatmul.mubr.msk.f32.vlgmr.msra.gmra.mrb[0].mxu1 %vm1036_vm1, %v919_v26 }
 0x2bc   :  { %8600 = vmatpush3.msk.msra.mxu1 %vm1061_vm0, %v7707_v11  ;;  %v3329_v11 = vld [vmem:[%s11745_s4] sm:$0xff] }
 0x2bd   :  { %8613 = vmatprep.subr.msk.mxu1 %vm1061_vm0, %v7717_v27  ;;  %8643 = vmatprep.mubr.msk.f32.mxu0 %vm3361_vm2, %v3329_v11  ;;  %v3356_v11 = vld [vmem:[%s11745_s4 + $0xd8] sm:$0xff] }
 0x2be   :  { %v924_v29 = vpop.f32.mrb[212].mxu0 }
 0x2bf   :  { %v926_v30 = vpop.f32.mrb[213].mxu0  ;;  %8590 = vmatprep.mubr.msk.f32.mxu1 %vm1036_vm1, %v924_v29 }
 0x2c2   :  { %v929_v31 = vpop.f32.mrb[214].mxu0 }
 0x2c3   :  { %v931_v32 = vpop.f32.mrb[215].mxu0  ;;  %8591 = vmatmul.mubr.msk.f32.gmra.mrb[2].mxu1 %vm1036_vm1, %v929_v31 }
 0x2c6   :  { %v934_v33 = vpop.f32.mrb[216].mxu0 }
 0x2c7   :  { %v936_v35 = vpop.f32.mrb[217].mxu0  ;;  %8593 = vmatprep.mubr.msk.f32.mxu1 %vm1036_vm1, %v934_v33 }
 0x2ca   :  { %v939_v36 = vpop.f32.mrb[218].mxu0 }
 0x2cb   :  { %v941_v37 = vpop.f32.mrb[219].mxu0  ;;  %8594 = vmatmul.mubr.msk.f32.gmra.mrb[4].mxu1 %vm1036_vm1, %v939_v36 }
 0x2ce   :  { %v944_v39 = vpop.f32.mrb[220].mxu0 }
 0x2cf   :  { %v946_v40 = vpop.f32.mrb[221].mxu0  ;;  %8596 = vmatprep.mubr.msk.f32.mxu1 %vm1036_vm1, %v944_v39 }
 0x2d2   :  { %v949_v34 = vpop.f32.mrb[222].mxu0 }
 0x2d3   :  { %v951_v41 = vpop.f32.mrb[223].mxu0  ;;  %8597 = vmatmul.mubr.msk.f32.gmra.mrb[6].mxu1 %vm1036_vm1, %v949_v34 }
 0x2d6   :  { %v954_v43 = vpop.f32.mrb[224].mxu0 }
 0x2d7   :  { %v956_v38 = vpop.f32.mrb[225].mxu0  ;;  %8601 = vmatprep.mubr.msk.f32.mxu1 %vm1036_vm1, %v954_v43 }
 0x2da   :  { %v959_v42 = vpop.f32.mrb[226].mxu0 }
 0x2db   :  { %v961_v44 = vpop.f32.mrb[227].mxu0  ;;  %8602 = vmatmul.mubr.msk.f32.vlgmr.msra.gmra.mrb[0].mxu1 %vm1036_vm1, %v959_v42 }
 0x2dc   :  { %8614 = vmatpush3.msk.msra.mxu1 %vm1061_vm0, %v7717_v27  ;;  %vm6085_vm0 = vcmask 15360  }
 0x2de   :  { %v964_v45 = vpop.f32.mrb[228].mxu0 }
 0x2df   :  { %v966_v47 = vpop.f32.mrb[229].mxu0  ;;  %8604 = vmatprep.mubr.msk.f32.mxu1 %vm1036_vm1, %v964_v45 }
 0x2e0   :  { %v3683_v47 = vld [vmem:[%s11747_s5] sm:$0xff] }
 0x2e2   :  { %v969_v46 = vpop.f32.mrb[230].mxu0 }
 0x2e3   :  { %v971_v48 = vpop.f32.mrb[231].mxu0  ;;  %8605 = vmatmul.mubr.msk.f32.gmra.mrb[2].mxu1 %vm1036_vm1, %v969_v46  ;;  %v3684_v46 = vld [vmem:[%s11747_s5 + $0x8] sm:$0xff] }
 0x2e6   :  { %v974_v49 = vpop.f32.mrb[232].mxu0 }
 0x2e7   :  { %v976_v50 = vpop.f32.mrb[233].mxu0  ;;  %8607 = vmatprep.mubr.msk.f32.mxu1 %vm1036_vm1, %v974_v49 }
 0x2ea   :  { %v979_v51 = vpop.f32.mrb[234].mxu0 }
 0x2eb   :  { %v981_v52 = vpop.f32.mrb[235].mxu0  ;;  %8608 = vmatmul.mubr.msk.f32.gmra.mrb[4].mxu1 %vm1036_vm1, %v979_v51  ;;  %v9205_v51 = vpack.c.bf16 %v3684_v46, %v3683_v47  ;;  %v7778_v46 = vld [vmem:[%s11747_s5 + $0x50] sm:$0xff] }
 0x2ec   :  { %v3330_v52 = vld [vmem:[%s11745_s4 + $0x8] sm:$0xff] }
 0x2ee   :  { %v984_v53 = vpop.f32.mrb[236].mxu0 }
 0x2ef   :  { %v986_v54 = vpop.f32.mrb[237].mxu0  ;;  %8610 = vmatprep.mubr.msk.f32.mxu1 %vm1036_vm1, %v984_v53  ;;  %v3346_v53 = vld [vmem:[%s11745_s4 + $0x88] sm:$0xff] }
 0x2f0   :  { %v3331_v54 = vld [vmem:[%s11745_s4 + $0x10] sm:$0xff] }
 0x2f2   :  { %v989_v55 = vpop.f32.mrb[238].mxu0 }
 0x2f3   :  { %v991_v56 = vpop.f32.mrb[239].mxu0  ;;  %8611 = vmatmul.mubr.msk.f32.gmra.mrb[6].mxu1 %vm1036_vm1, %v989_v55  ;;  %v3347_v55 = vld [vmem:[%s11745_s4 + $0x90] sm:$0xff] }
 0x2f4   :  { %v3332_v56 = vld [vmem:[%s11745_s4 + $0x18] sm:$0xff] }
 0x2f6   :  { %v994_v57 = vpop.f32.mrb[240].mxu0 }
 0x2f7   :  { %v996_v58 = vpop.f32.mrb[241].mxu0  ;;  %8615 = vmatprep.mubr.msk.f32.mxu1 %vm1036_vm1, %v994_v57  ;;  %v3348_v57 = vld [vmem:[%s11745_s4 + $0x98] sm:$0xff] }
 0x2f8   :  { %v3333_v58 = vld [vmem:[%s11745_s4 + $0x20] sm:$0xff] }
 0x2fa   :  { %v999_v59 = vpop.f32.mrb[242].mxu0 }
 0x2fb   :  { %v1001_v60 = vpop.f32.mrb[243].mxu0  ;;  %8616 = vmatmul.mubr.msk.f32.vlgmr.msra.gmra.mrb[0].mxu1 %vm1036_vm1, %v999_v59  ;;  %v3349_v59 = vld [vmem:[%s11745_s4 + $0xa0] sm:$0xff] }
 0x2fc   :  { %v3334_v60 = vld [vmem:[%s11745_s4 + $0x28] sm:$0xff] }
 0x2fe   :  { %v1004_v61 = vpop.f32.mrb[244].mxu0 }
 0x2ff   :  { %v1006_v62 = vpop.f32.mrb[245].mxu0  ;;  %8618 = vmatprep.mubr.msk.f32.mxu1 %vm1036_vm1, %v1004_v61  ;;  %v3350_v61 = vld [vmem:[%s11745_s4 + $0xa8] sm:$0xff] }
 0x300   :  { %v3335_v62 = vld [vmem:[%s11745_s4 + $0x30] sm:$0xff] }
 0x302   :  { %v1009_v1 = vpop.f32.mrb[246].mxu0 }
 0x303   :  { %8619 = vmatmul.mubr.msk.f32.gmra.mrb[2].mxu1 %vm1036_vm1, %v1009_v1  ;;  %v1011_v2 = vpop.f32.mrb[247].mxu0  ;;  %v3351_v1 = vld [vmem:[%s11745_s4 + $0xb0] sm:$0xff] }
 0x304   :  { %v3336_v2 = vld [vmem:[%s11745_s4 + $0x38] sm:$0xff] }
 0x306   :  { %v1014_v3 = vpop.f32.mrb[248].mxu0 }
 0x307   :  { %v1016_v4 = vpop.f32.mrb[249].mxu0  ;;  %8621 = vmatprep.mubr.msk.f32.mxu1 %vm1036_vm1, %v1014_v3  ;;  %v3352_v3 = vld [vmem:[%s11745_s4 + $0xb8] sm:$0xff] }
 0x308   :  { %v3337_v4 = vld [vmem:[%s11745_s4 + $0x40] sm:$0xff] }
 0x30a   :  { %v1019_v5 = vpop.f32.mrb[250].mxu0 }
 0x30b   :  { %8622 = vmatmul.mubr.msk.f32.gmra.mrb[4].mxu1 %vm1036_vm1, %v1019_v5  ;;  %v1021_v6 = vpop.f32.mrb[251].mxu0  ;;  %v3353_v5 = vld [vmem:[%s11745_s4 + $0xc0] sm:$0xff] }
 0x30c   :  { %v3338_v6 = vld [vmem:[%s11745_s4 + $0x48] sm:$0xff] }
 0x30e   :  { %v1024_v7 = vpop.f32.mrb[252].mxu0 }
 0x30f   :  { %v1026_v8 = vpop.f32.mrb[253].mxu0  ;;  %8624 = vmatprep.mubr.msk.f32.mxu1 %vm1036_vm1, %v1024_v7  ;;  %v3354_v7 = vld [vmem:[%s11745_s4 + $0xc8] sm:$0xff] }
 0x310   :  { %v3339_v8 = vld [vmem:[%s11745_s4 + $0x50] sm:$0xff] }
 0x312   :  { %v1029_v9 = vpop.f32.mrb[254].mxu0 }
 0x313   :  { %8625 = vmatmul.mubr.msk.f32.gmra.mrb[6].mxu1 %vm1036_vm1, %v1029_v9  ;;  %v1031_v10 = vpop.f32.mrb[255].mxu0  ;;  %v3355_v9 = vld [vmem:[%s11745_s4 + $0xd0] sm:$0xff]  ;;  %vm7558_vm1 = vcmask 113664  }
 0x314   :  { %8667 = vmatprep.mubr.msk.f32.mxu1 %vm3361_vm2, %v3345_v12  ;;  %v3340_v10 = vld [vmem:[%s11745_s4 + $0x58] sm:$0xff]  ;;  %v3341_v12 = vld [vmem:[%s11745_s4 + $0x60] sm:$0xff] }
 0x3ce   :  { %v8617_v14 = vpop.f32.mrb[0].mxu1 }
 0x3cf   :  { %v3298_v15 = vadd.f32 %v8617_v14, %v7727_v13  ;;  %v3243_v63 = vpop.f32.mrb[1].mxu1  ;;  %v3342_v14 = vld [vmem:[%s11745_s4 + $0x68] sm:$0xff] }
 0x3d0   :  { %v3297_v16 = vadd.f32 %v7727_v13, %v3243_v63  ;;  %v3343_v63 = vld [vmem:[%s11745_s4 + $0x70] sm:$0xff] }
 0x3d1   :  { %vm3306_vm3 = vcmp.ge.f32.partialorder %v3298_v15, 0.0  ;;  %v3314_v17 = vmul.f32 0.01, %v3298_v15 }
 0x3d2   :  { %vm3305_vm4 = vcmp.ge.f32.partialorder %v3297_v16, 0.0  ;;  %v3313_v18 = vmul.f32 0.01, %v3297_v16 }
 0x3d3   :  { %v3322_v19 = vsel %vm3306_vm3, %v3298_v15, %v3314_v17  ;;  %v3358_v15 = vld [vmem:[%s11745_s4 + $0xe8] sm:$0xff]  ;;  %v3344_v17 = vld [vmem:[%s11745_s4 + $0x78] sm:$0xff] }
 0x3d4   :  { %v3321_v20 = vsel %vm3305_vm4, %v3297_v16, %v3313_v18  ;;  %v3359_v16 = vld [vmem:[%s11745_s4 + $0xf0] sm:$0xff]  ;;  %v3360_v18 = vld [vmem:[%s11745_s4 + $0xf8] sm:$0xff] }
 0x3d5   :  { %v9185_v21 = vpack.c.bf16 %v3322_v19, %v3321_v20  ;;  %v7760_v19 = vld [vmem:[%s11747_s5 + $0x10] sm:$0xff]  ;;  %v7761_v20 = vld [vmem:[%s11747_s5 + $0x18] sm:$0xff] }
 0x3d6   :  { %v8620_v22 = vpop.f32.mrb[2].mxu1 }
 0x3d7   :  { %v3300_v23 = vadd.f32 %v8620_v22, %v7727_v13  ;;  %v3253_v24 = vpop.f32.mrb[3].mxu1  ;;  %9186 = vmatprep.subr.bf16.mxu0 %v9185_v21  ;;  %9441 = vmatprep.subr.bf16.mxu1 %v9185_v21  ;;  %v7766_v22 = vld [vmem:[%s11747_s5 + $0x20] sm:$0xff] }
 0x3d8   :  { %v3299_v25 = vadd.f32 %v7727_v13, %v3253_v24  ;;  %9188 = vmatpush3.bf16.msra.mxu0 %v9185_v21  ;;  %9445 = vmatpush3.bf16.msra.mxu1 %v9185_v21  ;;  %v9201_v21 = vpack.c.bf16 %v7761_v20, %v7760_v19  ;;  %v7803_v19 = vld [vmem:[%s11747_s5 + $0xb8] sm:$0xff] }
 0x3d9   :  { %vm3308_vm5 = vcmp.ge.f32.partialorder %v3300_v23, 0.0  ;;  %v3316_v26 = vmul.f32 0.01, %v3300_v23 }
 0x3da   :  { %vm3307_vm6 = vcmp.ge.f32.partialorder %v3299_v25, 0.0  ;;  %v3315_v27 = vmul.f32 0.01, %v3299_v25 }
 0x3db   :  { %v3324_v28 = vsel %vm3308_vm5, %v3300_v23, %v3316_v26  ;;  %v7767_v23 = vld [vmem:[%s11747_s5 + $0x28] sm:$0xff]  ;;  %v7771_v26 = vld [vmem:[%s11747_s5 + $0x38] sm:$0xff] }
 0x3dc   :  { %v3323_v29 = vsel %vm3307_vm6, %v3299_v25, %v3315_v27  ;;  %v9209_v24 = vpack.c.bf16 %v7767_v23, %v7766_v22  ;;  %v7770_v25 = vld [vmem:[%s11747_s5 + $0x30] sm:$0xff]  ;;  %v7807_v22 = vld [vmem:[%s11747_s5 + $0xc8] sm:$0xff] }
 0x3dd   :  { %v9189_v30 = vpack.c.bf16 %v3324_v28, %v3323_v29 }
 0x3de   :  { %v8623_v31 = vpop.f32.mrb[4].mxu1 }
 0x3df   :  { %v3302_v32 = vadd.f32 %v8623_v31, %v7727_v13  ;;  %v3263_v33 = vpop.f32.mrb[5].mxu1  ;;  %9190 = vmatprep.subr.bf16.mxu0 %v9189_v30  ;;  %9442 = vmatprep.subr.bf16.mxu1 %v9189_v30 }
 0x3e0   :  { %v3301_v35 = vadd.f32 %v7727_v13, %v3263_v33  ;;  %9192 = vmatpush3.bf16.msra.mxu0 %v9189_v30  ;;  %9446 = vmatpush3.bf16.msra.mxu1 %v9189_v30  ;;  %v9213_v30 = vpack.c.bf16 %v7771_v26, %v7770_v25  ;;  %v7811_v25 = vld [vmem:[%s11747_s5 + $0xd8] sm:$0xff] }
 0x3e1   :  { %vm3310_vm7 = vcmp.ge.f32.partialorder %v3302_v32, 0.0  ;;  %v3318_v36 = vmul.f32 0.01, %v3302_v32 }
 0x3e2   :  { %vm3309_vm8 = vcmp.ge.f32.partialorder %v3301_v35, 0.0  ;;  %v3317_v37 = vmul.f32 0.01, %v3301_v35 }
 0x3e3   :  { %v3326_v39 = vsel %vm3310_vm7, %v3302_v32, %v3318_v36 }
 0x3e4   :  { %v3325_v40 = vsel %vm3309_vm8, %v3301_v35, %v3317_v37  ;;  %v7774_v37 = vld [vmem:[%s11747_s5 + $0x40] sm:$0xff] }
 0x3e5   :  { %v9193_v34 = vpack.c.bf16 %v3326_v39, %v3325_v40  ;;  %v7775_v39 = vld [vmem:[%s11747_s5 + $0x48] sm:$0xff] }
 0x3e6   :  { %v8626_v41 = vpop.f32.mrb[6].mxu1 }
 0x3e7   :  { %v3304_v43 = vadd.f32 %v8626_v41, %v7727_v13  ;;  %v3273_v38 = vpop.f32.mrb[7].mxu1  ;;  %9194 = vmatprep.subr.bf16.mxu0 %v9193_v34  ;;  %9443 = vmatprep.subr.bf16.mxu1 %v9193_v34 }
 0x3e8   :  { %v3303_v42 = vadd.f32 %v7727_v13, %v3273_v38  ;;  %9196 = vmatpush3.bf16.msra.mxu0 %v9193_v34  ;;  %9447 = vmatpush3.bf16.msra.mxu1 %v9193_v34  ;;  %v3357_v13 = vld [vmem:[%s11745_s4 + $0xe0] sm:$0xff] }
 0x3e9   :  { %vm3312_vm9 = vcmp.ge.f32.partialorder %v3304_v43, 0.0  ;;  %v3320_v44 = vmul.f32 0.01, %v3304_v43 }
 0x3ea   :  { %vm3311_vm10 = vcmp.ge.f32.partialorder %v3303_v42, 0.0  ;;  %v3319_v45 = vmul.f32 0.01, %v3303_v42 }
 0x3eb   :  { %v3328_v48 = vsel %vm3312_vm9, %v3304_v43, %v3320_v44  ;;  %v9217_v43 = vpack.c.bf16 %v7775_v39, %v7774_v37  ;;  %v7822_v39 = vld [vmem:[%s11749_s6] ss:$0 sm:$0xff] }
 0x3ec   :  { %v3327_v49 = vsel %vm3311_vm10, %v3303_v42, %v3319_v45 }
 0x3ed   :  { %v9197_v50 = vpack.c.bf16 %v3328_v48, %v3327_v49  ;;  %v7779_v48 = vld [vmem:[%s11747_s5 + $0x58] sm:$0xff] }
 0x3ef   :  { %9198 = vmatprep.subr.bf16.mxu0 %v9197_v50  ;;  %9444 = vmatprep.subr.bf16.mxu1 %v9197_v50 }
 0x3f0   :  { %9200 = vmatpush3.bf16.msra.mxu0 %v9197_v50  ;;  %9448 = vmatpush3.bf16.msra.mxu1 %v9197_v50 }
 0x3f1   :  { %9206 = vmatprep.subr.bf16.mxu1 %v9205_v51  ;;  %9202 = vmatprep.subr.bf16.mxu0 %v9201_v21 }
 0x3f3   :  { %8644 = vmatmul.mubr.msk.f32.vlgmr.msra.gmra.mrb[0].mxu0 %vm3361_vm2, %v3330_v52  ;;  %8668 = vmatmul.mubr.msk.f32.vlgmr.msra.gmra.mrb[8].mxu1 %vm3361_vm2, %v3346_v53  ;;  %v9221_v52 = vpack.c.bf16 %v7779_v48, %v7778_v46 }
 0x3f4   :  { %8646 = vmatprep.mubr.msk.f32.mxu0 %vm3361_vm2, %v3331_v54  ;;  %8670 = vmatprep.mubr.msk.f32.mxu1 %vm3361_vm2, %v3347_v55 }
 0x3f5   :  { %9208 = vmatpush3.bf16.msra.mxu1 %v9205_v51  ;;  %9204 = vmatpush3.bf16.msra.mxu0 %v9201_v21  ;;  %v7806_v21 = vld [vmem:[%s11747_s5 + $0xc0] sm:$0xff] }
 0x3f6   :  { %9210 = vmatprep.subr.bf16.mxu1 %v9209_v24  ;;  %v9249_v23 = vpack.c.bf16 %v7807_v22, %v7806_v21 }
 0x3f7   :  { %8647 = vmatmul.mubr.msk.f32.gmra.mrb[2].mxu0 %vm3361_vm2, %v3332_v56  ;;  %8671 = vmatmul.mubr.msk.f32.gmra.mrb[10].mxu1 %vm3361_vm2, %v3348_v57 }
 0x3f8   :  { %8649 = vmatprep.mubr.msk.f32.mxu0 %vm3361_vm2, %v3333_v58  ;;  %8673 = vmatprep.mubr.msk.f32.mxu1 %vm3361_vm2, %v3349_v59  ;;  %v7782_v58 = vld [vmem:[%s11747_s5 + $0x60] sm:$0xff]  ;;  %v7783_v59 = vld [vmem:[%s11747_s5 + $0x68] sm:$0xff] }
 0x3fb   :  { %8650 = vmatmul.mubr.msk.f32.gmra.mrb[4].mxu0 %vm3361_vm2, %v3334_v60  ;;  %8674 = vmatmul.mubr.msk.f32.gmra.mrb[12].mxu1 %vm3361_vm2, %v3350_v61 }
 0x3fc   :  { %8652 = vmatprep.mubr.msk.f32.mxu0 %vm3361_vm2, %v3335_v62  ;;  %8676 = vmatprep.mubr.msk.f32.mxu1 %vm3361_vm2, %v3351_v1  ;;  %v9225_v62 = vpack.c.bf16 %v7783_v59, %v7782_v58  ;;  %v5078_v58 = vld [vmem:[%s11748_s7 + $0x40] sm:$0xff]  ;;  %v5079_v59 = vld [vmem:[%s11748_s7 + $0x48] sm:$0xff] }
 0x3ff   :  { %8653 = vmatmul.mubr.msk.f32.gmra.mrb[6].mxu0 %vm3361_vm2, %v3336_v2  ;;  %8677 = vmatmul.mubr.msk.f32.gmra.mrb[14].mxu1 %vm3361_vm2, %v3352_v3 }
 0x400   :  { %8655 = vmatprep.mubr.msk.f32.mxu0 %vm3361_vm2, %v3337_v4  ;;  %8679 = vmatprep.mubr.msk.f32.mxu1 %vm3361_vm2, %v3353_v5 }
 0x403   :  { %8656 = vmatmul.mubr.msk.f32.gmra.mrb[8].mxu0 %vm3361_vm2, %v3338_v6  ;;  %8680 = vmatmul.mubr.msk.f32.gmra.mrb[16].mxu1 %vm3361_vm2, %v3354_v7  ;;  %v7786_v7 = vld [vmem:[%s11747_s5 + $0x70] sm:$0xff] }
 0x404   :  { %8658 = vmatprep.mubr.msk.f32.mxu0 %vm3361_vm2, %v3339_v8  ;;  %8682 = vmatprep.mubr.msk.f32.mxu1 %vm3361_vm2, %v3355_v9  ;;  %v7787_v8 = vld [vmem:[%s11747_s5 + $0x78] sm:$0xff] }
 0x405   :  { %v9229_v9 = vpack.c.bf16 %v7787_v8, %v7786_v7  ;;  %v7844_v7 = vld [vmem:[%s11750_s8 + $0x38] sm:$0xff] }
 0x407   :  { %8659 = vmatmul.mubr.msk.f32.gmra.mrb[10].mxu0 %vm3361_vm2, %v3340_v10  ;;  %8683 = vmatmul.mubr.msk.f32.gmra.mrb[18].mxu1 %vm3361_vm2, %v3356_v11  ;;  %v7790_v10 = vld [vmem:[%s11747_s5 + $0x80] sm:$0xff]  ;;  %v7791_v11 = vld [vmem:[%s11747_s5 + $0x88] sm:$0xff] }
 0x408   :  { %8661 = vmatprep.mubr.msk.f32.mxu0 %vm3361_vm2, %v3341_v12  ;;  %8685 = vmatprep.mubr.msk.f32.mxu1 %vm3361_vm2, %v3357_v13  ;;  %v9233_v12 = vpack.c.bf16 %v7791_v11, %v7790_v10  ;;  %v7794_v13 = vld [vmem:[%s11747_s5 + $0x90] sm:$0xff]  ;;  %v5298_v10 = vld [vmem:[%s11750_s8 + $0x8] sm:$0xff] }
 0x40b   :  { %8662 = vmatmul.mubr.msk.f32.gmra.mrb[12].mxu0 %vm3361_vm2, %v3342_v14  ;;  %8686 = vmatmul.mubr.msk.f32.gmra.mrb[20].mxu1 %vm3361_vm2, %v3358_v15  ;;  %v7795_v14 = vld [vmem:[%s11747_s5 + $0x98] sm:$0xff] }
 0x40c   :  { %8664 = vmatprep.mubr.msk.f32.mxu0 %vm3361_vm2, %v3343_v63  ;;  %8688 = vmatprep.mubr.msk.f32.mxu1 %vm3361_vm2, %v3359_v16  ;;  %v9237_v15 = vpack.c.bf16 %v7795_v14, %v7794_v13  ;;  %v7798_v63 = vld [vmem:[%s11747_s5 + $0xa0] sm:$0xff]  ;;  %v7799_v16 = vld [vmem:[%s11747_s5 + $0xa8] sm:$0xff]  ;;  %v5299_v14 = vld [vmem:[%s11750_s8 + $0x10] sm:$0xff] }
 0x40f   :  { %8665 = vmatmul.mubr.msk.f32.gmra.mrb[14].mxu0 %vm3361_vm2, %v3344_v17  ;;  %8689 = vmatmul.mubr.msk.f32.gmra.mrb[22].mxu1 %vm3361_vm2, %v3360_v18  ;;  %v9241_v17 = vpack.c.bf16 %v7799_v16, %v7798_v63  ;;  %v7802_v18 = vld [vmem:[%s11747_s5 + $0xb0] sm:$0xff] }
 0x410   :  { %v9245_v20 = vpack.c.bf16 %v7803_v19, %v7802_v18  ;;  %v7849_v18 = vld [vmem:[%s11750_s8 + $0x40] sm:$0xff]  ;;  %v7850_v19 = vld [vmem:[%s11750_s8 + $0x48] sm:$0xff] }
 0x411   :  { %v9285_v21 = vpack.c.bf16 %v7850_v19, %v7849_v18  ;;  %v6092_v18 = vld [vmem:[%s11751_s9 + $0x20] sm:$0xff]  ;;  %v6093_v19 = vld [vmem:[%s11751_s9 + $0x28] sm:$0xff] }
 0x4c6   :  { %v8645_v27 = vpop.f32.mrb[0].mxu0  ;;  %v11011_v28 = vpop.f32.mrb[8].mxu1 }
 0x4c7   :  { %v3524_v29 = vpop.f32.mrb[1].mxu0  ;;  %v11013_v31 = vpop.f32.mrb[9].mxu1 }
 0x4c8   :  { %8702 = vmatprep.mubr.msk.f32.mxu1 %vm3688_vm11, %v3524_v29 }
 0x4c9   :  { %8703 = vmatmul.mubr.msk.f32.vlgmr.msra.gmra.mrb[24].mxu1 %vm3688_vm11, %v8645_v27  ;;  %v7814_v27 = vld [vmem:[%s11747_s5 + $0xe0] sm:$0xff] }
 0x4ca   :  { %v8648_v32 = vpop.f32.mrb[2].mxu0  ;;  %9212 = vmatpush3.bf16.msra.mxu1 %v9209_v24  ;;  %v11017_v33 = vpop.f32.mrb[10].mxu1  ;;  %v7810_v24 = vld [vmem:[%s11747_s5 + $0xd0] sm:$0xff] }
 0x4cb   :  { %v3534_v35 = vpop.f32.mrb[3].mxu0  ;;  %9214 = vmatprep.subr.bf16.mxu1 %v9213_v30  ;;  %v11019_v36 = vpop.f32.mrb[11].mxu1  ;;  %v9253_v26 = vpack.c.bf16 %v7811_v25, %v7810_v24  ;;  %v7852_v24 = vld [vmem:[%s11750_s8 + $0x58] sm:$0xff] }
 0x4cc   :  { %8695 = vmatprep.mubr.msk.f32.mxu0 %vm3688_vm11, %v3534_v35 }
 0x4cd   :  { %8696 = vmatmul.mubr.msk.f32.vlgmr.msra.gmra.mrb[16].mxu0 %vm3688_vm11, %v8648_v32 }
 0x4ce   :  { %v8651_v40 = vpop.f32.mrb[4].mxu0  ;;  %v11029_v34 = vpop.f32.mrb[12].mxu1 }
 0x4cf   :  { %v3544_v41 = vpop.f32.mrb[5].mxu0  ;;  %v11031_v38 = vpop.f32.mrb[13].mxu1 }
 0x4d0   :  { %8709 = vmatprep.mubr.msk.f32.mxu1 %vm3688_vm11, %v3544_v41 }
 0x4d1   :  { %8710 = vmatmul.mubr.msk.f32.vlgmr.msra.gmra.mrb[24].mxu1 %vm3688_vm11, %v8651_v40 }
 0x4d2   :  { %v8654_v42 = vpop.f32.mrb[6].mxu0  ;;  %9216 = vmatpush3.bf16.msra.mxu1 %v9213_v30  ;;  %v11035_v44 = vpop.f32.mrb[14].mxu1  ;;  %v7818_v30 = vld [vmem:[%s11747_s5 + $0xf0] sm:$0xff] }
 0x4d3   :  { %v3554_v45 = vpop.f32.mrb[7].mxu0  ;;  %9218 = vmatprep.subr.bf16.mxu1 %v9217_v43  ;;  %v11037_v47 = vpop.f32.mrb[15].mxu1 }
 0x4d4   :  { %8716 = vmatprep.mubr.msk.f32.mxu1 %vm3688_vm11, %v3554_v45  ;;  %v7841_v45 = vld [vmem:[%s11750_s8 + $0x20] sm:$0xff] }
 0x4d6   :  { %v8657_v49 = vpop.f32.mrb[8].mxu0  ;;  %v11046_v50 = vpop.f32.mrb[16].mxu1 }
 0x4d7   :  { %v3564_v51 = vpop.f32.mrb[9].mxu0  ;;  %v11048_v53 = vpop.f32.mrb[17].mxu1 }
 0x4d9   :  { %8717 = vmatmul.mubr.msk.f32.vlgmr.msra.gmra.mrb[24].mxu1 %vm3688_vm11, %v8654_v42 }
 0x4da   :  { %9220 = vmatpush3.bf16.msra.mxu1 %v9217_v43  ;;  %8723 = vmatprep.mubr.msk.f32.mxu1 %vm3688_vm11, %v3564_v51  ;;  %v8660_v54 = vpop.f32.mrb[10].mxu0  ;;  %v11052_v55 = vpop.f32.mrb[18].mxu1  ;;  %v5071_v51 = vld [vmem:[%s11748_s7 + $0x8] sm:$0xff] }
 0x4db   :  { %9222 = vmatprep.subr.bf16.mxu1 %v9221_v52  ;;  %v3574_v56 = vpop.f32.mrb[11].mxu0  ;;  %v11054_v57 = vpop.f32.mrb[19].mxu1 }
 0x4de   :  { %v8663_v60 = vpop.f32.mrb[12].mxu0  ;;  %v11062_v61 = vpop.f32.mrb[20].mxu1 }
 0x4df   :  { %v3584_v1 = vpop.f32.mrb[13].mxu0  ;;  %v11064_v2 = vpop.f32.mrb[21].mxu1 }
 0x4e1   :  { %8724 = vmatmul.mubr.msk.f32.vlgmr.msra.gmra.mrb[24].mxu1 %vm3688_vm11, %v8657_v49 }
 0x4e2   :  { %9224 = vmatpush3.bf16.msra.mxu1 %v9221_v52  ;;  %8730 = vmatprep.mubr.msk.f32.mxu1 %vm3688_vm11, %v3574_v56  ;;  %v8666_v3 = vpop.f32.mrb[14].mxu0  ;;  %v11068_v4 = vpop.f32.mrb[22].mxu1  ;;  %v5072_v52 = vld [vmem:[%s11748_s7 + $0x10] sm:$0xff] }
 0x4e3   :  { %9226 = vmatprep.subr.bf16.mxu1 %v9225_v62  ;;  %v3594_v5 = vpop.f32.mrb[15].mxu0  ;;  %v11070_v6 = vpop.f32.mrb[23].mxu1  ;;  %v5076_v56 = vld [vmem:[%s11748_s7 + $0x30] sm:$0xff] }
 0x4e9   :  { %8731 = vmatmul.mubr.msk.f32.vlgmr.msra.gmra.mrb[24].mxu1 %vm3688_vm11, %v8660_v54  ;;  %v5074_v54 = vld [vmem:[%s11748_s7 + $0x20] sm:$0xff] }
 0x4ea   :  { %9228 = vmatpush3.bf16.msra.mxu1 %v9225_v62  ;;  %8737 = vmatprep.mubr.msk.f32.mxu1 %vm3688_vm11, %v3584_v1  ;;  %v5082_v62 = vld [vmem:[%s11748_s7 + $0x60] sm:$0xff]  ;;  %v5083_v1 = vld [vmem:[%s11748_s7 + $0x68] sm:$0xff] }
 0x4eb   :  { %9230 = vmatprep.subr.bf16.mxu1 %v9229_v9 }
 0x4f1   :  { %8738 = vmatmul.mubr.msk.f32.vlgmr.msra.gmra.mrb[24].mxu1 %vm3688_vm11, %v8663_v60  ;;  %v5080_v60 = vld [vmem:[%s11748_s7 + $0x50] sm:$0xff] }
 0x4f2   :  { %9232 = vmatpush3.bf16.msra.mxu1 %v9229_v9  ;;  %8744 = vmatprep.mubr.msk.f32.mxu1 %vm3688_vm11, %v3594_v5  ;;  %v5087_v5 = vld [vmem:[%s11748_s7 + $0x88] sm:$0xff]  ;;  %v5297_v9 = vld [vmem:[%s11750_s8] sm:$0xff] }
 0x4f3   :  { %9234 = vmatprep.subr.bf16.mxu1 %v9233_v12  ;;  %v9277_v11 = vpack.c.bf16 %v5298_v10, %v5297_v9  ;;  %v7887_v10 = vld [vmem:[%s11750_s8 + $0x110] sm:$0xff] }
 0x4f9   :  { %8745 = vmatmul.mubr.msk.f32.vlgmr.msra.gmra.mrb[24].mxu1 %vm3688_vm11, %v8666_v3  ;;  %v5085_v3 = vld [vmem:[%s11748_s7 + $0x78] sm:$0xff] }
 0x4fa   :  { %9236 = vmatpush3.bf16.msra.mxu1 %v9233_v12  ;;  %8751 = vmatprep.mubr.msk.f32.mxu1 %vm3688_vm11, %v11013_v31  ;;  %v7819_v31 = vld [vmem:[%s11747_s5 + $0xf8] sm:$0xff] }
 0x4fb   :  { %9238 = vmatprep.subr.bf16.mxu1 %v9237_v15  ;;  %v9261_v32 = vpack.c.bf16 %v7819_v31, %v7818_v30 }
 0x501   :  { %8752 = vmatmul.mubr.msk.f32.vlgmr.msra.gmra.mrb[24].mxu1 %vm3688_vm11, %v11011_v28  ;;  %v7815_v28 = vld [vmem:[%s11747_s5 + $0xe8] sm:$0xff] }
 0x502   :  { %9240 = vmatpush3.bf16.msra.mxu1 %v9237_v15  ;;  %8758 = vmatprep.mubr.msk.f32.mxu1 %vm3688_vm11, %v11019_v36  ;;  %v9257_v29 = vpack.c.bf16 %v7815_v28, %v7814_v27  ;;  %v5300_v15 = vld [vmem:[%s11750_s8 + $0x18] sm:$0xff]  ;;  %v7855_v28 = vld [vmem:[%s11750_s8 + $0x60] sm:$0xff] }
 0x503   :  { %9242 = vmatprep.subr.bf16.mxu1 %v9241_v17 }
 0x509   :  { %8759 = vmatmul.mubr.msk.f32.vlgmr.msra.gmra.mrb[24].mxu1 %vm3688_vm11, %v11017_v33  ;;  %v5070_v33 = vld [vmem:[%s11748_s7] sm:$0xff] }
 0x50a   :  { %9244 = vmatpush3.bf16.msra.mxu1 %v9241_v17  ;;  %8765 = vmatprep.mubr.msk.f32.mxu1 %vm3688_vm11, %v11031_v38  ;;  %v9281_v17 = vpack.c.bf16 %v5300_v15, %v5299_v14  ;;  %v7907_v14 = vld [vmem:[%s11752_s10 + $0x20] sm:$0xff]  ;;  %v7908_v15 = vld [vmem:[%s11752_s10 + $0x28] sm:$0xff] }
 0x50b   :  { %9246 = vmatprep.subr.bf16.mxu1 %v9245_v20 }
 0x511   :  { %8766 = vmatmul.mubr.msk.f32.vlgmr.msra.gmra.mrb[24].mxu1 %vm3688_vm11, %v11029_v34 }
 0x512   :  { %9248 = vmatpush3.bf16.msra.mxu1 %v9245_v20  ;;  %8772 = vmatprep.mubr.msk.f32.mxu1 %vm3688_vm11, %v11037_v47  ;;  %v7842_v47 = vld [vmem:[%s11750_s8 + $0x28] sm:$0xff] }
 0x513   :  { %9250 = vmatprep.subr.bf16.mxu1 %v9249_v23 }
 0x519   :  { %8773 = vmatmul.mubr.msk.f32.vlgmr.msra.gmra.mrb[24].mxu1 %vm3688_vm11, %v11035_v44 }
 0x51a   :  { %9252 = vmatpush3.bf16.msra.mxu1 %v9249_v23  ;;  %8779 = vmatprep.mubr.msk.f32.mxu1 %vm3688_vm11, %v11048_v53  ;;  %v5073_v53 = vld [vmem:[%s11748_s7 + $0x18] sm:$0xff]  ;;  %v7851_v23 = vld [vmem:[%s11750_s8 + $0x50] sm:$0xff] }
 0x51b   :  { %9254 = vmatprep.subr.bf16.mxu1 %v9253_v26 }
 0x521   :  { %8780 = vmatmul.mubr.msk.f32.vlgmr.msra.gmra.mrb[24].mxu1 %vm3688_vm11, %v11046_v50  ;;  %v9269_v50 = vpack.c.bf16 %v7842_v47, %v7841_v45 }
 0x522   :  { %9256 = vmatpush3.bf16.msra.mxu1 %v9253_v26  ;;  %8786 = vmatprep.mubr.msk.f32.mxu1 %vm3688_vm11, %v11054_v57  ;;  %v5077_v57 = vld [vmem:[%s11748_s7 + $0x38] sm:$0xff]  ;;  %v9289_v26 = vpack.c.bf16 %v7852_v24, %v7851_v23  ;;  %v6097_v23 = vld [vmem:[%s11751_s9 + $0x48] sm:$0xff]  ;;  %v6098_v24 = vld [vmem:[%s11751_s9 + $0x50] sm:$0xff] }
 0x523   :  { %9258 = vmatprep.subr.bf16.mxu1 %v9257_v29 }
 0x529   :  { %8787 = vmatmul.mubr.msk.f32.vlgmr.msra.gmra.mrb[24].mxu1 %vm3688_vm11, %v11052_v55  ;;  %v5075_v55 = vld [vmem:[%s11748_s7 + $0x28] sm:$0xff] }
 0x52a   :  { %9260 = vmatpush3.bf16.msra.mxu1 %v9257_v29  ;;  %8793 = vmatprep.mubr.msk.f32.mxu1 %vm3688_vm11, %v11064_v2  ;;  %v5084_v2 = vld [vmem:[%s11748_s7 + $0x70] sm:$0xff]  ;;  %v7856_v29 = vld [vmem:[%s11750_s8 + $0x68] sm:$0xff] }
 0x52b   :  { %9262 = vmatprep.subr.bf16.mxu1 %v9261_v32  ;;  %v9293_v31 = vpack.c.bf16 %v7856_v29, %v7855_v28  ;;  %v6102_v28 = vld [vmem:[%s11751_s9 + $0x70] sm:$0xff]  ;;  %v6103_v29 = vld [vmem:[%s11751_s9 + $0x78] sm:$0xff] }
 0x531   :  { %8794 = vmatmul.mubr.msk.f32.vlgmr.msra.gmra.mrb[24].mxu1 %vm3688_vm11, %v11062_v61  ;;  %v5081_v61 = vld [vmem:[%s11748_s7 + $0x58] sm:$0xff] }
 0x532   :  { %9264 = vmatpush3.bf16.msra.mxu1 %v9261_v32  ;;  %8800 = vmatprep.mubr.msk.f32.mxu1 %vm3688_vm11, %v11070_v6  ;;  %v7843_v6 = vld [vmem:[%s11750_s8 + $0x30] sm:$0xff] }
 0x533   :  { %v9273_v8 = vpack.c.bf16 %v7844_v7, %v7843_v6  ;;  %v7885_v7 = vld [vmem:[%s11750_s8 + $0x100] sm:$0xff] }
 0x539   :  { %8801 = vmatmul.mubr.msk.f32.vlgmr.msra.gmra.mrb[24].mxu1 %vm3688_vm11, %v11068_v4  ;;  %v5086_v4 = vld [vmem:[%s11748_s7 + $0x80] sm:$0xff] }
 0x53a   :  { %8807 = vmatprep.mubr.msk.f32.mxu1 %vm3688_vm11, %v5070_v33  ;;  %v7857_v33 = vld [vmem:[%s11750_s8 + $0x70] sm:$0xff] }
 0x5a0   :  { %v8697_v35 = vpop.f32.mrb[16].mxu0 }
 0x5a1   :  { %v3761_v36 = vpop.f32.mrb[17].mxu0 }
 0x60c   :  { %v8802_v37 = vpop.f32.mrb[24].mxu1 }
 0x60d   :  { %v9449_v40 = vadd.f32 %v8802_v37, %v8697_v35  ;;  %v5044_v34 = vpop.f32.mrb[25].mxu1  ;;  %v7858_v35 = vld [vmem:[%s11750_s8 + $0x78] sm:$0xff] }
 0x60e   :  { %v9450_v41 = vadd.f32 %v5044_v34, %v3761_v36  ;;  %v9297_v37 = vpack.c.bf16 %v7858_v35, %v7857_v33  ;;  %v7862_v34 = vld [vmem:[%s11750_s8 + $0x88] sm:$0xff]  ;;  %v9650_v33 = vmov 0.0   ;;  %v6297_v35 = vld [vmem:[%s11752_s10] sm:$0xff] }
 0x60f   :  { %v5063_v43 = vadd.f32 %v9449_v40, %v7822_v39  ;;  %v7861_v40 = vld [vmem:[%s11750_s8 + $0x80] sm:$0xff] }
 0x610   :  { %v5062_v38 = vadd.f32 %v9450_v41, %v7822_v39 }
 0x611   :  { %vm5065_vm12 = vcmp.ge.f32.partialorder %v5063_v43, 0.0  ;;  %v5067_v42 = vmul.f32 0.01, %v5063_v43 }
 0x612   :  { %vm5064_vm13 = vcmp.ge.f32.partialorder %v5062_v38, 0.0  ;;  %v5066_v44 = vmul.f32 0.01, %v5062_v38 }
 0x613   :  { %v5069_v46 = vsel %vm5065_vm12, %v5063_v43, %v5067_v42  ;;  %v9301_v43 = vpack.c.bf16 %v7862_v34, %v7861_v40  ;;  %v7863_v42 = vld [vmem:[%s11750_s8 + $0x90] sm:$0xff] }
 0x614   :  { %v5068_v48 = vsel %vm5064_vm13, %v5062_v38, %v5066_v44  ;;  %v7864_v44 = vld [vmem:[%s11750_s8 + $0x98] sm:$0xff]  ;;  %v6299_v34 = vld [vmem:[%s11752_s10 + $0x10] sm:$0xff] }
 0x615   :  { %v11176_v49 = vpack.c.bf16 %v5069_v46, %v5068_v48  ;;  %v9305_v47 = vpack.c.bf16 %v7864_v44, %v7863_v42  ;;  %v7867_v48 = vld [vmem:[%s11750_s8 + $0xa0] sm:$0xff] }
 0x616   :  { %v7913_v44 = vld [vmem:[%s11752_s10 + $0x40] sm:$0xff] }
 0x617   :  { %9266 = vmatprep.subr.bf16.mxu1 %v11176_v49 }
 0x618   :  { %9268 = vmatpush3.bf16.msra.mxu1 %v11176_v49 }
 0x619   :  { %9270 = vmatprep.subr.bf16.mxu1 %v9269_v50 }
 0x61b   :  { %8808 = vmatmul.mubr.msk.f32.vlgmr.msra.gmra.mrb[26].mxu1 %vm3688_vm11, %v5071_v51 }
 0x61c   :  { %8810 = vmatprep.mubr.msk.f32.mxu1 %vm3688_vm11, %v5072_v52  ;;  %9272 = vmatpush3.bf16.msra.mxu1 %v9269_v50  ;;  %v7868_v50 = vld [vmem:[%s11750_s8 + $0xa8] sm:$0xff] }
 0x61d   :  { %9274 = vmatprep.subr.bf16.mxu1 %v9273_v8  ;;  %v9309_v52 = vpack.c.bf16 %v7868_v50, %v7867_v48  ;;  %v7915_v50 = vld [vmem:[%s11752_s10 + $0x50] sm:$0xff] }
 0x61f   :  { %8811 = vmatmul.mubr.msk.f32.gmra.mrb[28].mxu1 %vm3688_vm11, %v5073_v53 }
 0x620   :  { %8813 = vmatprep.mubr.msk.f32.mxu1 %vm3688_vm11, %v5074_v54  ;;  %9276 = vmatpush3.bf16.msra.mxu1 %v9273_v8  ;;  %v7869_v54 = vld [vmem:[%s11750_s8 + $0xb0] sm:$0xff]  ;;  %v7886_v8 = vld [vmem:[%s11750_s8 + $0x108] sm:$0xff] }
 0x621   :  { %9278 = vmatprep.subr.bf16.mxu1 %v9277_v11  ;;  %v9333_v9 = vpack.c.bf16 %v7886_v8, %v7885_v7  ;;  %v7925_v8 = vld [vmem:[%s11752_s10 + $0x90] sm:$0xff] }
 0x623   :  { %8814 = vmatmul.mubr.msk.f32.gmra.mrb[30].mxu1 %vm3688_vm11, %v5075_v55  ;;  %v7870_v55 = vld [vmem:[%s11750_s8 + $0xb8] sm:$0xff] }
 0x624   :  { %8816 = vmatprep.mubr.msk.f32.mxu1 %vm3688_vm11, %v5076_v56  ;;  %v9313_v56 = vpack.c.bf16 %v7870_v55, %v7869_v54  ;;  %v7918_v55 = vld [vmem:[%s11752_s10 + $0x60] sm:$0xff] }
 0x627   :  { %8817 = vmatmul.mubr.msk.f32.gmra.mrb[32].mxu1 %vm3688_vm11, %v5077_v57  ;;  %v7873_v57 = vld [vmem:[%s11750_s8 + $0xc0] sm:$0xff] }
 0x628   :  { %8819 = vmatprep.mubr.msk.f32.mxu1 %vm3688_vm11, %v5078_v58  ;;  %v7874_v58 = vld [vmem:[%s11750_s8 + $0xc8] sm:$0xff] }
 0x62b   :  { %8820 = vmatmul.mubr.msk.f32.gmra.mrb[34].mxu1 %vm3688_vm11, %v5079_v59  ;;  %v9317_v59 = vpack.c.bf16 %v7874_v58, %v7873_v57 }
 0x62c   :  { %8822 = vmatprep.mubr.msk.f32.mxu1 %vm3688_vm11, %v5080_v60  ;;  %v7875_v60 = vld [vmem:[%s11750_s8 + $0xd0] sm:$0xff] }
 0x62f   :  { %8823 = vmatmul.mubr.msk.f32.gmra.mrb[36].mxu1 %vm3688_vm11, %v5081_v61  ;;  %v7876_v61 = vld [vmem:[%s11750_s8 + $0xd8] sm:$0xff] }
 0x630   :  { %8825 = vmatprep.mubr.msk.f32.mxu1 %vm3688_vm11, %v5082_v62  ;;  %v9321_v62 = vpack.c.bf16 %v7876_v61, %v7875_v60  ;;  %v7920_v60 = vld [vmem:[%s11752_s10 + $0x70] sm:$0xff]  ;;  %v7921_v61 = vld [vmem:[%s11752_s10 + $0x78] sm:$0xff] }
 0x633   :  { %8826 = vmatmul.mubr.msk.f32.gmra.mrb[38].mxu1 %vm3688_vm11, %v5083_v1  ;;  %v7879_v1 = vld [vmem:[%s11750_s8 + $0xe0] sm:$0xff] }
 0x634   :  { %8828 = vmatprep.mubr.msk.f32.mxu1 %vm3688_vm11, %v5084_v2  ;;  %v7880_v2 = vld [vmem:[%s11750_s8 + $0xe8] sm:$0xff] }
 0x637   :  { %8829 = vmatmul.mubr.msk.f32.gmra.mrb[40].mxu1 %vm3688_vm11, %v5085_v3  ;;  %v9325_v3 = vpack.c.bf16 %v7880_v2, %v7879_v1  ;;  %v9367_v2 = vpack.c.bf16 %v7921_v61, %v7920_v60  ;;  %v7965_v60 = vld [vmem:[%s11752_s10 + $0x190] sm:$0xff]  ;;  %v7966_v61 = vld [vmem:[%s11752_s10 + $0x198] sm:$0xff] }
 0x638   :  { %8831 = vmatprep.mubr.msk.f32.mxu1 %vm3688_vm11, %v5086_v4  ;;  %v7881_v4 = vld [vmem:[%s11750_s8 + $0xf0] sm:$0xff] }
 0x63b   :  { %8832 = vmatmul.mubr.msk.f32.gmra.mrb[42].mxu1 %vm3688_vm11, %v5087_v5  ;;  %v7882_v5 = vld [vmem:[%s11750_s8 + $0xf8] sm:$0xff] }
 0x63c   :  { %v9329_v6 = vpack.c.bf16 %v7882_v5, %v7881_v4  ;;  %v7924_v4 = vld [vmem:[%s11752_s10 + $0x88] sm:$0xff] }
 0x6ee   :  { %v8809_v12 = vpop.f32.mrb[26].mxu1 }
 0x6ef   :  { %v5208_v13 = vpop.f32.mrb[27].mxu1 }
 0x6f2   :  { %v8812_v63 = vpop.f32.mrb[28].mxu1 }
 0x6f3   :  { %v5218_v16 = vpop.f32.mrb[29].mxu1 }
 0x6f4   :  { %8842 = vmatprep.mubr.msk.f32.mxu1 %vm5306_vm14, %v5218_v16  ;;  %v9346_v16 = vpack.c.bf16 %v7908_v15, %v7907_v14  ;;  %v7929_v14 = vld [vmem:[%s11752_s10 + $0xa8] sm:$0xff] }
 0x6f5   :  { %8843 = vmatmul.mubr.msk.f32.vlgmr.msra.gmra.mrb[44].mxu1 %vm5306_vm14, %v8812_v63  ;;  %v6089_v63 = vld [vmem:[%s11751_s9 + $0x8] sm:$0xff] }
 0x6f6   :  { %9280 = vmatpush3.bf16.msra.mxu1 %v9277_v11  ;;  %8853 = vmatprep.mubr.msk.f32.mxu1 %vm5306_vm14, %v5208_v13  ;;  %v8815_v20 = vpop.f32.mrb[30].mxu1  ;;  %v7888_v11 = vld [vmem:[%s11750_s8 + $0x118] sm:$0xff]  ;;  %v6088_v13 = vld [vmem:[%s11751_s9] sm:$0xff] }
 0x6f7   :  { %9282 = vmatprep.subr.bf16.mxu1 %v9281_v17  ;;  %v5228_v22 = vpop.f32.mrb[31].mxu1 }
 0x6fa   :  { %9284 = vmatpush3.bf16.msra.mxu1 %v9281_v17  ;;  %v8818_v25 = vpop.f32.mrb[32].mxu1  ;;  %v6090_v17 = vld [vmem:[%s11751_s9 + $0x10] sm:$0xff] }
 0x6fb   :  { %9286 = vmatprep.subr.bf16.mxu1 %v9285_v21  ;;  %v5238_v27 = vpop.f32.mrb[33].mxu1 }
 0x6fd   :  { %8854 = vmatmul.mubr.msk.f32.vlgmr.msra.gmra.mrb[44].mxu1 %vm5306_vm14, %v8809_v12  ;;  %v9337_v12 = vpack.c.bf16 %v7888_v11, %v7887_v10 }
 0x6fe   :  { %9288 = vmatpush3.bf16.msra.mxu1 %v9285_v21  ;;  %8864 = vmatprep.mubr.msk.f32.mxu1 %vm5306_vm14, %v5228_v22  ;;  %v8821_v30 = vpop.f32.mrb[34].mxu1  ;;  %v6095_v21 = vld [vmem:[%s11751_s9 + $0x38] sm:$0xff]  ;;  %v6096_v22 = vld [vmem:[%s11751_s9 + $0x40] sm:$0xff] }
 0x6ff   :  { %9290 = vmatprep.subr.bf16.mxu1 %v9289_v26  ;;  %v5248_v32 = vpop.f32.mrb[35].mxu1 }
 0x702   :  { %9292 = vmatpush3.bf16.msra.mxu1 %v9289_v26  ;;  %v8824_v36 = vpop.f32.mrb[36].mxu1  ;;  %v6100_v26 = vld [vmem:[%s11751_s9 + $0x60] sm:$0xff] }
 0x703   :  { %9294 = vmatprep.subr.bf16.mxu1 %v9293_v31  ;;  %v5258_v39 = vpop.f32.mrb[37].mxu1 }
 0x705   :  { %8865 = vmatmul.mubr.msk.f32.vlgmr.msra.gmra.mrb[44].mxu1 %vm5306_vm14, %v8815_v20  ;;  %v6094_v20 = vld [vmem:[%s11751_s9 + $0x30] sm:$0xff] }
 0x706   :  { %9296 = vmatpush3.bf16.msra.mxu1 %v9293_v31  ;;  %8875 = vmatprep.mubr.msk.f32.mxu1 %vm5306_vm14, %v5238_v27  ;;  %v8827_v41 = vpop.f32.mrb[38].mxu1  ;;  %v6101_v27 = vld [vmem:[%s11751_s9 + $0x68] sm:$0xff]  ;;  %v7910_v31 = vld [vmem:[%s11752_s10 + $0x38] sm:$0xff] }
 0x707   :  { %9298 = vmatprep.subr.bf16.mxu1 %v9297_v37  ;;  %v5268_v38 = vpop.f32.mrb[39].mxu1 }
 0x70a   :  { %9300 = vmatpush3.bf16.msra.mxu1 %v9297_v37  ;;  %v8830_v45 = vpop.f32.mrb[40].mxu1 }
 0x70b   :  { %9302 = vmatprep.subr.bf16.mxu1 %v9301_v43  ;;  %v5278_v46 = vpop.f32.mrb[41].mxu1 }
 0x70d   :  { %8876 = vmatmul.mubr.msk.f32.vlgmr.msra.gmra.mrb[44].mxu1 %vm5306_vm14, %v8818_v25  ;;  %v6099_v25 = vld [vmem:[%s11751_s9 + $0x58] sm:$0xff] }
 0x70e   :  { %9304 = vmatpush3.bf16.msra.mxu1 %v9301_v43  ;;  %8886 = vmatprep.mubr.msk.f32.mxu1 %vm5306_vm14, %v5248_v32  ;;  %v8833_v51 = vpop.f32.mrb[42].mxu1 }
 0x70f   :  { %9306 = vmatprep.subr.bf16.mxu1 %v9305_v47  ;;  %v5288_v53 = vpop.f32.mrb[43].mxu1 }
 0x712   :  { %9308 = vmatpush3.bf16.msra.mxu1 %v9305_v47 }
 0x713   :  { %9310 = vmatprep.subr.bf16.mxu1 %v9309_v52 }
 0x715   :  { %8887 = vmatmul.mubr.msk.f32.vlgmr.msra.gmra.mrb[44].mxu1 %vm5306_vm14, %v8821_v30  ;;  %v7909_v30 = vld [vmem:[%s11752_s10 + $0x30] sm:$0xff] }
 0x716   :  { %9312 = vmatpush3.bf16.msra.mxu1 %v9309_v52  ;;  %8897 = vmatprep.mubr.msk.f32.mxu1 %vm5306_vm14, %v5258_v39  ;;  %v9349_v32 = vpack.c.bf16 %v7910_v31, %v7909_v30  ;;  %v7943_v31 = vld [vmem:[%s11752_s10 + $0x100] sm:$0xff] }
 0x717   :  { %9314 = vmatprep.subr.bf16.mxu1 %v9313_v56 }
 0x71a   :  { %9316 = vmatpush3.bf16.msra.mxu1 %v9313_v56  ;;  %v7919_v56 = vld [vmem:[%s11752_s10 + $0x68] sm:$0xff] }
 0x71b   :  { %9318 = vmatprep.subr.bf16.mxu1 %v9317_v59 }
 0x71d   :  { %8898 = vmatmul.mubr.msk.f32.vlgmr.msra.gmra.mrb[44].mxu1 %vm5306_vm14, %v8824_v36  ;;  %v6298_v36 = vld [vmem:[%s11752_s10 + $0x8] sm:$0xff] }
 0x71e   :  { %9320 = vmatpush3.bf16.msra.mxu1 %v9317_v59  ;;  %8908 = vmatprep.mubr.msk.f32.mxu1 %vm5306_vm14, %v5268_v38  ;;  %v9352_v40 = vpack.c.bf16 %v6298_v36, %v6297_v35  ;;  %v9364_v59 = vpack.c.bf16 %v7919_v56, %v7918_v55  ;;  %v7945_v36 = vld [vmem:[%s11752_s10 + $0x110] sm:$0xff]  ;;  %v7961_v55 = vld [vmem:[%s11752_s10 + $0x178] sm:$0xff] }
 0x71f   :  { %9322 = vmatprep.subr.bf16.mxu1 %v9321_v62 }
 0x722   :  { %9324 = vmatpush3.bf16.msra.mxu1 %v9321_v62 }
 0x723   :  { %9326 = vmatprep.subr.bf16.mxu1 %v9325_v3 }
 0x725   :  { %8909 = vmatmul.mubr.msk.f32.vlgmr.msra.gmra.mrb[44].mxu1 %vm5306_vm14, %v8827_v41  ;;  %v6300_v41 = vld [vmem:[%s11752_s10 + $0x18] sm:$0xff] }
 0x726   :  { %9328 = vmatpush3.bf16.msra.mxu1 %v9325_v3  ;;  %8919 = vmatprep.mubr.msk.f32.mxu1 %vm5306_vm14, %v5278_v46  ;;  %v9355_v42 = vpack.c.bf16 %v6300_v41, %v6299_v34  ;;  %v7923_v3 = vld [vmem:[%s11752_s10 + $0x80] sm:$0xff]  ;;  %v7949_v34 = vld [vmem:[%s11752_s10 + $0x128] sm:$0xff] }
 0x727   :  { %9330 = vmatprep.subr.bf16.mxu1 %v9329_v6  ;;  %v9370_v7 = vpack.c.bf16 %v7924_v4, %v7923_v3  ;;  %v7970_v4 = vld [vmem:[%s11752_s10 + $0x1b0] sm:$0xff] }
 0x72a   :  { %9332 = vmatpush3.bf16.msra.mxu1 %v9329_v6 }
 0x72b   :  { %9334 = vmatprep.subr.bf16.mxu1 %v9333_v9 }
 0x72d   :  { %8920 = vmatmul.mubr.msk.f32.vlgmr.msra.gmra.mrb[44].mxu1 %vm5306_vm14, %v8830_v45  ;;  %v7914_v45 = vld [vmem:[%s11752_s10 + $0x48] sm:$0xff] }
 0x72e   :  { %9336 = vmatpush3.bf16.msra.mxu1 %v9333_v9  ;;  %8930 = vmatprep.mubr.msk.f32.mxu1 %vm5306_vm14, %v5288_v53  ;;  %v9358_v48 = vpack.c.bf16 %v7914_v45, %v7913_v44  ;;  %v7926_v9 = vld [vmem:[%s11752_s10 + $0x98] sm:$0xff]  ;;  %v7953_v44 = vld [vmem:[%s11752_s10 + $0x140] sm:$0xff]  ;;  %v7954_v45 = vld [vmem:[%s11752_s10 + $0x148] sm:$0xff] }
 0x72f   :  { %9338 = vmatprep.subr.bf16.mxu1 %v9337_v12 }
 0x732   :  { %9340 = vmatpush3.bf16.msra.mxu1 %v9337_v12  ;;  %v9373_v12 = vpack.c.bf16 %v7926_v9, %v7925_v8  ;;  %v7974_v8 = vld [vmem:[%s11752_s10 + $0x1c8] sm:$0xff] }
 0x733   :  { %9342 = vmatprep.subr.bf16.mxu1 %v11176_v49 }
 0x735   :  { %8931 = vmatmul.mubr.msk.f32.vlgmr.msra.gmra.mrb[44].mxu1 %vm5306_vm14, %v8833_v51  ;;  %v7916_v51 = vld [vmem:[%s11752_s10 + $0x58] sm:$0xff] }
 0x736   :  { %9344 = vmatpush3.bf16.msra.mxu1 %v11176_v49  ;;  %8937 = vmatprep.mubr.msk.f32.mxu1 %vm3688_vm11, %v6088_v13  ;;  %v6091_v49 = vld [vmem:[%s11751_s9 + $0x18] sm:$0xff]  ;;  %v9361_v54 = vpack.c.bf16 %v7916_v51, %v7915_v50  ;;  %v7928_v13 = vld [vmem:[%s11752_s10 + $0xa0] sm:$0xff] }
 0x737   :  { %9345 = vmatprep.subr.bf16.mxu1 %v9648_v0  ;;  %v7958_v51 = vld [vmem:[%s11752_s10 + $0x160] sm:$0xff] }
 0x739   :  { %8938 = vmatmul.mubr.msk.f32.vlgmr.msra.gmra.mrb[46].mxu1 %vm3688_vm11, %v6089_v63 }
 0x73a   :  { %8940 = vmatprep.mubr.msk.f32.mxu1 %vm3688_vm11, %v6090_v17  ;;  %9347 = vmatpush3.bf16.msra.mxu1 %v9346_v16  ;;  %v9376_v16 = vpack.c.bf16 %v7929_v14, %v7928_v13  ;;  %v7930_v17 = vld [vmem:[%s11752_s10 + $0xb0] sm:$0xff]  ;;  %v7978_v14 = vld [vmem:[%s11752_s10 + $0x1e0] sm:$0xff] }
 0x73b   :  { %9348 = vmatprep.subr.bf16.mxu1 %v9648_v0 }
 0x73d   :  { %8941 = vmatmul.mubr.msk.f32.gmra.mrb[48].mxu1 %vm3688_vm11, %v6091_v49  ;;  %v7931_v49 = vld [vmem:[%s11752_s10 + $0xb8] sm:$0xff] }
 0x73e   :  { %8943 = vmatprep.mubr.msk.f32.mxu1 %vm3688_vm11, %v6092_v18  ;;  %9350 = vmatpush3.bf16.msra.mxu1 %v9349_v32  ;;  %v9379_v18 = vpack.c.bf16 %v7931_v49, %v7930_v17  ;;  %v7944_v32 = vld [vmem:[%s11752_s10 + $0x108] sm:$0xff]  ;;  %v7981_v49 = vld [vmem:[%s11752_s10 + $0x1f8] sm:$0xff] }
 0x73f   :  { %9351 = vmatprep.subr.bf16.mxu1 %v9648_v0  ;;  %v9394_v35 = vpack.c.bf16 %v7944_v32, %v7943_v31 }
 0x741   :  { %8944 = vmatmul.mubr.msk.f32.gmra.mrb[50].mxu1 %vm3688_vm11, %v6093_v19  ;;  %v7933_v19 = vld [vmem:[%s11752_s10 + $0xc0] sm:$0xff] }
 0x742   :  { %8946 = vmatprep.mubr.msk.f32.mxu1 %vm3688_vm11, %v6094_v20  ;;  %v7934_v20 = vld [vmem:[%s11752_s10 + $0xc8] sm:$0xff] }
 0x745   :  { %8947 = vmatmul.mubr.msk.f32.gmra.mrb[52].mxu1 %vm3688_vm11, %v6095_v21  ;;  %v9382_v21 = vpack.c.bf16 %v7934_v20, %v7933_v19 }
 0x746   :  { %8949 = vmatprep.mubr.msk.f32.mxu1 %vm3688_vm11, %v6096_v22  ;;  %v7935_v22 = vld [vmem:[%s11752_s10 + $0xd0] sm:$0xff] }
 0x749   :  { %8950 = vmatmul.mubr.msk.f32.gmra.mrb[54].mxu1 %vm3688_vm11, %v6097_v23  ;;  %v7936_v23 = vld [vmem:[%s11752_s10 + $0xd8] sm:$0xff] }
 0x74a   :  { %8952 = vmatprep.mubr.msk.f32.mxu1 %vm3688_vm11, %v6098_v24  ;;  %v9385_v24 = vpack.c.bf16 %v7936_v23, %v7935_v22 }
 0x74d   :  { %8953 = vmatmul.mubr.msk.f32.gmra.mrb[56].mxu1 %vm3688_vm11, %v6099_v25  ;;  %v7938_v25 = vld [vmem:[%s11752_s10 + $0xe0] sm:$0xff] }
 0x74e   :  { %8955 = vmatprep.mubr.msk.f32.mxu1 %vm3688_vm11, %v6100_v26  ;;  %v7939_v26 = vld [vmem:[%s11752_s10 + $0xe8] sm:$0xff] }
 0x751   :  { %8956 = vmatmul.mubr.msk.f32.gmra.mrb[58].mxu1 %vm3688_vm11, %v6101_v27  ;;  %v9388_v27 = vpack.c.bf16 %v7939_v26, %v7938_v25 }
 0x752   :  { %8958 = vmatprep.mubr.msk.f32.mxu1 %vm3688_vm11, %v6102_v28  ;;  %v7940_v28 = vld [vmem:[%s11752_s10 + $0xf0] sm:$0xff] }
 0x755   :  { %8959 = vmatmul.mubr.msk.f32.gmra.mrb[60].mxu1 %vm3688_vm11, %v6103_v29  ;;  %v7941_v29 = vld [vmem:[%s11752_s10 + $0xf8] sm:$0xff] }
 0x756   :  { %8969 = vmatprep.mubr.msk.f32.mxu1 %vm9649_vm15, %v9650_v33  ;;  %v9391_v30 = vpack.c.bf16 %v7941_v29, %v7940_v28 }
 0x808   :  { %v8932_v37 = vpop.f32.mrb[44].mxu1 }
 0x809   :  { %6087 = vst.msk [vmem:[%s11753_s11 + $0x8] sm:$0xff] %vm6085_vm0, %v8932_v37  ;;  %v6074_v39 = vpop.f32.mrb[45].mxu1  ;;  %v7946_v37 = vld [vmem:[%s11752_s10 + $0x118] sm:$0xff] }
 0x80a   :  { %6086 = vst.msk [vmem:[%s11753_s11] sm:$0xff] %vm6085_vm0, %v6074_v39  ;;  %v9397_v39 = vpack.c.bf16 %v7946_v37, %v7945_v36 }
 0x80c   :  { %v8939_v43 = vpop.f32.mrb[46].mxu1 }
 0x80d   :  { %8970 = vmatmul.mubr.msk.f32.vlgmr.msra.gmra.mrb[62].mxu1 %vm5306_vm14, %v8939_v43  ;;  %v6218_v38 = vpop.f32.mrb[47].mxu1  ;;  %v7950_v43 = vld [vmem:[%s11752_s10 + $0x130] sm:$0xff] }
 0x80e   :  { %9353 = vmatpush3.bf16.msra.mxu1 %v9352_v40  ;;  %8980 = vmatprep.mubr.msk.f32.mxu1 %vm9649_vm15, %v9650_v33  ;;  %v7948_v40 = vld [vmem:[%s11752_s10 + $0x120] sm:$0xff] }
 0x80f   :  { %9354 = vmatprep.subr.bf16.mxu1 %v9648_v0  ;;  %v9400_v41 = vpack.c.bf16 %v7949_v34, %v7948_v40 }
 0x810   :  { %v8942_v47 = vpop.f32.mrb[48].mxu1 }
 0x811   :  { %v6228_v46 = vpop.f32.mrb[49].mxu1 }
 0x812   :  { %9356 = vmatpush3.bf16.msra.mxu1 %v9355_v42 }
 0x813   :  { %9357 = vmatprep.subr.bf16.mxu1 %v9648_v0 }
 0x814   :  { %v8945_v52 = vpop.f32.mrb[50].mxu1 }
 0x815   :  { %8981 = vmatmul.mubr.msk.f32.vlgmr.msra.gmra.mrb[62].mxu1 %vm5306_vm14, %v6218_v38  ;;  %v6238_v53 = vpop.f32.mrb[51].mxu1  ;;  %v7951_v38 = vld [vmem:[%s11752_s10 + $0x138] sm:$0xff] }
 0x816   :  { %9359 = vmatpush3.bf16.msra.mxu1 %v9358_v48  ;;  %8991 = vmatprep.mubr.msk.f32.mxu1 %vm9649_vm15, %v9650_v33  ;;  %v9403_v42 = vpack.c.bf16 %v7951_v38, %v7950_v43  ;;  %v7956_v48 = vld [vmem:[%s11752_s10 + $0x158] sm:$0xff] }
 0x817   :  { %9360 = vmatprep.subr.bf16.mxu1 %v9648_v0 }
 0x818   :  { %v11496_v57 = vpop.f32.mrb[52].mxu1 }
 0x819   :  { %v6248_v58 = vpop.f32.mrb[53].mxu1 }
 0x81a   :  { %9362 = vmatpush3.bf16.msra.mxu1 %v9361_v54  ;;  %v7960_v54 = vld [vmem:[%s11752_s10 + $0x170] sm:$0xff] }
 0x81b   :  { %9363 = vmatprep.subr.bf16.mxu1 %v9648_v0  ;;  %v9415_v56 = vpack.c.bf16 %v7961_v55, %v7960_v54 }
 0x81c   :  { %v11505_v62 = vpop.f32.mrb[54].mxu1 }
 0x81d   :  { %8992 = vmatmul.mubr.msk.f32.vlgmr.msra.gmra.mrb[62].mxu1 %vm5306_vm14, %v6228_v46  ;;  %v11508_v1 = vpop.f32.mrb[55].mxu1  ;;  %v7955_v46 = vld [vmem:[%s11752_s10 + $0x150] sm:$0xff] }
 0x81e   :  { %9365 = vmatpush3.bf16.msra.mxu1 %v9364_v59  ;;  %9002 = vmatprep.mubr.msk.f32.mxu1 %vm9649_vm15, %v9650_v33  ;;  %v9409_v50 = vpack.c.bf16 %v7956_v48, %v7955_v46 }
 0x81f   :  { %9366 = vmatprep.subr.bf16.mxu1 %v9648_v0 }
 0x820   :  { %v11519_v5 = vpop.f32.mrb[56].mxu1 }
 0x821   :  { %v11521_v6 = vpop.f32.mrb[57].mxu1 }
 0x822   :  { %9368 = vmatpush3.bf16.msra.mxu1 %v9367_v2  ;;  %v7969_v2 = vld [vmem:[%s11752_s10 + $0x1a8] sm:$0xff] }
 0x823   :  { %9369 = vmatprep.subr.bf16.mxu1 %v9648_v0 }
 0x824   :  { %v11530_v10 = vpop.f32.mrb[58].mxu1 }
 0x825   :  { %9003 = vmatmul.mubr.msk.f32.vlgmr.msra.gmra.mrb[62].mxu1 %vm5306_vm14, %v8942_v47  ;;  %v11533_v11 = vpop.f32.mrb[59].mxu1  ;;  %v9406_v47 = vpack.c.bf16 %v7954_v45, %v7953_v44 }
 0x826   :  { %9371 = vmatpush3.bf16.msra.mxu1 %v9370_v7  ;;  %9013 = vmatprep.mubr.msk.f32.mxu1 %vm9649_vm15, %v9650_v33  ;;  %v7973_v7 = vld [vmem:[%s11752_s10 + $0x1c0] sm:$0xff] }
 0x827   :  { %9372 = vmatprep.subr.bf16.mxu1 %v9648_v0  ;;  %v9430_v9 = vpack.c.bf16 %v7974_v8, %v7973_v7 }
 0x828   :  { %v11544_v15 = vpop.f32.mrb[60].mxu1 }
 0x829   :  { %v11546_v63 = vpop.f32.mrb[61].mxu1 }
 0x82a   :  { %9374 = vmatpush3.bf16.msra.mxu1 %v9373_v12  ;;  %v7976_v12 = vld [vmem:[%s11752_s10 + $0x1d8] sm:$0xff] }
 0x82b   :  { %9375 = vmatprep.subr.bf16.mxu1 %v9648_v0 }
 0x82d   :  { %9014 = vmatmul.mubr.msk.f32.vlgmr.msra.gmra.mrb[62].mxu1 %vm5306_vm14, %v6238_v53 }
 0x82e   :  { %9377 = vmatpush3.bf16.msra.mxu1 %v9376_v16  ;;  %9024 = vmatprep.mubr.msk.f32.mxu1 %vm9649_vm15, %v9650_v33  ;;  %v7979_v16 = vld [vmem:[%s11752_s10 + $0x1e8] sm:$0xff] }
 0x82f   :  { %9378 = vmatprep.subr.bf16.mxu1 %v9648_v0  ;;  %v9436_v17 = vpack.c.bf16 %v7979_v16, %v7978_v14 }
 0x832   :  { %9380 = vmatpush3.bf16.msra.mxu1 %v9379_v18 }
 0x833   :  { %9381 = vmatprep.subr.bf16.mxu1 %v9648_v0 }
 0x835   :  { %9025 = vmatmul.mubr.msk.f32.vlgmr.msra.gmra.mrb[62].mxu1 %vm5306_vm14, %v8945_v52  ;;  %v7959_v52 = vld [vmem:[%s11752_s10 + $0x168] sm:$0xff] }
 0x836   :  { %9383 = vmatpush3.bf16.msra.mxu1 %v9382_v21  ;;  %9035 = vmatprep.mubr.msk.f32.mxu1 %vm9649_vm15, %v9650_v33  ;;  %v9412_v53 = vpack.c.bf16 %v7959_v52, %v7958_v51 }
 0x837   :  { %9384 = vmatprep.subr.bf16.mxu1 %v9648_v0 }
 0x83a   :  { %9386 = vmatpush3.bf16.msra.mxu1 %v9385_v24 }
 0x83b   :  { %9387 = vmatprep.subr.bf16.mxu1 %v9648_v0 }
 0x83d   :  { %9036 = vmatmul.mubr.msk.f32.vlgmr.msra.gmra.mrb[62].mxu1 %vm5306_vm14, %v6248_v58  ;;  %v7964_v58 = vld [vmem:[%s11752_s10 + $0x188] sm:$0xff] }
 0x83e   :  { %9389 = vmatpush3.bf16.msra.mxu1 %v9388_v27  ;;  %9046 = vmatprep.mubr.msk.f32.mxu1 %vm9649_vm15, %v9650_v33 }
 0x83f   :  { %9390 = vmatprep.subr.bf16.mxu1 %v9648_v0 }
 0x842   :  { %9392 = vmatpush3.bf16.msra.mxu1 %v9391_v30 }
 0x843   :  { %9393 = vmatprep.subr.bf16.mxu1 %v9648_v0 }
 0x845   :  { %9047 = vmatmul.mubr.msk.f32.vlgmr.msra.gmra.mrb[62].mxu1 %vm5306_vm14, %v11496_v57  ;;  %v7963_v57 = vld [vmem:[%s11752_s10 + $0x180] sm:$0xff] }
 0x846   :  { %9395 = vmatpush3.bf16.msra.mxu1 %v9394_v35  ;;  %9057 = vmatprep.mubr.msk.f32.mxu1 %vm9649_vm15, %v9650_v33  ;;  %v9418_v59 = vpack.c.bf16 %v7964_v58, %v7963_v57 }
 0x847   :  { %9396 = vmatprep.subr.bf16.mxu1 %v9648_v0 }
 0x84a   :  { %9398 = vmatpush3.bf16.msra.mxu1 %v9397_v39 }
 0x84b   :  { %9399 = vmatprep.subr.bf16.mxu1 %v9648_v0 }
 0x84d   :  { %9058 = vmatmul.mubr.msk.f32.vlgmr.msra.gmra.mrb[62].mxu1 %vm5306_vm14, %v11508_v1  ;;  %v7968_v1 = vld [vmem:[%s11752_s10 + $0x1a0] sm:$0xff] }
 0x84e   :  { %9401 = vmatpush3.bf16.msra.mxu1 %v9400_v41  ;;  %9068 = vmatprep.mubr.msk.f32.mxu1 %vm9649_vm15, %v9650_v33  ;;  %v9424_v3 = vpack.c.bf16 %v7969_v2, %v7968_v1 }
 0x84f   :  { %9402 = vmatprep.subr.bf16.mxu1 %v9648_v0 }
 0x852   :  { %9404 = vmatpush3.bf16.msra.mxu1 %v9403_v42 }
 0x853   :  { %9405 = vmatprep.subr.bf16.mxu1 %v9648_v0 }
 0x855   :  { %9069 = vmatmul.mubr.msk.f32.vlgmr.msra.gmra.mrb[62].mxu1 %vm5306_vm14, %v11505_v62  ;;  %v9421_v62 = vpack.c.bf16 %v7966_v61, %v7965_v60 }
 0x856   :  { %9407 = vmatpush3.bf16.msra.mxu1 %v9406_v47  ;;  %9079 = vmatprep.mubr.msk.f32.mxu1 %vm9649_vm15, %v9650_v33 }
 0x857   :  { %9408 = vmatprep.subr.bf16.mxu1 %v9648_v0 }
 0x85a   :  { %9410 = vmatpush3.bf16.msra.mxu1 %v9409_v50 }
 0x85b   :  { %9411 = vmatprep.subr.bf16.mxu1 %v9648_v0 }
 0x85d   :  { %9080 = vmatmul.mubr.msk.f32.vlgmr.msra.gmra.mrb[62].mxu1 %vm5306_vm14, %v11521_v6 }
 0x85e   :  { %9413 = vmatpush3.bf16.msra.mxu1 %v9412_v53  ;;  %9090 = vmatprep.mubr.msk.f32.mxu1 %vm9649_vm15, %v9650_v33 }
 0x85f   :  { %9414 = vmatprep.subr.bf16.mxu1 %v9648_v0 }
 0x862   :  { %9416 = vmatpush3.bf16.msra.mxu1 %v9415_v56 }
 0x863   :  { %9417 = vmatprep.subr.bf16.mxu1 %v9648_v0 }
 0x865   :  { %9091 = vmatmul.mubr.msk.f32.vlgmr.msra.gmra.mrb[62].mxu1 %vm5306_vm14, %v11519_v5  ;;  %v7971_v5 = vld [vmem:[%s11752_s10 + $0x1b8] sm:$0xff] }
 0x866   :  { %9419 = vmatpush3.bf16.msra.mxu1 %v9418_v59  ;;  %9101 = vmatprep.mubr.msk.f32.mxu1 %vm9649_vm15, %v9650_v33  ;;  %v9427_v6 = vpack.c.bf16 %v7971_v5, %v7970_v4 }
 0x867   :  { %9420 = vmatprep.subr.bf16.mxu1 %v9648_v0 }
 0x86a   :  { %9422 = vmatpush3.bf16.msra.mxu1 %v9421_v62 }
 0x86b   :  { %9423 = vmatprep.subr.bf16.mxu1 %v9648_v0 }
 0x86d   :  { %9102 = vmatmul.mubr.msk.f32.vlgmr.msra.gmra.mrb[62].mxu1 %vm5306_vm14, %v11533_v11  ;;  %v7975_v11 = vld [vmem:[%s11752_s10 + $0x1d0] sm:$0xff] }
 0x86e   :  { %9425 = vmatpush3.bf16.msra.mxu1 %v9424_v3  ;;  %9112 = vmatprep.mubr.msk.f32.mxu1 %vm9649_vm15, %v9650_v33  ;;  %v9433_v13 = vpack.c.bf16 %v7976_v12, %v7975_v11 }
 0x86f   :  { %9426 = vmatprep.subr.bf16.mxu1 %v9648_v0 }
 0x872   :  { %9428 = vmatpush3.bf16.msra.mxu1 %v9427_v6 }
 0x873   :  { %9429 = vmatprep.subr.bf16.mxu1 %v9648_v0 }
 0x875   :  { %9113 = vmatmul.mubr.msk.f32.vlgmr.msra.gmra.mrb[62].mxu1 %vm5306_vm14, %v11530_v10  ;;  %v7980_v10 = vld [vmem:[%s11752_s10 + $0x1f0] sm:$0xff] }
 0x876   :  { %9431 = vmatpush3.bf16.msra.mxu1 %v9430_v9  ;;  %9123 = vmatprep.mubr.msk.f32.mxu1 %vm9649_vm15, %v9650_v33  ;;  %v9439_v18 = vpack.c.bf16 %v7981_v49, %v7980_v10 }
 0x877   :  { %9432 = vmatprep.subr.bf16.mxu1 %v9648_v0 }
 0x87a   :  { %9434 = vmatpush3.bf16.msra.mxu1 %v9433_v13 }
 0x87b   :  { %9435 = vmatprep.subr.bf16.mxu1 %v9648_v0 }
 0x87d   :  { %9124 = vmatmul.mubr.msk.f32.vlgmr.msra.gmra.mrb[62].mxu1 %vm5306_vm14, %v11546_v63 }
 0x87e   :  { %9437 = vmatpush3.bf16.msra.mxu1 %v9436_v17  ;;  %9134 = vmatprep.mubr.msk.f32.mxu1 %vm9649_vm15, %v9650_v33 }
 0x87f   :  { %9438 = vmatprep.subr.bf16.mxu1 %v9648_v0 }
 0x882   :  { %9440 = vmatpush3.bf16.msra.mxu1 %v9439_v18 }
 0x885   :  { %9135 = vmatmul.mubr.msk.f32.vlgmr.msra.gmra.mrb[62].mxu1 %vm5306_vm14, %v11544_v15 }
 0x958   :  { %v7553_v19 = vpop.f32.mrb[62].mxu1 }
 0x959   :  { %7559 = vst.msk [vmem:[%s11754_s12] sm:$0xff] %vm7558_vm1, %v7553_v19  ;;  %v9136_v20 = vpop.f32.mrb[63].mxu1 }

</bundles_post_ra>
